<compile_context>
chip_gen: v7x
topology: tpu7x:2x2x1
jax: 0.10.0
libtpu: 0.0.40
codegen_flags: <defaults>
</compile_context>

<pallas_src>
import functools

import jax
import jax.numpy as jnp
from jax.experimental import pallas as pl
from jax.experimental.pallas import tpu as pltpu

N_HEADS = 2         # synthetic "model" returns a list of 2 outputs (VAT3d_V1 expects a list)
N_CLASSES = 4
EP = 1e-8           # Binary_dice_loss ep
EPS_NORM = 1e-8     # _l2_normalize eps
N_STAT_SLOTS = 8    # padded per-block stats column (sublane aligned)


def _head_pairs(nheads):
    return [(i, j) for i in range(nheads) for j in range(nheads) if i != j]


# ----------------------------------------------------------------------------
# in-kernel helpers (trace-time Python; data stays in vregs, layout = (C, Mb))
# ----------------------------------------------------------------------------
def _linear_heads(v, wT, b):
    """z = W^T v + b for all heads at once.

    v: (cin, mb) pixels on lanes; wT: (H*nc, cin); b: (H*nc, 1).
    Unrolled VPU broadcast-FMA over the 4-wide contraction (no MXU padding).
    """
    cin = v.shape[0]
    z = jnp.zeros((wT.shape[0], v.shape[1]), jnp.float32) + b
    for k in range(cin):
        z = z + wT[:, k:k + 1] * v[k:k + 1, :]
    return z


def _softmax_rows(z):
    """softmax over the small static class axis (sublanes) of z: (nc, mb)."""
    nc = z.shape[0]
    zmax = z[0:1, :]
    for c in range(1, nc):
        zmax = jnp.maximum(zmax, z[c:c + 1, :])
    e = jnp.exp(z - zmax)
    s = e[0:1, :]
    for c in range(1, nc):
        s = s + e[c:c + 1, :]
    return e / s


def _sum_all(a):
    """full reduce (r, mb) -> (1, 1): sublane reduce then lane reduce."""
    return jnp.sum(jnp.sum(a, axis=0, keepdims=True), axis=1, keepdims=True)


def _forward_heads(x, xin, wT, b, nheads, nc):
    z_clean = _linear_heads(x, wT, b)     # pred  = softmax(model(x))
    z_pert = _linear_heads(xin, wT, b)    # p_hat = softmax(model(x + s*d))
    preds = [_softmax_rows(z_clean[h * nc:(h + 1) * nc, :]) for h in range(nheads)]
    phats = [_softmax_rows(z_pert[h * nc:(h + 1) * nc, :]) for h in range(nheads)]
    return preds, phats


# ----------------------------------------------------------------------------
# Kernel 1: fused perturb + conv + softmax + Binary-dice reductions
#   emits per-block (per-sample) partial sums: I_ij, sum(p_hat_i), sum(pred_j)
# ----------------------------------------------------------------------------
def _dice_stats_kernel(inv_ref, x_ref, d_ref, wT_ref, b_ref, stats_ref, *,
                       scale, nheads, nc):
    i = pl.program_id(0)
    x = x_ref[...]                                 # (cin, mb)
    s = scale * inv_ref[i]                         # fold per-sample 1/||d|| in
    xin = x + s * d_ref[...]
    preds, phats = _forward_heads(x, xin, wT_ref[...], b_ref[...], nheads, nc)

    pieces = []
    for (hi, hj) in _head_pairs(nheads):
        pieces.append(_sum_all(phats[hi] * preds[hj]))        # I_ij
    for h in range(nheads):
        pieces.append(_sum_all(phats[h]))                     # sum p_hat_i
    for h in range(nheads):
        pieces.append(_sum_all(preds[h]))                     # sum pred_j
    while len(pieces) < N_STAT_SLOTS:
        pieces.append(jnp.zeros((1, 1), jnp.float32))
    col = jnp.concatenate(pieces, axis=0)                     # (8, 1)
    stats_ref[...] = col.reshape(1, N_STAT_SLOTS, 1)


def dice_stats(x_t, dir_t, wT_all, b_all, inv_norm, *, scale, nheads, nc, ns):
    cin, m = x_t.shape
    mb = m // ns
    assert mb % 128 == 0
    kern = functools.partial(_dice_stats_kernel, scale=float(scale),
                             nheads=nheads, nc=nc)
    raw = pl.pallas_call(
        kern,
        out_shape=jax.ShapeDtypeStruct((ns, N_STAT_SLOTS, 1), jnp.float32),
        grid=(ns,),
        in_specs=[
            pl.BlockSpec(memory_space=pltpu.MemorySpace.SMEM),        # inv_norm (ns,)
            pl.BlockSpec((cin, mb), lambda i: (0, i)),                # x
            pl.BlockSpec((cin, mb), lambda i: (0, i)),                # d (direction)
            pl.BlockSpec((nheads * nc, cin), lambda i: (0, 0)),       # W^T (all heads)
            pl.BlockSpec((nheads * nc, 1), lambda i: (0, 0)),         # bias
        ],
        out_specs=pl.BlockSpec((1, N_STAT_SLOTS, 1), lambda i: (i, 0, 0)),
        compiler_params=pltpu.CompilerParams(dimension_semantics=("parallel",)),
    )(inv_norm, x_t, dir_t, wT_all, b_all)
    return jnp.sum(raw.reshape(ns, N_STAT_SLOTS), axis=0)    # global sums (tiny)


# ----------------------------------------------------------------------------
# Kernel 2: analytic VAT gradient wrt d (linear model) + per-sample ||grad||^2
#   dL/dp_i  = A_i - sum_{j!=i} B_ij * pred_j       (Binary dice backward)
#   dL/dz_i  = p_i * (dL/dp_i - sum_c dL/dp_i p_i)  (softmax backward)
#   dL/dd    = xi * sum_i W_i @ dL/dz_i             (1x1x1-conv backward)
# ----------------------------------------------------------------------------
def _vat_grad_kernel(inv_ref, coef_ref, x_ref, d_ref, wT_ref, w_ref, b_ref,
                     gx_ref, ss_ref, *, xi, nheads, nc):
    i = pl.program_id(0)
    x = x_ref[...]                                  # (cin, mb)
    s = xi * inv_ref[i]
    xin = x + s * d_ref[...]
    preds, phats = _forward_heads(x, xin, wT_ref[...], b_ref[...], nheads, nc)

    pairs = _head_pairs(nheads)
    w = w_ref[...]                                  # (cin, H*nc)
    gx = jnp.zeros_like(x)
    for hi in range(nheads):
        gp = jnp.zeros_like(phats[hi]) + coef_ref[hi]               # A_i
        for hj in range(nheads):
            if hj != hi:
                bidx = nheads + pairs.index((hi, hj))
                gp = gp - coef_ref[bidx] * preds[hj]                # - B_ij * pred_j
        inner = jnp.sum(gp * phats[hi], axis=0, keepdims=True)      # (1, mb)
        gz = phats[hi] * (gp - inner)                               # (nc, mb)
        for c in range(nc):                                         # VPU outer products
            col = w[:, hi * nc + c: hi * nc + c + 1]                # (cin, 1)
            gx = gx + col * gz[c:c + 1, :]
    gx = xi * gx                                    # chain rule for x + xi*d
    gx_ref[...] = gx                                # lane-dense (cin, mb) store
    ssq = _sum_all(gx * gx)                         # per-sample ||grad||^2
    ss_ref[...] = jnp.broadcast_to(ssq, (N_STAT_SLOTS, 1)).reshape(1, N_STAT_SLOTS, 1)


def vat_grad(x_t, dir_t, wT_all, w_all, b_all, inv_norm, coef, *, xi, nheads, nc, ns):
    cin, m = x_t.shape
    mb = m // ns
    assert mb % 128 == 0
    kern = functools.partial(_vat_grad_kernel, xi=float(xi), nheads=nheads, nc=nc)
    gx, ss = pl.pallas_call(
        kern,
        out_shape=(jax.ShapeDtypeStruct((cin, m), jnp.float32),
                   jax.ShapeDtypeStruct((ns, N_STAT_SLOTS, 1), jnp.float32)),
        grid=(ns,),
        in_specs=[
            pl.BlockSpec(memory_space=pltpu.MemorySpace.SMEM),        # inv_norm (ns,)
            pl.BlockSpec(memory_space=pltpu.MemorySpace.SMEM),        # coef (A_i, B_ij)
            pl.BlockSpec((cin, mb), lambda i: (0, i)),                # x
            pl.BlockSpec((cin, mb), lambda i: (0, i)),                # d (direction)
            pl.BlockSpec((nheads * nc, cin), lambda i: (0, 0)),       # W^T
            pl.BlockSpec((cin, nheads * nc), lambda i: (0, 0)),       # W
            pl.BlockSpec((nheads * nc, 1), lambda i: (0, 0)),         # bias
        ],
        out_specs=(pl.BlockSpec((cin, mb), lambda i: (0, i)),
                   pl.BlockSpec((1, N_STAT_SLOTS, 1), lambda i: (i, 0, 0))),
        compiler_params=pltpu.CompilerParams(dimension_semantics=("parallel",)),
    )(inv_norm, coef, x_t, dir_t, wT_all, w_all, b_all)
    return gx, ss[:, 0, 0]


# ----------------------------------------------------------------------------
# VAT3d_V1 forward (tiny scalar glue in JAX; all heavy work in the 2 kernels)
# ----------------------------------------------------------------------------
def vat3d_loss(x, w_heads, b_heads, key, *, xi=10.0, epi=6.0, ip=1):
    n, cin, dd, hh, ww = x.shape
    mp = dd * hh * ww
    m = n * mp
    nheads = len(w_heads)
    nc = w_heads[0].shape[1]
    pairs = _head_pairs(nheads)

    # one-time layout change: channels on sublanes, sample-major pixels on lanes
    x_t = jnp.transpose(x, (1, 0, 2, 3, 4)).reshape(cin, m).astype(jnp.float32)
    wT_all = jnp.concatenate([w.T for w in w_heads], axis=0)              # (H*nc, cin)
    w_all = jnp.concatenate(list(w_heads), axis=1)                        # (cin, H*nc)
    b_all = jnp.concatenate([b.reshape(nc, 1) for b in b_heads], axis=0)  # (H*nc, 1)

    # d = rand(x.shape) - 0.5 ; d = _l2_normalize(d)   (kept as direction + 1/(||d||+eps))
    # TODO(synk): torch draws the noise in NCDHW order; here it is drawn directly in
    # the flat (C, N*DHW) layout -- same distribution, different sample values.
    dir_t = jax.random.uniform(key, (cin, m), dtype=jnp.float32) - 0.5
    ssq0 = jnp.sum(dir_t.reshape(cin, n, mp) ** 2, axis=(0, 2))           # per sample
    inv_norm = 1.0 / (jnp.sqrt(ssq0) + EPS_NORM)

    def unpack(st):
        npair = len(pairs)
        I = [st[k] for k in range(npair)]
        Sp = [st[npair + h] for h in range(nheads)]
        St = [st[npair + nheads + h] for h in range(nheads)]
        return I, Sp, St

    for _ in range(ip):
        st = dice_stats(x_t, dir_t, wT_all, b_all, inv_norm,
                        scale=xi, nheads=nheads, nc=nc, ns=n)
        I, Sp, St = unpack(st)
        A, B = [], []
        for h in range(nheads):
            a = jnp.float32(0.0)
            for k, (pi, pj) in enumerate(pairs):
                if pi == h:
                    U = Sp[pi] + St[pj] + EP
                    a = a + (2.0 * I[k] + EP) / (U * U)
            A.append(a)
        for k, (pi, pj) in enumerate(pairs):
            U = Sp[pi] + St[pj] + EP
            B.append(2.0 / U)
        coef = jnp.stack(A + B).astype(jnp.float32)
        # d = _l2_normalize(d.grad)  (direction written once to HBM, norm folded)
        dir_t, ssq = vat_grad(x_t, dir_t, wT_all, w_all, b_all, inv_norm, coef,
                              xi=xi, nheads=nheads, nc=nc, ns=n)
        inv_norm = 1.0 / (jnp.sqrt(ssq) + EPS_NORM)

    # lds = sum_{i != j} Binary_dice_loss(softmax(model(x + epi*d)[i]), pred[j])
    st = dice_stats(x_t, dir_t, wT_all, b_all, inv_norm,
                    scale=epi, nheads=nheads, nc=nc, ns=n)
    I, Sp, St = unpack(st)
    lds = jnp.float32(0.0)
    for k, (pi, pj) in enumerate(pairs):
        U = Sp[pi] + St[pj] + EP
        lds = lds + (1.0 - (2.0 * I[k] + EP) / U)
    return lds


if __name__ == "__main__":
    key = jax.random.PRNGKey(0)
    kx, kd, kw0, kb0, kw1, kb1 = jax.random.split(key, 6)

    n, cin, d3, h3, w3 = 2, 4, 8, 8, 8          # small NCDHW input (3-D volumes)
    x = jax.random.normal(kx, (n, cin, d3, h3, w3), dtype=jnp.float32)

    # deterministic synthetic "model": two 1x1x1-conv heads, cin -> 4 classes
    w_heads = [0.1 * jax.random.normal(kw0, (cin, N_CLASSES), dtype=jnp.float32),
               0.1 * jax.random.normal(kw1, (cin, N_CLASSES), dtype=jnp.float32)]
    b_heads = [0.1 * jax.random.normal(kb0, (N_CLASSES,), dtype=jnp.float32),
               0.1 * jax.random.normal(kb1, (N_CLASSES,), dtype=jnp.float32)]

    loss_fn = jax.jit(lambda xx, kk: vat3d_loss(xx, w_heads, b_heads, kk,
                                                xi=10.0, epi=6.0, ip=1))
    lds = loss_fn(x, kd)
    jax.block_until_ready(lds)
    print("KERNEL_OK")
</pallas_src>

<mosaic_0001>
module attributes {stable_mosaic.version = 11 : i64} {
  func.func @_dice_stats_kernel(%arg0: i32, %arg1: memref<2xf32, #tpu.memory_space<smem>>, %arg2: memref<4x512xf32, #tpu.memory_space<vmem>>, %arg3: memref<4x512xf32, #tpu.memory_space<vmem>>, %arg4: memref<8x4xf32, #tpu.memory_space<vmem>>, %arg5: memref<8x1xf32, #tpu.memory_space<vmem>>, %arg6: memref<1x8x1xf32, #tpu.memory_space<vmem>>) attributes {dimension_semantics = [#tpu.dimension_semantics<parallel>], iteration_bounds = array<i64: 2>, scalar_prefetch = 0 : i64, scratch_operands = 0 : i64, tpu.core_type = #tpu.core_type<tc>, window_params = [{transform_indices = @transform_0, window_bounds = array<i64: 2>}, {transform_indices = @transform_1, window_bounds = array<i64: 4, 512>}, {transform_indices = @transform_2, window_bounds = array<i64: 4, 512>}, {pipeline_mode = #tpu.pipeline_mode<synchronous>, transform_indices = @transform_3, window_bounds = array<i64: 8, 4>}, {pipeline_mode = #tpu.pipeline_mode<synchronous>, transform_indices = @transform_4, window_bounds = array<i64: 8, 1>}, {transform_indices = @transform_5, window_bounds = array<i64: 1, 8, 1>}]} {
    %c0 = arith.constant 0 : index
    %c0_0 = arith.constant 0 : index
    %0 = vector.load %arg2[%c0, %c0_0] : memref<4x512xf32, #tpu.memory_space<vmem>>, vector<4x512xf32>
    %1 = arith.index_cast %arg0 : i32 to index
    %2 = memref.load %arg1[%1] : memref<2xf32, #tpu.memory_space<smem>>
    %cst = arith.constant 1.000000e+01 : f32
    %3 = arith.mulf %cst, %2 : f32
    %c0_1 = arith.constant 0 : index
    %c0_2 = arith.constant 0 : index
    %4 = vector.load %arg3[%c0_1, %c0_2] : memref<4x512xf32, #tpu.memory_space<vmem>>, vector<4x512xf32>
    %5 = vector.broadcast %3 : f32 to vector<4x512xf32>
    %6 = arith.mulf %5, %4 : vector<4x512xf32>
    %7 = arith.addf %0, %6 : vector<4x512xf32>
    %c0_3 = arith.constant 0 : index
    %c0_4 = arith.constant 0 : index
    %8 = vector.load %arg4[%c0_3, %c0_4] : memref<8x4xf32, #tpu.memory_space<vmem>>, vector<8x4xf32>
    %c0_5 = arith.constant 0 : index
    %c0_6 = arith.constant 0 : index
    %9 = vector.load %arg5[%c0_5, %c0_6] : memref<8x1xf32, #tpu.memory_space<vmem>>, vector<8x1xf32>
    %cst_7 = arith.constant 0.000000e+00 : f32
    %10 = vector.broadcast %cst_7 : f32 to vector<8x512xf32>
    %11 = vector.broadcast %9 : vector<8x1xf32> to vector<8x512xf32>
    %12 = arith.addf %10, %11 : vector<8x512xf32>
    %13 = vector.extract_strided_slice %8 {offsets = [0, 0], sizes = [8, 1], strides = [1, 1]} : vector<8x4xf32> to vector<8x1xf32>
    %14 = vector.extract_strided_slice %0 {offsets = [0, 0], sizes = [1, 512], strides = [1, 1]} : vector<4x512xf32> to vector<1x512xf32>
    %15 = vector.broadcast %13 : vector<8x1xf32> to vector<8x512xf32>
    %16 = vector.broadcast %14 : vector<1x512xf32> to vector<8x512xf32>
    %17 = arith.mulf %15, %16 : vector<8x512xf32>
    %18 = arith.addf %12, %17 : vector<8x512xf32>
    %19 = vector.extract_strided_slice %8 {offsets = [0, 1], sizes = [8, 1], strides = [1, 1]} : vector<8x4xf32> to vector<8x1xf32>
    %20 = vector.extract_strided_slice %0 {offsets = [1, 0], sizes = [1, 512], strides = [1, 1]} : vector<4x512xf32> to vector<1x512xf32>
    %21 = vector.broadcast %19 : vector<8x1xf32> to vector<8x512xf32>
    %22 = vector.broadcast %20 : vector<1x512xf32> to vector<8x512xf32>
    %23 = arith.mulf %21, %22 : vector<8x512xf32>
    %24 = arith.addf %18, %23 : vector<8x512xf32>
    %25 = vector.extract_strided_slice %8 {offsets = [0, 2], sizes = [8, 1], strides = [1, 1]} : vector<8x4xf32> to vector<8x1xf32>
    %26 = vector.extract_strided_slice %0 {offsets = [2, 0], sizes = [1, 512], strides = [1, 1]} : vector<4x512xf32> to vector<1x512xf32>
    %27 = vector.broadcast %25 : vector<8x1xf32> to vector<8x512xf32>
    %28 = vector.broadcast %26 : vector<1x512xf32> to vector<8x512xf32>
    %29 = arith.mulf %27, %28 : vector<8x512xf32>
    %30 = arith.addf %24, %29 : vector<8x512xf32>
    %31 = vector.extract_strided_slice %8 {offsets = [0, 3], sizes = [8, 1], strides = [1, 1]} : vector<8x4xf32> to vector<8x1xf32>
    %32 = vector.extract_strided_slice %0 {offsets = [3, 0], sizes = [1, 512], strides = [1, 1]} : vector<4x512xf32> to vector<1x512xf32>
    %33 = vector.broadcast %31 : vector<8x1xf32> to vector<8x512xf32>
    %34 = vector.broadcast %32 : vector<1x512xf32> to vector<8x512xf32>
    %35 = arith.mulf %33, %34 : vector<8x512xf32>
    %36 = arith.addf %30, %35 : vector<8x512xf32>
    %cst_8 = arith.constant 0.000000e+00 : f32
    %37 = vector.broadcast %cst_8 : f32 to vector<8x512xf32>
    %38 = vector.broadcast %9 : vector<8x1xf32> to vector<8x512xf32>
    %39 = arith.addf %37, %38 : vector<8x512xf32>
    %40 = vector.extract_strided_slice %8 {offsets = [0, 0], sizes = [8, 1], strides = [1, 1]} : vector<8x4xf32> to vector<8x1xf32>
    %41 = vector.extract_strided_slice %7 {offsets = [0, 0], sizes = [1, 512], strides = [1, 1]} : vector<4x512xf32> to vector<1x512xf32>
    %42 = vector.broadcast %40 : vector<8x1xf32> to vector<8x512xf32>
    %43 = vector.broadcast %41 : vector<1x512xf32> to vector<8x512xf32>
    %44 = arith.mulf %42, %43 : vector<8x512xf32>
    %45 = arith.addf %39, %44 : vector<8x512xf32>
    %46 = vector.extract_strided_slice %8 {offsets = [0, 1], sizes = [8, 1], strides = [1, 1]} : vector<8x4xf32> to vector<8x1xf32>
    %47 = vector.extract_strided_slice %7 {offsets = [1, 0], sizes = [1, 512], strides = [1, 1]} : vector<4x512xf32> to vector<1x512xf32>
    %48 = vector.broadcast %46 : vector<8x1xf32> to vector<8x512xf32>
    %49 = vector.broadcast %47 : vector<1x512xf32> to vector<8x512xf32>
    %50 = arith.mulf %48, %49 : vector<8x512xf32>
    %51 = arith.addf %45, %50 : vector<8x512xf32>
    %52 = vector.extract_strided_slice %8 {offsets = [0, 2], sizes = [8, 1], strides = [1, 1]} : vector<8x4xf32> to vector<8x1xf32>
    %53 = vector.extract_strided_slice %7 {offsets = [2, 0], sizes = [1, 512], strides = [1, 1]} : vector<4x512xf32> to vector<1x512xf32>
    %54 = vector.broadcast %52 : vector<8x1xf32> to vector<8x512xf32>
    %55 = vector.broadcast %53 : vector<1x512xf32> to vector<8x512xf32>
    %56 = arith.mulf %54, %55 : vector<8x512xf32>
    %57 = arith.addf %51, %56 : vector<8x512xf32>
    %58 = vector.extract_strided_slice %8 {offsets = [0, 3], sizes = [8, 1], strides = [1, 1]} : vector<8x4xf32> to vector<8x1xf32>
    %59 = vector.extract_strided_slice %7 {offsets = [3, 0], sizes = [1, 512], strides = [1, 1]} : vector<4x512xf32> to vector<1x512xf32>
    %60 = vector.broadcast %58 : vector<8x1xf32> to vector<8x512xf32>
    %61 = vector.broadcast %59 : vector<1x512xf32> to vector<8x512xf32>
    %62 = arith.mulf %60, %61 : vector<8x512xf32>
    %63 = arith.addf %57, %62 : vector<8x512xf32>
    %64 = vector.extract_strided_slice %36 {offsets = [0, 0], sizes = [4, 512], strides = [1, 1]} : vector<8x512xf32> to vector<4x512xf32>
    %65 = vector.extract_strided_slice %64 {offsets = [0, 0], sizes = [1, 512], strides = [1, 1]} : vector<4x512xf32> to vector<1x512xf32>
    %66 = vector.extract_strided_slice %64 {offsets = [1, 0], sizes = [1, 512], strides = [1, 1]} : vector<4x512xf32> to vector<1x512xf32>
    %67 = arith.maximumf %65, %66 : vector<1x512xf32>
    %68 = vector.extract_strided_slice %64 {offsets = [2, 0], sizes = [1, 512], strides = [1, 1]} : vector<4x512xf32> to vector<1x512xf32>
    %69 = arith.maximumf %67, %68 : vector<1x512xf32>
    %70 = vector.extract_strided_slice %64 {offsets = [3, 0], sizes = [1, 512], strides = [1, 1]} : vector<4x512xf32> to vector<1x512xf32>
    %71 = arith.maximumf %69, %70 : vector<1x512xf32>
    %72 = vector.broadcast %71 : vector<1x512xf32> to vector<4x512xf32>
    %73 = arith.subf %64, %72 : vector<4x512xf32>
    %74 = math.exp %73 : vector<4x512xf32>
    %75 = vector.extract_strided_slice %74 {offsets = [0, 0], sizes = [1, 512], strides = [1, 1]} : vector<4x512xf32> to vector<1x512xf32>
    %76 = vector.extract_strided_slice %74 {offsets = [1, 0], sizes = [1, 512], strides = [1, 1]} : vector<4x512xf32> to vector<1x512xf32>
    %77 = arith.addf %75, %76 : vector<1x512xf32>
    %78 = vector.extract_strided_slice %74 {offsets = [2, 0], sizes = [1, 512], strides = [1, 1]} : vector<4x512xf32> to vector<1x512xf32>
    %79 = arith.addf %77, %78 : vector<1x512xf32>
    %80 = vector.extract_strided_slice %74 {offsets = [3, 0], sizes = [1, 512], strides = [1, 1]} : vector<4x512xf32> to vector<1x512xf32>
    %81 = arith.addf %79, %80 : vector<1x512xf32>
    %82 = vector.broadcast %81 : vector<1x512xf32> to vector<4x512xf32>
    %83 = arith.divf %74, %82 : vector<4x512xf32>
    %84 = vector.extract_strided_slice %36 {offsets = [4, 0], sizes = [4, 512], strides = [1, 1]} : vector<8x512xf32> to vector<4x512xf32>
    %85 = vector.extract_strided_slice %84 {offsets = [0, 0], sizes = [1, 512], strides = [1, 1]} : vector<4x512xf32> to vector<1x512xf32>
    %86 = vector.extract_strided_slice %84 {offsets = [1, 0], sizes = [1, 512], strides = [1, 1]} : vector<4x512xf32> to vector<1x512xf32>
    %87 = arith.maximumf %85, %86 : vector<1x512xf32>
    %88 = vector.extract_strided_slice %84 {offsets = [2, 0], sizes = [1, 512], strides = [1, 1]} : vector<4x512xf32> to vector<1x512xf32>
    %89 = arith.maximumf %87, %88 : vector<1x512xf32>
    %90 = vector.extract_strided_slice %84 {offsets = [3, 0], sizes = [1, 512], strides = [1, 1]} : vector<4x512xf32> to vector<1x512xf32>
    %91 = arith.maximumf %89, %90 : vector<1x512xf32>
    %92 = vector.broadcast %91 : vector<1x512xf32> to vector<4x512xf32>
    %93 = arith.subf %84, %92 : vector<4x512xf32>
    %94 = math.exp %93 : vector<4x512xf32>
    %95 = vector.extract_strided_slice %94 {offsets = [0, 0], sizes = [1, 512], strides = [1, 1]} : vector<4x512xf32> to vector<1x512xf32>
    %96 = vector.extract_strided_slice %94 {offsets = [1, 0], sizes = [1, 512], strides = [1, 1]} : vector<4x512xf32> to vector<1x512xf32>
    %97 = arith.addf %95, %96 : vector<1x512xf32>
    %98 = vector.extract_strided_slice %94 {offsets = [2, 0], sizes = [1, 512], strides = [1, 1]} : vector<4x512xf32> to vector<1x512xf32>
    %99 = arith.addf %97, %98 : vector<1x512xf32>
    %100 = vector.extract_strided_slice %94 {offsets = [3, 0], sizes = [1, 512], strides = [1, 1]} : vector<4x512xf32> to vector<1x512xf32>
    %101 = arith.addf %99, %100 : vector<1x512xf32>
    %102 = vector.broadcast %101 : vector<1x512xf32> to vector<4x512xf32>
    %103 = arith.divf %94, %102 : vector<4x512xf32>
    %104 = vector.extract_strided_slice %63 {offsets = [0, 0], sizes = [4, 512], strides = [1, 1]} : vector<8x512xf32> to vector<4x512xf32>
    %105 = vector.extract_strided_slice %104 {offsets = [0, 0], sizes = [1, 512], strides = [1, 1]} : vector<4x512xf32> to vector<1x512xf32>
    %106 = vector.extract_strided_slice %104 {offsets = [1, 0], sizes = [1, 512], strides = [1, 1]} : vector<4x512xf32> to vector<1x512xf32>
    %107 = arith.maximumf %105, %106 : vector<1x512xf32>
    %108 = vector.extract_strided_slice %104 {offsets = [2, 0], sizes = [1, 512], strides = [1, 1]} : vector<4x512xf32> to vector<1x512xf32>
    %109 = arith.maximumf %107, %108 : vector<1x512xf32>
    %110 = vector.extract_strided_slice %104 {offsets = [3, 0], sizes = [1, 512], strides = [1, 1]} : vector<4x512xf32> to vector<1x512xf32>
    %111 = arith.maximumf %109, %110 : vector<1x512xf32>
    %112 = vector.broadcast %111 : vector<1x512xf32> to vector<4x512xf32>
    %113 = arith.subf %104, %112 : vector<4x512xf32>
    %114 = math.exp %113 : vector<4x512xf32>
    %115 = vector.extract_strided_slice %114 {offsets = [0, 0], sizes = [1, 512], strides = [1, 1]} : vector<4x512xf32> to vector<1x512xf32>
    %116 = vector.extract_strided_slice %114 {offsets = [1, 0], sizes = [1, 512], strides = [1, 1]} : vector<4x512xf32> to vector<1x512xf32>
    %117 = arith.addf %115, %116 : vector<1x512xf32>
    %118 = vector.extract_strided_slice %114 {offsets = [2, 0], sizes = [1, 512], strides = [1, 1]} : vector<4x512xf32> to vector<1x512xf32>
    %119 = arith.addf %117, %118 : vector<1x512xf32>
    %120 = vector.extract_strided_slice %114 {offsets = [3, 0], sizes = [1, 512], strides = [1, 1]} : vector<4x512xf32> to vector<1x512xf32>
    %121 = arith.addf %119, %120 : vector<1x512xf32>
    %122 = vector.broadcast %121 : vector<1x512xf32> to vector<4x512xf32>
    %123 = arith.divf %114, %122 : vector<4x512xf32>
    %124 = vector.extract_strided_slice %63 {offsets = [4, 0], sizes = [4, 512], strides = [1, 1]} : vector<8x512xf32> to vector<4x512xf32>
    %125 = vector.extract_strided_slice %124 {offsets = [0, 0], sizes = [1, 512], strides = [1, 1]} : vector<4x512xf32> to vector<1x512xf32>
    %126 = vector.extract_strided_slice %124 {offsets = [1, 0], sizes = [1, 512], strides = [1, 1]} : vector<4x512xf32> to vector<1x512xf32>
    %127 = arith.maximumf %125, %126 : vector<1x512xf32>
    %128 = vector.extract_strided_slice %124 {offsets = [2, 0], sizes = [1, 512], strides = [1, 1]} : vector<4x512xf32> to vector<1x512xf32>
    %129 = arith.maximumf %127, %128 : vector<1x512xf32>
    %130 = vector.extract_strided_slice %124 {offsets = [3, 0], sizes = [1, 512], strides = [1, 1]} : vector<4x512xf32> to vector<1x512xf32>
    %131 = arith.maximumf %129, %130 : vector<1x512xf32>
    %132 = vector.broadcast %131 : vector<1x512xf32> to vector<4x512xf32>
    %133 = arith.subf %124, %132 : vector<4x512xf32>
    %134 = math.exp %133 : vector<4x512xf32>
    %135 = vector.extract_strided_slice %134 {offsets = [0, 0], sizes = [1, 512], strides = [1, 1]} : vector<4x512xf32> to vector<1x512xf32>
    %136 = vector.extract_strided_slice %134 {offsets = [1, 0], sizes = [1, 512], strides = [1, 1]} : vector<4x512xf32> to vector<1x512xf32>
    %137 = arith.addf %135, %136 : vector<1x512xf32>
    %138 = vector.extract_strided_slice %134 {offsets = [2, 0], sizes = [1, 512], strides = [1, 1]} : vector<4x512xf32> to vector<1x512xf32>
    %139 = arith.addf %137, %138 : vector<1x512xf32>
    %140 = vector.extract_strided_slice %134 {offsets = [3, 0], sizes = [1, 512], strides = [1, 1]} : vector<4x512xf32> to vector<1x512xf32>
    %141 = arith.addf %139, %140 : vector<1x512xf32>
    %142 = vector.broadcast %141 : vector<1x512xf32> to vector<4x512xf32>
    %143 = arith.divf %134, %142 : vector<4x512xf32>
    %144 = arith.mulf %123, %103 : vector<4x512xf32>
    %cst_9 = arith.constant dense<0.000000e+00> : vector<512xf32>
    %145 = vector.multi_reduction <add>, %144, %cst_9 [0] : vector<4x512xf32> to vector<512xf32>
    %146 = vector.shape_cast %145 : vector<512xf32> to vector<1x512xf32>
    %cst_10 = arith.constant dense<0.000000e+00> : vector<1xf32>
    %147 = vector.multi_reduction <add>, %146, %cst_10 [1] : vector<1x512xf32> to vector<1xf32>
    %148 = vector.shape_cast %147 : vector<1xf32> to vector<1x1xf32>
    %149 = arith.mulf %143, %83 : vector<4x512xf32>
    %cst_11 = arith.constant dense<0.000000e+00> : vector<512xf32>
    %150 = vector.multi_reduction <add>, %149, %cst_11 [0] : vector<4x512xf32> to vector<512xf32>
    %151 = vector.shape_cast %150 : vector<512xf32> to vector<1x512xf32>
    %cst_12 = arith.constant dense<0.000000e+00> : vector<1xf32>
    %152 = vector.multi_reduction <add>, %151, %cst_12 [1] : vector<1x512xf32> to vector<1xf32>
    %153 = vector.shape_cast %152 : vector<1xf32> to vector<1x1xf32>
    %cst_13 = arith.constant dense<0.000000e+00> : vector<512xf32>
    %154 = vector.multi_reduction <add>, %123, %cst_13 [0] : vector<4x512xf32> to vector<512xf32>
    %155 = vector.shape_cast %154 : vector<512xf32> to vector<1x512xf32>
    %cst_14 = arith.constant dense<0.000000e+00> : vector<1xf32>
    %156 = vector.multi_reduction <add>, %155, %cst_14 [1] : vector<1x512xf32> to vector<1xf32>
    %157 = vector.shape_cast %156 : vector<1xf32> to vector<1x1xf32>
    %cst_15 = arith.constant dense<0.000000e+00> : vector<512xf32>
    %158 = vector.multi_reduction <add>, %143, %cst_15 [0] : vector<4x512xf32> to vector<512xf32>
    %159 = vector.shape_cast %158 : vector<512xf32> to vector<1x512xf32>
    %cst_16 = arith.constant dense<0.000000e+00> : vector<1xf32>
    %160 = vector.multi_reduction <add>, %159, %cst_16 [1] : vector<1x512xf32> to vector<1xf32>
    %161 = vector.shape_cast %160 : vector<1xf32> to vector<1x1xf32>
    %cst_17 = arith.constant dense<0.000000e+00> : vector<512xf32>
    %162 = vector.multi_reduction <add>, %83, %cst_17 [0] : vector<4x512xf32> to vector<512xf32>
    %163 = vector.shape_cast %162 : vector<512xf32> to vector<1x512xf32>
    %cst_18 = arith.constant dense<0.000000e+00> : vector<1xf32>
    %164 = vector.multi_reduction <add>, %163, %cst_18 [1] : vector<1x512xf32> to vector<1xf32>
    %165 = vector.shape_cast %164 : vector<1xf32> to vector<1x1xf32>
    %cst_19 = arith.constant dense<0.000000e+00> : vector<512xf32>
    %166 = vector.multi_reduction <add>, %103, %cst_19 [0] : vector<4x512xf32> to vector<512xf32>
    %167 = vector.shape_cast %166 : vector<512xf32> to vector<1x512xf32>
    %cst_20 = arith.constant dense<0.000000e+00> : vector<1xf32>
    %168 = vector.multi_reduction <add>, %167, %cst_20 [1] : vector<1x512xf32> to vector<1xf32>
    %169 = vector.shape_cast %168 : vector<1xf32> to vector<1x1xf32>
    %cst_21 = arith.constant 0.000000e+00 : f32
    %170 = vector.broadcast %cst_21 : f32 to vector<1x1xf32>
    %cst_22 = arith.constant 0.000000e+00 : f32
    %171 = vector.broadcast %cst_22 : f32 to vector<1x1xf32>
    %172 = tpu.concatenate %148, %153, %157, %161, %165, %169, %170, %171 in 0 : vector<1x1xf32>, vector<1x1xf32>, vector<1x1xf32>, vector<1x1xf32>, vector<1x1xf32>, vector<1x1xf32>, vector<1x1xf32>, vector<1x1xf32> -> vector<8x1xf32>
    %173 = vector.shape_cast %172 : vector<8x1xf32> to vector<1x8x1xf32>
    %c0_23 = arith.constant 0 : index
    %c0_24 = arith.constant 0 : index
    %c0_25 = arith.constant 0 : index
    %174 = vector.load %arg6[%c0_23, %c0_24, %c0_25] : memref<1x8x1xf32, #tpu.memory_space<vmem>>, vector<1x8x1xf32>
    tpu.vector_store %arg6[%c0_23, %c0_24, %c0_25], %173 {strides = array<i32>} : memref<1x8x1xf32, #tpu.memory_space<vmem>>, vector<1x8x1xf32>,
    return
  }
  func.func @transform_0(%arg0: i32) -> i32 {
    %c0_i32 = arith.constant 0 : i32
    %c0_i32_0 = arith.constant 0 : i32
    return %c0_i32 : i32
  }
  func.func @transform_1(%arg0: i32) -> (i32, i32) {
    %c0_i32 = arith.constant 0 : i32
    %c0_i32_0 = arith.constant 0 : i32
    return %c0_i32, %arg0 : i32, i32
  }
  func.func @transform_2(%arg0: i32) -> (i32, i32) {
    %c0_i32 = arith.constant 0 : i32
    %c0_i32_0 = arith.constant 0 : i32
    return %c0_i32, %arg0 : i32, i32
  }
  func.func @transform_3(%arg0: i32) -> (i32, i32) {
    %c0_i32 = arith.constant 0 : i32
    %c0_i32_0 = arith.constant 0 : i32
    %c0_i32_1 = arith.constant 0 : i32
    return %c0_i32, %c0_i32_0 : i32, i32
  }
  func.func @transform_4(%arg0: i32) -> (i32, i32) {
    %c0_i32 = arith.constant 0 : i32
    %c0_i32_0 = arith.constant 0 : i32
    %c0_i32_1 = arith.constant 0 : i32
    return %c0_i32, %c0_i32_0 : i32, i32
  }
  func.func @transform_5(%arg0: i32) -> (i32, i32, i32) {
    %c0_i32 = arith.constant 0 : i32
    %c0_i32_0 = arith.constant 0 : i32
    %c0_i32_1 = arith.constant 0 : i32
    return %arg0, %c0_i32, %c0_i32_0 : i32, i32, i32
  }
}

module attributes {stable_mosaic.version = 11 : i64} {
  func.func @_dice_stats_kernel(%arg0: i32, %arg1: memref<2xf32, #tpu.memory_space<smem>>, %arg2: memref<4x512xf32, #tpu.memory_space<vmem>>, %arg3: memref<4x512xf32, #tpu.memory_space<vmem>>, %arg4: memref<8x4xf32, #tpu.memory_space<vmem>>, %arg5: memref<8x1xf32, #tpu.memory_space<vmem>>, %arg6: memref<1x8x1xf32, #tpu.memory_space<vmem>>) attributes {dimension_semantics = [#tpu.dimension_semantics<parallel>], iteration_bounds = array<i64: 2>, scalar_prefetch = 0 : i64, scratch_operands = 0 : i64, tpu.core_type = #tpu.core_type<tc>, window_params = [{transform_indices = @transform_0, window_bounds = array<i64: 2>}, {transform_indices = @transform_1, window_bounds = array<i64: 4, 512>}, {transform_indices = @transform_2, window_bounds = array<i64: 4, 512>}, {pipeline_mode = #tpu.pipeline_mode<synchronous>, transform_indices = @transform_3, window_bounds = array<i64: 8, 4>}, {pipeline_mode = #tpu.pipeline_mode<synchronous>, transform_indices = @transform_4, window_bounds = array<i64: 8, 1>}, {transform_indices = @transform_5, window_bounds = array<i64: 1, 8, 1>}]} {
    %c0 = arith.constant 0 : index
    %c0_0 = arith.constant 0 : index
    %0 = vector.load %arg2[%c0, %c0_0] : memref<4x512xf32, #tpu.memory_space<vmem>>, vector<4x512xf32>
    %1 = arith.index_cast %arg0 : i32 to index
    %2 = memref.load %arg1[%1] : memref<2xf32, #tpu.memory_space<smem>>
    %cst = arith.constant 6.000000e+00 : f32
    %3 = arith.mulf %cst, %2 : f32
    %c0_1 = arith.constant 0 : index
    %c0_2 = arith.constant 0 : index
    %4 = vector.load %arg3[%c0_1, %c0_2] : memref<4x512xf32, #tpu.memory_space<vmem>>, vector<4x512xf32>
    %5 = vector.broadcast %3 : f32 to vector<4x512xf32>
    %6 = arith.mulf %5, %4 : vector<4x512xf32>
    %7 = arith.addf %0, %6 : vector<4x512xf32>
    %c0_3 = arith.constant 0 : index
    %c0_4 = arith.constant 0 : index
    %8 = vector.load %arg4[%c0_3, %c0_4] : memref<8x4xf32, #tpu.memory_space<vmem>>, vector<8x4xf32>
    %c0_5 = arith.constant 0 : index
    %c0_6 = arith.constant 0 : index
    %9 = vector.load %arg5[%c0_5, %c0_6] : memref<8x1xf32, #tpu.memory_space<vmem>>, vector<8x1xf32>
    %cst_7 = arith.constant 0.000000e+00 : f32
    %10 = vector.broadcast %cst_7 : f32 to vector<8x512xf32>
    %11 = vector.broadcast %9 : vector<8x1xf32> to vector<8x512xf32>
    %12 = arith.addf %10, %11 : vector<8x512xf32>
    %13 = vector.extract_strided_slice %8 {offsets = [0, 0], sizes = [8, 1], strides = [1, 1]} : vector<8x4xf32> to vector<8x1xf32>
    %14 = vector.extract_strided_slice %0 {offsets = [0, 0], sizes = [1, 512], strides = [1, 1]} : vector<4x512xf32> to vector<1x512xf32>
    %15 = vector.broadcast %13 : vector<8x1xf32> to vector<8x512xf32>
    %16 = vector.broadcast %14 : vector<1x512xf32> to vector<8x512xf32>
    %17 = arith.mulf %15, %16 : vector<8x512xf32>
    %18 = arith.addf %12, %17 : vector<8x512xf32>
    %19 = vector.extract_strided_slice %8 {offsets = [0, 1], sizes = [8, 1], strides = [1, 1]} : vector<8x4xf32> to vector<8x1xf32>
    %20 = vector.extract_strided_slice %0 {offsets = [1, 0], sizes = [1, 512], strides = [1, 1]} : vector<4x512xf32> to vector<1x512xf32>
    %21 = vector.broadcast %19 : vector<8x1xf32> to vector<8x512xf32>
    %22 = vector.broadcast %20 : vector<1x512xf32> to vector<8x512xf32>
    %23 = arith.mulf %21, %22 : vector<8x512xf32>
    %24 = arith.addf %18, %23 : vector<8x512xf32>
    %25 = vector.extract_strided_slice %8 {offsets = [0, 2], sizes = [8, 1], strides = [1, 1]} : vector<8x4xf32> to vector<8x1xf32>
    %26 = vector.extract_strided_slice %0 {offsets = [2, 0], sizes = [1, 512], strides = [1, 1]} : vector<4x512xf32> to vector<1x512xf32>
    %27 = vector.broadcast %25 : vector<8x1xf32> to vector<8x512xf32>
    %28 = vector.broadcast %26 : vector<1x512xf32> to vector<8x512xf32>
    %29 = arith.mulf %27, %28 : vector<8x512xf32>
    %30 = arith.addf %24, %29 : vector<8x512xf32>
    %31 = vector.extract_strided_slice %8 {offsets = [0, 3], sizes = [8, 1], strides = [1, 1]} : vector<8x4xf32> to vector<8x1xf32>
    %32 = vector.extract_strided_slice %0 {offsets = [3, 0], sizes = [1, 512], strides = [1, 1]} : vector<4x512xf32> to vector<1x512xf32>
    %33 = vector.broadcast %31 : vector<8x1xf32> to vector<8x512xf32>
    %34 = vector.broadcast %32 : vector<1x512xf32> to vector<8x512xf32>
    %35 = arith.mulf %33, %34 : vector<8x512xf32>
    %36 = arith.addf %30, %35 : vector<8x512xf32>
    %cst_8 = arith.constant 0.000000e+00 : f32
    %37 = vector.broadcast %cst_8 : f32 to vector<8x512xf32>
    %38 = vector.broadcast %9 : vector<8x1xf32> to vector<8x512xf32>
    %39 = arith.addf %37, %38 : vector<8x512xf32>
    %40 = vector.extract_strided_slice %8 {offsets = [0, 0], sizes = [8, 1], strides = [1, 1]} : vector<8x4xf32> to vector<8x1xf32>
    %41 = vector.extract_strided_slice %7 {offsets = [0, 0], sizes = [1, 512], strides = [1, 1]} : vector<4x512xf32> to vector<1x512xf32>
    %42 = vector.broadcast %40 : vector<8x1xf32> to vector<8x512xf32>
    %43 = vector.broadcast %41 : vector<1x512xf32> to vector<8x512xf32>
    %44 = arith.mulf %42, %43 : vector<8x512xf32>
    %45 = arith.addf %39, %44 : vector<8x512xf32>
    %46 = vector.extract_strided_slice %8 {offsets = [0, 1], sizes = [8, 1], strides = [1, 1]} : vector<8x4xf32> to vector<8x1xf32>
    %47 = vector.extract_strided_slice %7 {offsets = [1, 0], sizes = [1, 512], strides = [1, 1]} : vector<4x512xf32> to vector<1x512xf32>
    %48 = vector.broadcast %46 : vector<8x1xf32> to vector<8x512xf32>
    %49 = vector.broadcast %47 : vector<1x512xf32> to vector<8x512xf32>
    %50 = arith.mulf %48, %49 : vector<8x512xf32>
    %51 = arith.addf %45, %50 : vector<8x512xf32>
    %52 = vector.extract_strided_slice %8 {offsets = [0, 2], sizes = [8, 1], strides = [1, 1]} : vector<8x4xf32> to vector<8x1xf32>
    %53 = vector.extract_strided_slice %7 {offsets = [2, 0], sizes = [1, 512], strides = [1, 1]} : vector<4x512xf32> to vector<1x512xf32>
    %54 = vector.broadcast %52 : vector<8x1xf32> to vector<8x512xf32>
    %55 = vector.broadcast %53 : vector<1x512xf32> to vector<8x512xf32>
    %56 = arith.mulf %54, %55 : vector<8x512xf32>
    %57 = arith.addf %51, %56 : vector<8x512xf32>
    %58 = vector.extract_strided_slice %8 {offsets = [0, 3], sizes = [8, 1], strides = [1, 1]} : vector<8x4xf32> to vector<8x1xf32>
    %59 = vector.extract_strided_slice %7 {offsets = [3, 0], sizes = [1, 512], strides = [1, 1]} : vector<4x512xf32> to vector<1x512xf32>
    %60 = vector.broadcast %58 : vector<8x1xf32> to vector<8x512xf32>
    %61 = vector.broadcast %59 : vector<1x512xf32> to vector<8x512xf32>
    %62 = arith.mulf %60, %61 : vector<8x512xf32>
    %63 = arith.addf %57, %62 : vector<8x512xf32>
    %64 = vector.extract_strided_slice %36 {offsets = [0, 0], sizes = [4, 512], strides = [1, 1]} : vector<8x512xf32> to vector<4x512xf32>
    %65 = vector.extract_strided_slice %64 {offsets = [0, 0], sizes = [1, 512], strides = [1, 1]} : vector<4x512xf32> to vector<1x512xf32>
    %66 = vector.extract_strided_slice %64 {offsets = [1, 0], sizes = [1, 512], strides = [1, 1]} : vector<4x512xf32> to vector<1x512xf32>
    %67 = arith.maximumf %65, %66 : vector<1x512xf32>
    %68 = vector.extract_strided_slice %64 {offsets = [2, 0], sizes = [1, 512], strides = [1, 1]} : vector<4x512xf32> to vector<1x512xf32>
    %69 = arith.maximumf %67, %68 : vector<1x512xf32>
    %70 = vector.extract_strided_slice %64 {offsets = [3, 0], sizes = [1, 512], strides = [1, 1]} : vector<4x512xf32> to vector<1x512xf32>
    %71 = arith.maximumf %69, %70 : vector<1x512xf32>
    %72 = vector.broadcast %71 : vector<1x512xf32> to vector<4x512xf32>
    %73 = arith.subf %64, %72 : vector<4x512xf32>
    %74 = math.exp %73 : vector<4x512xf32>
    %75 = vector.extract_strided_slice %74 {offsets = [0, 0], sizes = [1, 512], strides = [1, 1]} : vector<4x512xf32> to vector<1x512xf32>
    %76 = vector.extract_strided_slice %74 {offsets = [1, 0], sizes = [1, 512], strides = [1, 1]} : vector<4x512xf32> to vector<1x512xf32>
    %77 = arith.addf %75, %76 : vector<1x512xf32>
    %78 = vector.extract_strided_slice %74 {offsets = [2, 0], sizes = [1, 512], strides = [1, 1]} : vector<4x512xf32> to vector<1x512xf32>
    %79 = arith.addf %77, %78 : vector<1x512xf32>
    %80 = vector.extract_strided_slice %74 {offsets = [3, 0], sizes = [1, 512], strides = [1, 1]} : vector<4x512xf32> to vector<1x512xf32>
    %81 = arith.addf %79, %80 : vector<1x512xf32>
    %82 = vector.broadcast %81 : vector<1x512xf32> to vector<4x512xf32>
    %83 = arith.divf %74, %82 : vector<4x512xf32>
    %84 = vector.extract_strided_slice %36 {offsets = [4, 0], sizes = [4, 512], strides = [1, 1]} : vector<8x512xf32> to vector<4x512xf32>
    %85 = vector.extract_strided_slice %84 {offsets = [0, 0], sizes = [1, 512], strides = [1, 1]} : vector<4x512xf32> to vector<1x512xf32>
    %86 = vector.extract_strided_slice %84 {offsets = [1, 0], sizes = [1, 512], strides = [1, 1]} : vector<4x512xf32> to vector<1x512xf32>
    %87 = arith.maximumf %85, %86 : vector<1x512xf32>
    %88 = vector.extract_strided_slice %84 {offsets = [2, 0], sizes = [1, 512], strides = [1, 1]} : vector<4x512xf32> to vector<1x512xf32>
    %89 = arith.maximumf %87, %88 : vector<1x512xf32>
    %90 = vector.extract_strided_slice %84 {offsets = [3, 0], sizes = [1, 512], strides = [1, 1]} : vector<4x512xf32> to vector<1x512xf32>
    %91 = arith.maximumf %89, %90 : vector<1x512xf32>
    %92 = vector.broadcast %91 : vector<1x512xf32> to vector<4x512xf32>
    %93 = arith.subf %84, %92 : vector<4x512xf32>
    %94 = math.exp %93 : vector<4x512xf32>
    %95 = vector.extract_strided_slice %94 {offsets = [0, 0], sizes = [1, 512], strides = [1, 1]} : vector<4x512xf32> to vector<1x512xf32>
    %96 = vector.extract_strided_slice %94 {offsets = [1, 0], sizes = [1, 512], strides = [1, 1]} : vector<4x512xf32> to vector<1x512xf32>
    %97 = arith.addf %95, %96 : vector<1x512xf32>
    %98 = vector.extract_strided_slice %94 {offsets = [2, 0], sizes = [1, 512], strides = [1, 1]} : vector<4x512xf32> to vector<1x512xf32>
    %99 = arith.addf %97, %98 : vector<1x512xf32>
    %100 = vector.extract_strided_slice %94 {offsets = [3, 0], sizes = [1, 512], strides = [1, 1]} : vector<4x512xf32> to vector<1x512xf32>
    %101 = arith.addf %99, %100 : vector<1x512xf32>
    %102 = vector.broadcast %101 : vector<1x512xf32> to vector<4x512xf32>
    %103 = arith.divf %94, %102 : vector<4x512xf32>
    %104 = vector.extract_strided_slice %63 {offsets = [0, 0], sizes = [4, 512], strides = [1, 1]} : vector<8x512xf32> to vector<4x512xf32>
    %105 = vector.extract_strided_slice %104 {offsets = [0, 0], sizes = [1, 512], strides = [1, 1]} : vector<4x512xf32> to vector<1x512xf32>
    %106 = vector.extract_strided_slice %104 {offsets = [1, 0], sizes = [1, 512], strides = [1, 1]} : vector<4x512xf32> to vector<1x512xf32>
    %107 = arith.maximumf %105, %106 : vector<1x512xf32>
    %108 = vector.extract_strided_slice %104 {offsets = [2, 0], sizes = [1, 512], strides = [1, 1]} : vector<4x512xf32> to vector<1x512xf32>
    %109 = arith.maximumf %107, %108 : vector<1x512xf32>
    %110 = vector.extract_strided_slice %104 {offsets = [3, 0], sizes = [1, 512], strides = [1, 1]} : vector<4x512xf32> to vector<1x512xf32>
    %111 = arith.maximumf %109, %110 : vector<1x512xf32>
    %112 = vector.broadcast %111 : vector<1x512xf32> to vector<4x512xf32>
    %113 = arith.subf %104, %112 : vector<4x512xf32>
    %114 = math.exp %113 : vector<4x512xf32>
    %115 = vector.extract_strided_slice %114 {offsets = [0, 0], sizes = [1, 512], strides = [1, 1]} : vector<4x512xf32> to vector<1x512xf32>
    %116 = vector.extract_strided_slice %114 {offsets = [1, 0], sizes = [1, 512], strides = [1, 1]} : vector<4x512xf32> to vector<1x512xf32>
    %117 = arith.addf %115, %116 : vector<1x512xf32>
    %118 = vector.extract_strided_slice %114 {offsets = [2, 0], sizes = [1, 512], strides = [1, 1]} : vector<4x512xf32> to vector<1x512xf32>
    %119 = arith.addf %117, %118 : vector<1x512xf32>
    %120 = vector.extract_strided_slice %114 {offsets = [3, 0], sizes = [1, 512], strides = [1, 1]} : vector<4x512xf32> to vector<1x512xf32>
    %121 = arith.addf %119, %120 : vector<1x512xf32>
    %122 = vector.broadcast %121 : vector<1x512xf32> to vector<4x512xf32>
    %123 = arith.divf %114, %122 : vector<4x512xf32>
    %124 = vector.extract_strided_slice %63 {offsets = [4, 0], sizes = [4, 512], strides = [1, 1]} : vector<8x512xf32> to vector<4x512xf32>
    %125 = vector.extract_strided_slice %124 {offsets = [0, 0], sizes = [1, 512], strides = [1, 1]} : vector<4x512xf32> to vector<1x512xf32>
    %126 = vector.extract_strided_slice %124 {offsets = [1, 0], sizes = [1, 512], strides = [1, 1]} : vector<4x512xf32> to vector<1x512xf32>
    %127 = arith.maximumf %125, %126 : vector<1x512xf32>
    %128 = vector.extract_strided_slice %124 {offsets = [2, 0], sizes = [1, 512], strides = [1, 1]} : vector<4x512xf32> to vector<1x512xf32>
    %129 = arith.maximumf %127, %128 : vector<1x512xf32>
    %130 = vector.extract_strided_slice %124 {offsets = [3, 0], sizes = [1, 512], strides = [1, 1]} : vector<4x512xf32> to vector<1x512xf32>
    %131 = arith.maximumf %129, %130 : vector<1x512xf32>
    %132 = vector.broadcast %131 : vector<1x512xf32> to vector<4x512xf32>
    %133 = arith.subf %124, %132 : vector<4x512xf32>
    %134 = math.exp %133 : vector<4x512xf32>
    %135 = vector.extract_strided_slice %134 {offsets = [0, 0], sizes = [1, 512], strides = [1, 1]} : vector<4x512xf32> to vector<1x512xf32>
    %136 = vector.extract_strided_slice %134 {offsets = [1, 0], sizes = [1, 512], strides = [1, 1]} : vector<4x512xf32> to vector<1x512xf32>
    %137 = arith.addf %135, %136 : vector<1x512xf32>
    %138 = vector.extract_strided_slice %134 {offsets = [2, 0], sizes = [1, 512], strides = [1, 1]} : vector<4x512xf32> to vector<1x512xf32>
    %139 = arith.addf %137, %138 : vector<1x512xf32>
    %140 = vector.extract_strided_slice %134 {offsets = [3, 0], sizes = [1, 512], strides = [1, 1]} : vector<4x512xf32> to vector<1x512xf32>
    %141 = arith.addf %139, %140 : vector<1x512xf32>
    %142 = vector.broadcast %141 : vector<1x512xf32> to vector<4x512xf32>
    %143 = arith.divf %134, %142 : vector<4x512xf32>
    %144 = arith.mulf %123, %103 : vector<4x512xf32>
    %cst_9 = arith.constant dense<0.000000e+00> : vector<512xf32>
    %145 = vector.multi_reduction <add>, %144, %cst_9 [0] : vector<4x512xf32> to vector<512xf32>
    %146 = vector.shape_cast %145 : vector<512xf32> to vector<1x512xf32>
    %cst_10 = arith.constant dense<0.000000e+00> : vector<1xf32>
    %147 = vector.multi_reduction <add>, %146, %cst_10 [1] : vector<1x512xf32> to vector<1xf32>
    %148 = vector.shape_cast %147 : vector<1xf32> to vector<1x1xf32>
    %149 = arith.mulf %143, %83 : vector<4x512xf32>
    %cst_11 = arith.constant dense<0.000000e+00> : vector<512xf32>
    %150 = vector.multi_reduction <add>, %149, %cst_11 [0] : vector<4x512xf32> to vector<512xf32>
    %151 = vector.shape_cast %150 : vector<512xf32> to vector<1x512xf32>
    %cst_12 = arith.constant dense<0.000000e+00> : vector<1xf32>
    %152 = vector.multi_reduction <add>, %151, %cst_12 [1] : vector<1x512xf32> to vector<1xf32>
    %153 = vector.shape_cast %152 : vector<1xf32> to vector<1x1xf32>
    %cst_13 = arith.constant dense<0.000000e+00> : vector<512xf32>
    %154 = vector.multi_reduction <add>, %123, %cst_13 [0] : vector<4x512xf32> to vector<512xf32>
    %155 = vector.shape_cast %154 : vector<512xf32> to vector<1x512xf32>
    %cst_14 = arith.constant dense<0.000000e+00> : vector<1xf32>
    %156 = vector.multi_reduction <add>, %155, %cst_14 [1] : vector<1x512xf32> to vector<1xf32>
    %157 = vector.shape_cast %156 : vector<1xf32> to vector<1x1xf32>
    %cst_15 = arith.constant dense<0.000000e+00> : vector<512xf32>
    %158 = vector.multi_reduction <add>, %143, %cst_15 [0] : vector<4x512xf32> to vector<512xf32>
    %159 = vector.shape_cast %158 : vector<512xf32> to vector<1x512xf32>
    %cst_16 = arith.constant dense<0.000000e+00> : vector<1xf32>
    %160 = vector.multi_reduction <add>, %159, %cst_16 [1] : vector<1x512xf32> to vector<1xf32>
    %161 = vector.shape_cast %160 : vector<1xf32> to vector<1x1xf32>
    %cst_17 = arith.constant dense<0.000000e+00> : vector<512xf32>
    %162 = vector.multi_reduction <add>, %83, %cst_17 [0] : vector<4x512xf32> to vector<512xf32>
    %163 = vector.shape_cast %162 : vector<512xf32> to vector<1x512xf32>
    %cst_18 = arith.constant dense<0.000000e+00> : vector<1xf32>
    %164 = vector.multi_reduction <add>, %163, %cst_18 [1] : vector<1x512xf32> to vector<1xf32>
    %165 = vector.shape_cast %164 : vector<1xf32> to vector<1x1xf32>
    %cst_19 = arith.constant dense<0.000000e+00> : vector<512xf32>
    %166 = vector.multi_reduction <add>, %103, %cst_19 [0] : vector<4x512xf32> to vector<512xf32>
    %167 = vector.shape_cast %166 : vector<512xf32> to vector<1x512xf32>
    %cst_20 = arith.constant dense<0.000000e+00> : vector<1xf32>
    %168 = vector.multi_reduction <add>, %167, %cst_20 [1] : vector<1x512xf32> to vector<1xf32>
    %169 = vector.shape_cast %168 : vector<1xf32> to vector<1x1xf32>
    %cst_21 = arith.constant 0.000000e+00 : f32
    %170 = vector.broadcast %cst_21 : f32 to vector<1x1xf32>
    %cst_22 = arith.constant 0.000000e+00 : f32
    %171 = vector.broadcast %cst_22 : f32 to vector<1x1xf32>
    %172 = tpu.concatenate %148, %153, %157, %161, %165, %169, %170, %171 in 0 : vector<1x1xf32>, vector<1x1xf32>, vector<1x1xf32>, vector<1x1xf32>, vector<1x1xf32>, vector<1x1xf32>, vector<1x1xf32>, vector<1x1xf32> -> vector<8x1xf32>
    %173 = vector.shape_cast %172 : vector<8x1xf32> to vector<1x8x1xf32>
    %c0_23 = arith.constant 0 : index
    %c0_24 = arith.constant 0 : index
    %c0_25 = arith.constant 0 : index
    %174 = vector.load %arg6[%c0_23, %c0_24, %c0_25] : memref<1x8x1xf32, #tpu.memory_space<vmem>>, vector<1x8x1xf32>
    tpu.vector_store %arg6[%c0_23, %c0_24, %c0_25], %173 {strides = array<i32>} : memref<1x8x1xf32, #tpu.memory_space<vmem>>, vector<1x8x1xf32>,
    return
  }
  func.func @transform_0(%arg0: i32) -> i32 {
    %c0_i32 = arith.constant 0 : i32
    %c0_i32_0 = arith.constant 0 : i32
    return %c0_i32 : i32
  }
  func.func @transform_1(%arg0: i32) -> (i32, i32) {
    %c0_i32 = arith.constant 0 : i32
    %c0_i32_0 = arith.constant 0 : i32
    return %c0_i32, %arg0 : i32, i32
  }
  func.func @transform_2(%arg0: i32) -> (i32, i32) {
    %c0_i32 = arith.constant 0 : i32
    %c0_i32_0 = arith.constant 0 : i32
    return %c0_i32, %arg0 : i32, i32
  }
  func.func @transform_3(%arg0: i32) -> (i32, i32) {
    %c0_i32 = arith.constant 0 : i32
    %c0_i32_0 = arith.constant 0 : i32
    %c0_i32_1 = arith.constant 0 : i32
    return %c0_i32, %c0_i32_0 : i32, i32
  }
  func.func @transform_4(%arg0: i32) -> (i32, i32) {
    %c0_i32 = arith.constant 0 : i32
    %c0_i32_0 = arith.constant 0 : i32
    %c0_i32_1 = arith.constant 0 : i32
    return %c0_i32, %c0_i32_0 : i32, i32
  }
  func.func @transform_5(%arg0: i32) -> (i32, i32, i32) {
    %c0_i32 = arith.constant 0 : i32
    %c0_i32_0 = arith.constant 0 : i32
    %c0_i32_1 = arith.constant 0 : i32
    return %arg0, %c0_i32, %c0_i32_0 : i32, i32, i32
  }
}

module attributes {stable_mosaic.version = 11 : i64} {
  func.func @_vat_grad_kernel(%arg0: i32, %arg1: memref<2xf32, #tpu.memory_space<smem>>, %arg2: memref<4xf32, #tpu.memory_space<smem>>, %arg3: memref<4x512xf32, #tpu.memory_space<vmem>>, %arg4: memref<4x512xf32, #tpu.memory_space<vmem>>, %arg5: memref<8x4xf32, #tpu.memory_space<vmem>>, %arg6: memref<4x8xf32, #tpu.memory_space<vmem>>, %arg7: memref<8x1xf32, #tpu.memory_space<vmem>>, %arg8: memref<4x512xf32, #tpu.memory_space<vmem>>, %arg9: memref<1x8x1xf32, #tpu.memory_space<vmem>>) attributes {dimension_semantics = [#tpu.dimension_semantics<parallel>], iteration_bounds = array<i64: 2>, scalar_prefetch = 0 : i64, scratch_operands = 0 : i64, tpu.core_type = #tpu.core_type<tc>, window_params = [{transform_indices = @transform_0, window_bounds = array<i64: 2>}, {transform_indices = @transform_1, window_bounds = array<i64: 4>}, {transform_indices = @transform_2, window_bounds = array<i64: 4, 512>}, {transform_indices = @transform_3, window_bounds = array<i64: 4, 512>}, {pipeline_mode = #tpu.pipeline_mode<synchronous>, transform_indices = @transform_4, window_bounds = array<i64: 8, 4>}, {pipeline_mode = #tpu.pipeline_mode<synchronous>, transform_indices = @transform_5, window_bounds = array<i64: 4, 8>}, {pipeline_mode = #tpu.pipeline_mode<synchronous>, transform_indices = @transform_6, window_bounds = array<i64: 8, 1>}, {transform_indices = @transform_7, window_bounds = array<i64: 4, 512>}, {transform_indices = @transform_8, window_bounds = array<i64: 1, 8, 1>}]} {
    %c0 = arith.constant 0 : index
    %c0_0 = arith.constant 0 : index
    %0 = vector.load %arg3[%c0, %c0_0] : memref<4x512xf32, #tpu.memory_space<vmem>>, vector<4x512xf32>
    %1 = arith.index_cast %arg0 : i32 to index
    %2 = memref.load %arg1[%1] : memref<2xf32, #tpu.memory_space<smem>>
    %cst = arith.constant 1.000000e+01 : f32
    %3 = arith.mulf %cst, %2 : f32
    %c0_1 = arith.constant 0 : index
    %c0_2 = arith.constant 0 : index
    %4 = vector.load %arg4[%c0_1, %c0_2] : memref<4x512xf32, #tpu.memory_space<vmem>>, vector<4x512xf32>
    %5 = vector.broadcast %3 : f32 to vector<4x512xf32>
    %6 = arith.mulf %5, %4 : vector<4x512xf32>
    %7 = arith.addf %0, %6 : vector<4x512xf32>
    %c0_3 = arith.constant 0 : index
    %c0_4 = arith.constant 0 : index
    %8 = vector.load %arg5[%c0_3, %c0_4] : memref<8x4xf32, #tpu.memory_space<vmem>>, vector<8x4xf32>
    %c0_5 = arith.constant 0 : index
    %c0_6 = arith.constant 0 : index
    %9 = vector.load %arg7[%c0_5, %c0_6] : memref<8x1xf32, #tpu.memory_space<vmem>>, vector<8x1xf32>
    %cst_7 = arith.constant 0.000000e+00 : f32
    %10 = vector.broadcast %cst_7 : f32 to vector<8x512xf32>
    %11 = vector.broadcast %9 : vector<8x1xf32> to vector<8x512xf32>
    %12 = arith.addf %10, %11 : vector<8x512xf32>
    %13 = vector.extract_strided_slice %8 {offsets = [0, 0], sizes = [8, 1], strides = [1, 1]} : vector<8x4xf32> to vector<8x1xf32>
    %14 = vector.extract_strided_slice %0 {offsets = [0, 0], sizes = [1, 512], strides = [1, 1]} : vector<4x512xf32> to vector<1x512xf32>
    %15 = vector.broadcast %13 : vector<8x1xf32> to vector<8x512xf32>
    %16 = vector.broadcast %14 : vector<1x512xf32> to vector<8x512xf32>
    %17 = arith.mulf %15, %16 : vector<8x512xf32>
    %18 = arith.addf %12, %17 : vector<8x512xf32>
    %19 = vector.extract_strided_slice %8 {offsets = [0, 1], sizes = [8, 1], strides = [1, 1]} : vector<8x4xf32> to vector<8x1xf32>
    %20 = vector.extract_strided_slice %0 {offsets = [1, 0], sizes = [1, 512], strides = [1, 1]} : vector<4x512xf32> to vector<1x512xf32>
    %21 = vector.broadcast %19 : vector<8x1xf32> to vector<8x512xf32>
    %22 = vector.broadcast %20 : vector<1x512xf32> to vector<8x512xf32>
    %23 = arith.mulf %21, %22 : vector<8x512xf32>
    %24 = arith.addf %18, %23 : vector<8x512xf32>
    %25 = vector.extract_strided_slice %8 {offsets = [0, 2], sizes = [8, 1], strides = [1, 1]} : vector<8x4xf32> to vector<8x1xf32>
    %26 = vector.extract_strided_slice %0 {offsets = [2, 0], sizes = [1, 512], strides = [1, 1]} : vector<4x512xf32> to vector<1x512xf32>
    %27 = vector.broadcast %25 : vector<8x1xf32> to vector<8x512xf32>
    %28 = vector.broadcast %26 : vector<1x512xf32> to vector<8x512xf32>
    %29 = arith.mulf %27, %28 : vector<8x512xf32>
    %30 = arith.addf %24, %29 : vector<8x512xf32>
    %31 = vector.extract_strided_slice %8 {offsets = [0, 3], sizes = [8, 1], strides = [1, 1]} : vector<8x4xf32> to vector<8x1xf32>
    %32 = vector.extract_strided_slice %0 {offsets = [3, 0], sizes = [1, 512], strides = [1, 1]} : vector<4x512xf32> to vector<1x512xf32>
    %33 = vector.broadcast %31 : vector<8x1xf32> to vector<8x512xf32>
    %34 = vector.broadcast %32 : vector<1x512xf32> to vector<8x512xf32>
    %35 = arith.mulf %33, %34 : vector<8x512xf32>
    %36 = arith.addf %30, %35 : vector<8x512xf32>
    %cst_8 = arith.constant 0.000000e+00 : f32
    %37 = vector.broadcast %cst_8 : f32 to vector<8x512xf32>
    %38 = vector.broadcast %9 : vector<8x1xf32> to vector<8x512xf32>
    %39 = arith.addf %37, %38 : vector<8x512xf32>
    %40 = vector.extract_strided_slice %8 {offsets = [0, 0], sizes = [8, 1], strides = [1, 1]} : vector<8x4xf32> to vector<8x1xf32>
    %41 = vector.extract_strided_slice %7 {offsets = [0, 0], sizes = [1, 512], strides = [1, 1]} : vector<4x512xf32> to vector<1x512xf32>
    %42 = vector.broadcast %40 : vector<8x1xf32> to vector<8x512xf32>
    %43 = vector.broadcast %41 : vector<1x512xf32> to vector<8x512xf32>
    %44 = arith.mulf %42, %43 : vector<8x512xf32>
    %45 = arith.addf %39, %44 : vector<8x512xf32>
    %46 = vector.extract_strided_slice %8 {offsets = [0, 1], sizes = [8, 1], strides = [1, 1]} : vector<8x4xf32> to vector<8x1xf32>
    %47 = vector.extract_strided_slice %7 {offsets = [1, 0], sizes = [1, 512], strides = [1, 1]} : vector<4x512xf32> to vector<1x512xf32>
    %48 = vector.broadcast %46 : vector<8x1xf32> to vector<8x512xf32>
    %49 = vector.broadcast %47 : vector<1x512xf32> to vector<8x512xf32>
    %50 = arith.mulf %48, %49 : vector<8x512xf32>
    %51 = arith.addf %45, %50 : vector<8x512xf32>
    %52 = vector.extract_strided_slice %8 {offsets = [0, 2], sizes = [8, 1], strides = [1, 1]} : vector<8x4xf32> to vector<8x1xf32>
    %53 = vector.extract_strided_slice %7 {offsets = [2, 0], sizes = [1, 512], strides = [1, 1]} : vector<4x512xf32> to vector<1x512xf32>
    %54 = vector.broadcast %52 : vector<8x1xf32> to vector<8x512xf32>
    %55 = vector.broadcast %53 : vector<1x512xf32> to vector<8x512xf32>
    %56 = arith.mulf %54, %55 : vector<8x512xf32>
    %57 = arith.addf %51, %56 : vector<8x512xf32>
    %58 = vector.extract_strided_slice %8 {offsets = [0, 3], sizes = [8, 1], strides = [1, 1]} : vector<8x4xf32> to vector<8x1xf32>
    %59 = vector.extract_strided_slice %7 {offsets = [3, 0], sizes = [1, 512], strides = [1, 1]} : vector<4x512xf32> to vector<1x512xf32>
    %60 = vector.broadcast %58 : vector<8x1xf32> to vector<8x512xf32>
    %61 = vector.broadcast %59 : vector<1x512xf32> to vector<8x512xf32>
    %62 = arith.mulf %60, %61 : vector<8x512xf32>
    %63 = arith.addf %57, %62 : vector<8x512xf32>
    %64 = vector.extract_strided_slice %36 {offsets = [0, 0], sizes = [4, 512], strides = [1, 1]} : vector<8x512xf32> to vector<4x512xf32>
    %65 = vector.extract_strided_slice %64 {offsets = [0, 0], sizes = [1, 512], strides = [1, 1]} : vector<4x512xf32> to vector<1x512xf32>
    %66 = vector.extract_strided_slice %64 {offsets = [1, 0], sizes = [1, 512], strides = [1, 1]} : vector<4x512xf32> to vector<1x512xf32>
    %67 = arith.maximumf %65, %66 : vector<1x512xf32>
    %68 = vector.extract_strided_slice %64 {offsets = [2, 0], sizes = [1, 512], strides = [1, 1]} : vector<4x512xf32> to vector<1x512xf32>
    %69 = arith.maximumf %67, %68 : vector<1x512xf32>
    %70 = vector.extract_strided_slice %64 {offsets = [3, 0], sizes = [1, 512], strides = [1, 1]} : vector<4x512xf32> to vector<1x512xf32>
    %71 = arith.maximumf %69, %70 : vector<1x512xf32>
    %72 = vector.broadcast %71 : vector<1x512xf32> to vector<4x512xf32>
    %73 = arith.subf %64, %72 : vector<4x512xf32>
    %74 = math.exp %73 : vector<4x512xf32>
    %75 = vector.extract_strided_slice %74 {offsets = [0, 0], sizes = [1, 512], strides = [1, 1]} : vector<4x512xf32> to vector<1x512xf32>
    %76 = vector.extract_strided_slice %74 {offsets = [1, 0], sizes = [1, 512], strides = [1, 1]} : vector<4x512xf32> to vector<1x512xf32>
    %77 = arith.addf %75, %76 : vector<1x512xf32>
    %78 = vector.extract_strided_slice %74 {offsets = [2, 0], sizes = [1, 512], strides = [1, 1]} : vector<4x512xf32> to vector<1x512xf32>
    %79 = arith.addf %77, %78 : vector<1x512xf32>
    %80 = vector.extract_strided_slice %74 {offsets = [3, 0], sizes = [1, 512], strides = [1, 1]} : vector<4x512xf32> to vector<1x512xf32>
    %81 = arith.addf %79, %80 : vector<1x512xf32>
    %82 = vector.broadcast %81 : vector<1x512xf32> to vector<4x512xf32>
    %83 = arith.divf %74, %82 : vector<4x512xf32>
    %84 = vector.extract_strided_slice %36 {offsets = [4, 0], sizes = [4, 512], strides = [1, 1]} : vector<8x512xf32> to vector<4x512xf32>
    %85 = vector.extract_strided_slice %84 {offsets = [0, 0], sizes = [1, 512], strides = [1, 1]} : vector<4x512xf32> to vector<1x512xf32>
    %86 = vector.extract_strided_slice %84 {offsets = [1, 0], sizes = [1, 512], strides = [1, 1]} : vector<4x512xf32> to vector<1x512xf32>
    %87 = arith.maximumf %85, %86 : vector<1x512xf32>
    %88 = vector.extract_strided_slice %84 {offsets = [2, 0], sizes = [1, 512], strides = [1, 1]} : vector<4x512xf32> to vector<1x512xf32>
    %89 = arith.maximumf %87, %88 : vector<1x512xf32>
    %90 = vector.extract_strided_slice %84 {offsets = [3, 0], sizes = [1, 512], strides = [1, 1]} : vector<4x512xf32> to vector<1x512xf32>
    %91 = arith.maximumf %89, %90 : vector<1x512xf32>
    %92 = vector.broadcast %91 : vector<1x512xf32> to vector<4x512xf32>
    %93 = arith.subf %84, %92 : vector<4x512xf32>
    %94 = math.exp %93 : vector<4x512xf32>
    %95 = vector.extract_strided_slice %94 {offsets = [0, 0], sizes = [1, 512], strides = [1, 1]} : vector<4x512xf32> to vector<1x512xf32>
    %96 = vector.extract_strided_slice %94 {offsets = [1, 0], sizes = [1, 512], strides = [1, 1]} : vector<4x512xf32> to vector<1x512xf32>
    %97 = arith.addf %95, %96 : vector<1x512xf32>
    %98 = vector.extract_strided_slice %94 {offsets = [2, 0], sizes = [1, 512], strides = [1, 1]} : vector<4x512xf32> to vector<1x512xf32>
    %99 = arith.addf %97, %98 : vector<1x512xf32>
    %100 = vector.extract_strided_slice %94 {offsets = [3, 0], sizes = [1, 512], strides = [1, 1]} : vector<4x512xf32> to vector<1x512xf32>
    %101 = arith.addf %99, %100 : vector<1x512xf32>
    %102 = vector.broadcast %101 : vector<1x512xf32> to vector<4x512xf32>
    %103 = arith.divf %94, %102 : vector<4x512xf32>
    %104 = vector.extract_strided_slice %63 {offsets = [0, 0], sizes = [4, 512], strides = [1, 1]} : vector<8x512xf32> to vector<4x512xf32>
    %105 = vector.extract_strided_slice %104 {offsets = [0, 0], sizes = [1, 512], strides = [1, 1]} : vector<4x512xf32> to vector<1x512xf32>
    %106 = vector.extract_strided_slice %104 {offsets = [1, 0], sizes = [1, 512], strides = [1, 1]} : vector<4x512xf32> to vector<1x512xf32>
    %107 = arith.maximumf %105, %106 : vector<1x512xf32>
    %108 = vector.extract_strided_slice %104 {offsets = [2, 0], sizes = [1, 512], strides = [1, 1]} : vector<4x512xf32> to vector<1x512xf32>
    %109 = arith.maximumf %107, %108 : vector<1x512xf32>
    %110 = vector.extract_strided_slice %104 {offsets = [3, 0], sizes = [1, 512], strides = [1, 1]} : vector<4x512xf32> to vector<1x512xf32>
    %111 = arith.maximumf %109, %110 : vector<1x512xf32>
    %112 = vector.broadcast %111 : vector<1x512xf32> to vector<4x512xf32>
    %113 = arith.subf %104, %112 : vector<4x512xf32>
    %114 = math.exp %113 : vector<4x512xf32>
    %115 = vector.extract_strided_slice %114 {offsets = [0, 0], sizes = [1, 512], strides = [1, 1]} : vector<4x512xf32> to vector<1x512xf32>
    %116 = vector.extract_strided_slice %114 {offsets = [1, 0], sizes = [1, 512], strides = [1, 1]} : vector<4x512xf32> to vector<1x512xf32>
    %117 = arith.addf %115, %116 : vector<1x512xf32>
    %118 = vector.extract_strided_slice %114 {offsets = [2, 0], sizes = [1, 512], strides = [1, 1]} : vector<4x512xf32> to vector<1x512xf32>
    %119 = arith.addf %117, %118 : vector<1x512xf32>
    %120 = vector.extract_strided_slice %114 {offsets = [3, 0], sizes = [1, 512], strides = [1, 1]} : vector<4x512xf32> to vector<1x512xf32>
    %121 = arith.addf %119, %120 : vector<1x512xf32>
    %122 = vector.broadcast %121 : vector<1x512xf32> to vector<4x512xf32>
    %123 = arith.divf %114, %122 : vector<4x512xf32>
    %124 = vector.extract_strided_slice %63 {offsets = [4, 0], sizes = [4, 512], strides = [1, 1]} : vector<8x512xf32> to vector<4x512xf32>
    %125 = vector.extract_strided_slice %124 {offsets = [0, 0], sizes = [1, 512], strides = [1, 1]} : vector<4x512xf32> to vector<1x512xf32>
    %126 = vector.extract_strided_slice %124 {offsets = [1, 0], sizes = [1, 512], strides = [1, 1]} : vector<4x512xf32> to vector<1x512xf32>
    %127 = arith.maximumf %125, %126 : vector<1x512xf32>
    %128 = vector.extract_strided_slice %124 {offsets = [2, 0], sizes = [1, 512], strides = [1, 1]} : vector<4x512xf32> to vector<1x512xf32>
    %129 = arith.maximumf %127, %128 : vector<1x512xf32>
    %130 = vector.extract_strided_slice %124 {offsets = [3, 0], sizes = [1, 512], strides = [1, 1]} : vector<4x512xf32> to vector<1x512xf32>
    %131 = arith.maximumf %129, %130 : vector<1x512xf32>
    %132 = vector.broadcast %131 : vector<1x512xf32> to vector<4x512xf32>
    %133 = arith.subf %124, %132 : vector<4x512xf32>
    %134 = math.exp %133 : vector<4x512xf32>
    %135 = vector.extract_strided_slice %134 {offsets = [0, 0], sizes = [1, 512], strides = [1, 1]} : vector<4x512xf32> to vector<1x512xf32>
    %136 = vector.extract_strided_slice %134 {offsets = [1, 0], sizes = [1, 512], strides = [1, 1]} : vector<4x512xf32> to vector<1x512xf32>
    %137 = arith.addf %135, %136 : vector<1x512xf32>
    %138 = vector.extract_strided_slice %134 {offsets = [2, 0], sizes = [1, 512], strides = [1, 1]} : vector<4x512xf32> to vector<1x512xf32>
    %139 = arith.addf %137, %138 : vector<1x512xf32>
    %140 = vector.extract_strided_slice %134 {offsets = [3, 0], sizes = [1, 512], strides = [1, 1]} : vector<4x512xf32> to vector<1x512xf32>
    %141 = arith.addf %139, %140 : vector<1x512xf32>
    %142 = vector.broadcast %141 : vector<1x512xf32> to vector<4x512xf32>
    %143 = arith.divf %134, %142 : vector<4x512xf32>
    %c0_9 = arith.constant 0 : index
    %c0_10 = arith.constant 0 : index
    %144 = vector.load %arg6[%c0_9, %c0_10] : memref<4x8xf32, #tpu.memory_space<vmem>>, vector<4x8xf32>
    %cst_11 = arith.constant 0.000000e+00 : f32
    %145 = vector.broadcast %cst_11 : f32 to vector<4x512xf32>
    %cst_12 = arith.constant 0.000000e+00 : f32
    %146 = vector.broadcast %cst_12 : f32 to vector<4x512xf32>
    %c0_13 = arith.constant 0 : index
    %147 = memref.load %arg2[%c0_13] : memref<4xf32, #tpu.memory_space<smem>>
    %148 = vector.broadcast %147 : f32 to vector<4x512xf32>
    %149 = arith.addf %146, %148 : vector<4x512xf32>
    %c2 = arith.constant 2 : index
    %150 = memref.load %arg2[%c2] : memref<4xf32, #tpu.memory_space<smem>>
    %151 = vector.broadcast %150 : f32 to vector<4x512xf32>
    %152 = arith.mulf %151, %103 : vector<4x512xf32>
    %153 = arith.subf %149, %152 : vector<4x512xf32>
    %154 = arith.mulf %153, %123 : vector<4x512xf32>
    %cst_14 = arith.constant dense<0.000000e+00> : vector<512xf32>
    %155 = vector.multi_reduction <add>, %154, %cst_14 [0] : vector<4x512xf32> to vector<512xf32>
    %156 = vector.shape_cast %155 : vector<512xf32> to vector<1x512xf32>
    %157 = vector.broadcast %156 : vector<1x512xf32> to vector<4x512xf32>
    %158 = arith.subf %153, %157 : vector<4x512xf32>
    %159 = arith.mulf %123, %158 : vector<4x512xf32>
    %160 = vector.extract_strided_slice %144 {offsets = [0, 0], sizes = [4, 1], strides = [1, 1]} : vector<4x8xf32> to vector<4x1xf32>
    %161 = vector.extract_strided_slice %159 {offsets = [0, 0], sizes = [1, 512], strides = [1, 1]} : vector<4x512xf32> to vector<1x512xf32>
    %162 = vector.broadcast %160 : vector<4x1xf32> to vector<4x512xf32>
    %163 = vector.broadcast %161 : vector<1x512xf32> to vector<4x512xf32>
    %164 = arith.mulf %162, %163 : vector<4x512xf32>
    %165 = arith.addf %145, %164 : vector<4x512xf32>
    %166 = vector.extract_strided_slice %144 {offsets = [0, 1], sizes = [4, 1], strides = [1, 1]} : vector<4x8xf32> to vector<4x1xf32>
    %167 = vector.extract_strided_slice %159 {offsets = [1, 0], sizes = [1, 512], strides = [1, 1]} : vector<4x512xf32> to vector<1x512xf32>
    %168 = vector.broadcast %166 : vector<4x1xf32> to vector<4x512xf32>
    %169 = vector.broadcast %167 : vector<1x512xf32> to vector<4x512xf32>
    %170 = arith.mulf %168, %169 : vector<4x512xf32>
    %171 = arith.addf %165, %170 : vector<4x512xf32>
    %172 = vector.extract_strided_slice %144 {offsets = [0, 2], sizes = [4, 1], strides = [1, 1]} : vector<4x8xf32> to vector<4x1xf32>
    %173 = vector.extract_strided_slice %159 {offsets = [2, 0], sizes = [1, 512], strides = [1, 1]} : vector<4x512xf32> to vector<1x512xf32>
    %174 = vector.broadcast %172 : vector<4x1xf32> to vector<4x512xf32>
    %175 = vector.broadcast %173 : vector<1x512xf32> to vector<4x512xf32>
    %176 = arith.mulf %174, %175 : vector<4x512xf32>
    %177 = arith.addf %171, %176 : vector<4x512xf32>
    %178 = vector.extract_strided_slice %144 {offsets = [0, 3], sizes = [4, 1], strides = [1, 1]} : vector<4x8xf32> to vector<4x1xf32>
    %179 = vector.extract_strided_slice %159 {offsets = [3, 0], sizes = [1, 512], strides = [1, 1]} : vector<4x512xf32> to vector<1x512xf32>
    %180 = vector.broadcast %178 : vector<4x1xf32> to vector<4x512xf32>
    %181 = vector.broadcast %179 : vector<1x512xf32> to vector<4x512xf32>
    %182 = arith.mulf %180, %181 : vector<4x512xf32>
    %183 = arith.addf %177, %182 : vector<4x512xf32>
    %cst_15 = arith.constant 0.000000e+00 : f32
    %184 = vector.broadcast %cst_15 : f32 to vector<4x512xf32>
    %c1 = arith.constant 1 : index
    %185 = memref.load %arg2[%c1] : memref<4xf32, #tpu.memory_space<smem>>
    %186 = vector.broadcast %185 : f32 to vector<4x512xf32>
    %187 = arith.addf %184, %186 : vector<4x512xf32>
    %c3 = arith.constant 3 : index
    %188 = memref.load %arg2[%c3] : memref<4xf32, #tpu.memory_space<smem>>
    %189 = vector.broadcast %188 : f32 to vector<4x512xf32>
    %190 = arith.mulf %189, %83 : vector<4x512xf32>
    %191 = arith.subf %187, %190 : vector<4x512xf32>
    %192 = arith.mulf %191, %143 : vector<4x512xf32>
    %cst_16 = arith.constant dense<0.000000e+00> : vector<512xf32>
    %193 = vector.multi_reduction <add>, %192, %cst_16 [0] : vector<4x512xf32> to vector<512xf32>
    %194 = vector.shape_cast %193 : vector<512xf32> to vector<1x512xf32>
    %195 = vector.broadcast %194 : vector<1x512xf32> to vector<4x512xf32>
    %196 = arith.subf %191, %195 : vector<4x512xf32>
    %197 = arith.mulf %143, %196 : vector<4x512xf32>
    %198 = vector.extract_strided_slice %144 {offsets = [0, 4], sizes = [4, 1], strides = [1, 1]} : vector<4x8xf32> to vector<4x1xf32>
    %199 = vector.extract_strided_slice %197 {offsets = [0, 0], sizes = [1, 512], strides = [1, 1]} : vector<4x512xf32> to vector<1x512xf32>
    %200 = vector.broadcast %198 : vector<4x1xf32> to vector<4x512xf32>
    %201 = vector.broadcast %199 : vector<1x512xf32> to vector<4x512xf32>
    %202 = arith.mulf %200, %201 : vector<4x512xf32>
    %203 = arith.addf %183, %202 : vector<4x512xf32>
    %204 = vector.extract_strided_slice %144 {offsets = [0, 5], sizes = [4, 1], strides = [1, 1]} : vector<4x8xf32> to vector<4x1xf32>
    %205 = vector.extract_strided_slice %197 {offsets = [1, 0], sizes = [1, 512], strides = [1, 1]} : vector<4x512xf32> to vector<1x512xf32>
    %206 = vector.broadcast %204 : vector<4x1xf32> to vector<4x512xf32>
    %207 = vector.broadcast %205 : vector<1x512xf32> to vector<4x512xf32>
    %208 = arith.mulf %206, %207 : vector<4x512xf32>
    %209 = arith.addf %203, %208 : vector<4x512xf32>
    %210 = vector.extract_strided_slice %144 {offsets = [0, 6], sizes = [4, 1], strides = [1, 1]} : vector<4x8xf32> to vector<4x1xf32>
    %211 = vector.extract_strided_slice %197 {offsets = [2, 0], sizes = [1, 512], strides = [1, 1]} : vector<4x512xf32> to vector<1x512xf32>
    %212 = vector.broadcast %210 : vector<4x1xf32> to vector<4x512xf32>
    %213 = vector.broadcast %211 : vector<1x512xf32> to vector<4x512xf32>
    %214 = arith.mulf %212, %213 : vector<4x512xf32>
    %215 = arith.addf %209, %214 : vector<4x512xf32>
    %216 = vector.extract_strided_slice %144 {offsets = [0, 7], sizes = [4, 1], strides = [1, 1]} : vector<4x8xf32> to vector<4x1xf32>
    %217 = vector.extract_strided_slice %197 {offsets = [3, 0], sizes = [1, 512], strides = [1, 1]} : vector<4x512xf32> to vector<1x512xf32>
    %218 = vector.broadcast %216 : vector<4x1xf32> to vector<4x512xf32>
    %219 = vector.broadcast %217 : vector<1x512xf32> to vector<4x512xf32>
    %220 = arith.mulf %218, %219 : vector<4x512xf32>
    %221 = arith.addf %215, %220 : vector<4x512xf32>
    %cst_17 = arith.constant 1.000000e+01 : f32
    %222 = vector.broadcast %cst_17 : f32 to vector<4x512xf32>
    %223 = arith.mulf %222, %221 : vector<4x512xf32>
    %c0_18 = arith.constant 0 : index
    %c0_19 = arith.constant 0 : index
    %224 = vector.load %arg8[%c0_18, %c0_19] : memref<4x512xf32, #tpu.memory_space<vmem>>, vector<4x512xf32>
    tpu.vector_store %arg8[%c0_18, %c0_19], %223 {strides = array<i32>} : memref<4x512xf32, #tpu.memory_space<vmem>>, vector<4x512xf32>,
    %225 = arith.mulf %223, %223 : vector<4x512xf32>
    %cst_20 = arith.constant dense<0.000000e+00> : vector<512xf32>
    %226 = vector.multi_reduction <add>, %225, %cst_20 [0] : vector<4x512xf32> to vector<512xf32>
    %227 = vector.shape_cast %226 : vector<512xf32> to vector<1x512xf32>
    %cst_21 = arith.constant dense<0.000000e+00> : vector<1xf32>
    %228 = vector.multi_reduction <add>, %227, %cst_21 [1] : vector<1x512xf32> to vector<1xf32>
    %229 = vector.shape_cast %228 : vector<1xf32> to vector<1x1xf32>
    %230 = vector.shape_cast %229 : vector<1x1xf32> to vector<1x1xf32>
    %231 = vector.broadcast %230 : vector<1x1xf32> to vector<8x1xf32>
    %232 = vector.shape_cast %231 : vector<8x1xf32> to vector<1x8x1xf32>
    %c0_22 = arith.constant 0 : index
    %c0_23 = arith.constant 0 : index
    %c0_24 = arith.constant 0 : index
    %233 = vector.load %arg9[%c0_22, %c0_23, %c0_24] : memref<1x8x1xf32, #tpu.memory_space<vmem>>, vector<1x8x1xf32>
    tpu.vector_store %arg9[%c0_22, %c0_23, %c0_24], %232 {strides = array<i32>} : memref<1x8x1xf32, #tpu.memory_space<vmem>>, vector<1x8x1xf32>,
    return
  }
  func.func @transform_0(%arg0: i32) -> i32 {
    %c0_i32 = arith.constant 0 : i32
    %c0_i32_0 = arith.constant 0 : i32
    return %c0_i32 : i32
  }
  func.func @transform_1(%arg0: i32) -> i32 {
    %c0_i32 = arith.constant 0 : i32
    %c0_i32_0 = arith.constant 0 : i32
    return %c0_i32 : i32
  }
  func.func @transform_2(%arg0: i32) -> (i32, i32) {
    %c0_i32 = arith.constant 0 : i32
    %c0_i32_0 = arith.constant 0 : i32
    return %c0_i32, %arg0 : i32, i32
  }
  func.func @transform_3(%arg0: i32) -> (i32, i32) {
    %c0_i32 = arith.constant 0 : i32
    %c0_i32_0 = arith.constant 0 : i32
    return %c0_i32, %arg0 : i32, i32
  }
  func.func @transform_4(%arg0: i32) -> (i32, i32) {
    %c0_i32 = arith.constant 0 : i32
    %c0_i32_0 = arith.constant 0 : i32
    %c0_i32_1 = arith.constant 0 : i32
    return %c0_i32, %c0_i32_0 : i32, i32
  }
  func.func @transform_5(%arg0: i32) -> (i32, i32) {
    %c0_i32 = arith.constant 0 : i32
    %c0_i32_0 = arith.constant 0 : i32
    %c0_i32_1 = arith.constant 0 : i32
    return %c0_i32, %c0_i32_0 : i32, i32
  }
  func.func @transform_6(%arg0: i32) -> (i32, i32) {
    %c0_i32 = arith.constant 0 : i32
    %c0_i32_0 = arith.constant 0 : i32
    %c0_i32_1 = arith.constant 0 : i32
    return %c0_i32, %c0_i32_0 : i32, i32
  }
  func.func @transform_7(%arg0: i32) -> (i32, i32) {
    %c0_i32 = arith.constant 0 : i32
    %c0_i32_0 = arith.constant 0 : i32
    return %c0_i32, %arg0 : i32, i32
  }
  func.func @transform_8(%arg0: i32) -> (i32, i32, i32) {
    %c0_i32 = arith.constant 0 : i32
    %c0_i32_0 = arith.constant 0 : i32
    %c0_i32_1 = arith.constant 0 : i32
    return %arg0, %c0_i32, %c0_i32_0 : i32, i32, i32
  }
}

</mosaic_0001>

<bundles_post_ra>
// kernel: _lambda_.3
= control target key start
LH: loop header
LB: loop body
LE: loop exit
PB: predicated region body
PF: predicated region fallthrough
CT: control target
= control target key end

     0   :  { %10 = vsyncpa [#allocation3], 0  ;;  %s1615_s18 = smov 0   ;;  %s2048_s0 = inlined_call_operand.vmem [shape: f32[2], index: 0, kind: input, shape index: {}]   ;;  %s2049_s1 = inlined_call_operand.vmem [shape: f32[4,1024], index: 1, kind: input, shape index: {}]   ;;  %s2050_s2 = inlined_call_operand.vmem [shape: f32[4,1024], index: 2, kind: input, shape index: {}]   ;;  %s2051_s3 = inlined_call_operand.vmem [shape: f32[8,4], index: 3, kind: input, shape index: {}]   ;;  %s2052_s4 = inlined_call_operand.vmem [shape: f32[8,1], index: 4, kind: input, shape index: {}]   ;;  %s2053_s5 = inlined_call_operand.vmem [shape: f32[2,8,1], index: 5, kind: output, shape index: {}]  }
   0x1 LB: > { %s1621_s19 = sadd.s32 4294967295, %s1578_s18   ;;  %p1450_p0 = scmp.ge.s32.totalorder %s1578_s18, 1  ;;  %s1578_s18 = sphi %s1615_s18, %s16_s18  }
   0x2   : > { %p162_p1 = scmp.lt.s32.totalorder %s1578_s18, 3  ;;  %s175_s22 = sshll.u32 %s2048_s0, 4  ;;  %s176_s22 = int_to_ptr.vmem [resolvable:$true] %s175_s22 }
   0x3   : > { %p1470_p3 = scmp.eq.s32.totalorder %s1621_s19, 0  ;;  %s1553_s24 = scalar_lea.vmem %s176_s22, 16 }
   0x4   : > { %p1628_p2 = pnand %p1450_p0, %p162_p1  ;;  %p1554_p6 = scmp.ne.s32.totalorder %s176_s22, %s1553_s24 }
   0x5   : > { %p1561_p10 = scmp.lt.s32.totalorder %s176_s22, %s176_s22  ;;  %p1562_p11 = scmp.lt.s32.totalorder %s1553_s24, %s1553_s24 }
   0x6   : > { %p1466_p4 = pneg %p1628_p2 }
   0x7   : > { %p1563_p12 = por %p1562_p11, %p1561_p10 }
   0x8   : > { %p1467_p5 = pnand %p1470_p3, %p1466_p4 }
   0xa   : > { %p1555_p7 = pneg %p1467_p5 }
   0xc   : > { %p1556_p8 = pnand %p1555_p7, %p1554_p6 }
   0xe   : > { %p1557_p9 = pneg %p1556_p8 }
  0x10   : > { %p1564_p13 = pnand %p1563_p12, %p1557_p9 }
  0x12   : > { %1567 = shalt.err (!%p1564_p13)
}
  0x13   : > { %s1580_s25 = smov [#allocation2]   ;;  %212 = sbr.rel (%p1628_p2) target bundleno = 446 (0x1be), region = 40 }
  0x14   : > { %1469 = dma.vmem_to_smem (!%p1467_p5), %s176_s22, 16, %s1580_s25, [#allocation3]  }
  0x1a   : > { %1573 = dma.done.wait (%p1470_p3), [#allocation3], 16  }
  0x1b   : > { %1575 = vsyncadd (%p1470_p3), [#allocation3], 4294967280 }
  0x1c   : > { %218 = sfence }
  0x1d   : > { %v272_v0 = vld [vmem:[%s2051_s3] sm:$0xff]  ;;  %v1581_v1 = vmov 0   ;;  %v1582_v2 = vmov 1   ;;  %v1583_v4 = vmov 2   ;;  %v1584_v5 = vmov 3   ;;  %s1455_s30 = sshll.u32 %s1621_s19, 2 }
  0x1e   : > { %1485 = vset.pattern.permute.xlu0 %v1581_v1  ;;  %1486 = vset.pattern.permute.xlu1 %v1582_v2  ;;  %v273_v3 = vld [vmem:[%s2052_s4] sm:$0xff]  ;;  %p246_p0 = scmp.lt.s32.totalorder %s1455_s30, 7  ;;  %s263_s6 = sld [smem:[#allocation2 + %s1621_s19]]  ;;  %v287_v6 = vlaneseq  ;;  %vm1117_vm0 = vcmask 1043456   ;;  %vm1356_vm1 = vcmask 1040384   ;;  %vm1358_vm2 = vcmask 1041408  }
  0x1f   : > { %282 = vperm.xlu0 %1485, %v272_v0   ;;  %332 = vperm.xlu1 %1486, %v272_v0   ;;  %p257_p1 = scmp.lt.s32.totalorder %s1621_s19, 1  ;;  %vm1360_vm3 = vcmask 1042432   ;;  %vm1363_vm4 = vcmask 1044480   ;;  %vm1365_vm5 = vcmask 1045504   ;;  %vm1367_vm6 = vcmask 1046528  }
  0x20   : > { %s2056_s30 = smov (!%p246_p0, %s1455_s30), 7  ;;  %v288_v7 = vshrl.u32 %v287_v6, 7  ;;  %vm1369_vm7 = vcmask 7168  }
  0x21   : > { %s1456_s7 = sshll.u32 %s2056_s30, 2  ;;  %s2058_s19 = smov (!%p257_p1, %s1621_s19), 1 }
  0x22   : > { %s255_s11 = scalar_lea.vmem %s2050_s2, %s1456_s7  ;;  %s249_s14 = scalar_lea.vmem %s2049_s1, %s1456_s7  ;;  %v1657_v11 = vsub.s32 0, %v288_v7  ;;  %v1659_v12 = vsub.s32 4, %v288_v7  ;;  %v337_v17 = vsub.s32 1, %v288_v7  ;;  %v341_v18 = vsub.s32 5, %v288_v7 }
  0x23   : > { %276 = vperm.xlu0 %1485, %v273_v3   ;;  %1487 = vset.pattern.permute.xlu1 %v1583_v4  ;;  %v265_v8 = vld [vmem:[%s255_s11] sm:$0xff]  ;;  %v266_v10 = vld [vmem:[%s255_s11 + $0x8] sm:$0xff]  ;;  %v385_v24 = vsub.s32 2, %v288_v7  ;;  %v389_v26 = vsub.s32 6, %v288_v7  ;;  %v1679_v27 = vsub.s32 3, %v288_v7  ;;  %v1681_v28 = vsub.s32 7, %v288_v7 }
  0x24   : > { %380 = vperm.xlu1 %1487, %v272_v0   ;;  %s264_s8 = smul.f32 10.0, %s263_s6  ;;  %v1661_v14 = vld [vmem:[%s249_s14] sm:$0xff]  ;;  %v1663_v16 = vld [vmem:[%s249_s14 + $0x8] sm:$0xff]  ;;  %s1459_s15 = sshll.u32 %s2058_s19, 3 }
  0x25   : > { %v290_v20 = vrot.slane %v1661_v14, %v1657_v11  ;;  %v294_v21 = vrot.slane %v1661_v14, %v1659_v12  ;;  %v298_v22 = vrot.slane %v1663_v16, %v1657_v11  ;;  %v302_v25 = vrot.slane %v1663_v16, %v1659_v12  ;;  %s260_s20 = scalar_lea.vmem %s2053_s5, %s1459_s15 }
  0x26   : > { %v267_v9 = vstv %s264_s8  ;;  %v338_v29 = vrot.slane %v1661_v14, %v337_v17  ;;  %v342_v30 = vrot.slane %v1661_v14, %v341_v18  ;;  %v346_v31 = vrot.slane %v1663_v16, %v337_v17 }
  0x27   : > { %1488 = vset.pattern.permute.xlu0 %v1584_v5  ;;  %v268_v13 = vmul.f32 %v267_v9, %v265_v8  ;;  %v269_v15 = vmul.f32 %v267_v9, %v266_v10  ;;  %v350_v32 = vrot.slane %v1663_v16, %v341_v18  ;;  %v310_v33 = vrot.slane %v290_v20, %v1657_v11 }
  0x28   : > { %428 = vperm.xlu0 %1488, %v272_v0   ;;  %v314_v34 = vrot.slane %v294_v21, %v1657_v11  ;;  %v318_v35 = vrot.slane %v298_v22, %v1657_v11  ;;  %v322_v41 = vrot.slane %v302_v25, %v1657_v11  ;;  %v358_v45 = vrot.slane %v338_v29, %v337_v17 }
  0x29   : > { %v1666_v19 = vadd.f32 %v268_v13, %v1661_v14  ;;  %v1675_v23 = vadd.f32 %v269_v15, %v1663_v16  ;;  %v362_v46 = vrot.slane %v342_v30, %v337_v17  ;;  %v366_v47 = vrot.slane %v346_v31, %v337_v17 }
  0x2a   : > { %v370_v48 = vrot.slane %v350_v32, %v337_v17  ;;  %v386_v50 = vrot.slane %v1661_v14, %v385_v24  ;;  %v390_v51 = vrot.slane %v1661_v14, %v389_v26  ;;  %v394_v52 = vrot.slane %v1663_v16, %v385_v24 }
  0x2b   : > { %v480_v36 = vrot.slane %v1666_v19, %v1657_v11  ;;  %v484_v37 = vrot.slane %v1666_v19, %v1659_v12  ;;  %v488_v38 = vrot.slane %v1675_v23, %v1657_v11  ;;  %v492_v39 = vrot.slane %v1675_v23, %v1659_v12 }
  0x2c   : > { %v524_v40 = vrot.slane %v1666_v19, %v337_v17  ;;  %v528_v42 = vrot.slane %v1666_v19, %v341_v18  ;;  %v532_v43 = vrot.slane %v1675_v23, %v337_v17  ;;  %v536_v44 = vrot.slane %v1675_v23, %v341_v18 }
  0x2d   : > { %v500_v49 = vrot.slane %v480_v36, %v1657_v11  ;;  %v504_v53 = vrot.slane %v484_v37, %v1657_v11  ;;  %v508_v54 = vrot.slane %v488_v38, %v1657_v11  ;;  %v512_v55 = vrot.slane %v492_v39, %v1657_v11 }
  0x2e   : > { %v544_v56 = vrot.slane %v524_v40, %v337_v17  ;;  %v548_v57 = vrot.slane %v528_v42, %v337_v17  ;;  %v552_v58 = vrot.slane %v532_v43, %v337_v17  ;;  %v556_v59 = vrot.slane %v536_v44, %v337_v17 }
  0x2f   : > { %v398_v60 = vrot.slane %v1663_v16, %v389_v26  ;;  %v568_v61 = vrot.slane %v1666_v19, %v385_v24  ;;  %v572_v62 = vrot.slane %v1666_v19, %v389_v26  ;;  %v576_v63 = vrot.slane %v1675_v23, %v385_v24 }
  0x30   : > { %v580_v0 = vrot.slane %v1675_v23, %v389_v26  ;;  %v434_v1 = vrot.slane %v1661_v14, %v1679_v27  ;;  %v438_v2 = vrot.slane %v1661_v14, %v1681_v28  ;;  %v442_v3 = vrot.slane %v1663_v16, %v1679_v27 }
  0x31   : > { %v446_v4 = vrot.slane %v1663_v16, %v1681_v28  ;;  %v612_v5 = vrot.slane %v1666_v19, %v1679_v27  ;;  %v616_v6 = vrot.slane %v1666_v19, %v1681_v28  ;;  %v620_v7 = vrot.slane %v1675_v23, %v1679_v27 }
  0x32   : > { %v624_v8 = vrot.slane %v1675_v23, %v1681_v28  ;;  %v406_v9 = vrot.slane %v386_v50, %v385_v24  ;;  %v410_v10 = vrot.slane %v390_v51, %v385_v24  ;;  %v414_v13 = vrot.slane %v394_v52, %v385_v24 }
  0x33   : > { %v418_v14 = vrot.slane %v398_v60, %v385_v24  ;;  %v588_v15 = vrot.slane %v568_v61, %v385_v24  ;;  %v592_v17 = vrot.slane %v572_v62, %v385_v24  ;;  %v596_v18 = vrot.slane %v576_v63, %v385_v24 }
  0x34   : > { %v600_v16 = vrot.slane %v580_v0, %v385_v24  ;;  %v454_v20 = vrot.slane %v434_v1, %v1679_v27  ;;  %v458_v21 = vrot.slane %v438_v2, %v1679_v27  ;;  %v462_v19 = vrot.slane %v442_v3, %v1679_v27 }
  0x35   : > { %v466_v22 = vrot.slane %v446_v4, %v1679_v27  ;;  %v632_v23 = vrot.slane %v612_v5, %v1679_v27  ;;  %v636_v28 = vrot.slane %v616_v6, %v1679_v27  ;;  %v640_v29 = vrot.slane %v620_v7, %v1679_v27 }
  0x36   : > { %v644_v30 = vrot.slane %v624_v8, %v1679_v27 }
  0x9e   : > { %v283_v25 = vpop.permute.xlu0 %282  ;;  %v333_v26 = vpop.permute.xlu1 %332 }
  0x9f   : > { %v323_v31 = vmul.f32 %v310_v33, %v283_v25  ;;  %v324_v24 = vmul.f32 %v314_v34, %v283_v25  ;;  %v325_v32 = vmul.f32 %v318_v35, %v283_v25  ;;  %v326_v36 = vmul.f32 %v322_v41, %v283_v25 }
  0xa0   : > { %v513_v37 = vmul.f32 %v500_v49, %v283_v25  ;;  %v514_v38 = vmul.f32 %v504_v53, %v283_v25  ;;  %v515_v39 = vmul.f32 %v508_v54, %v283_v25  ;;  %v516_v40 = vmul.f32 %v512_v55, %v283_v25 }
  0xa1   : > { %v371_v42 = vmul.f32 %v358_v45, %v333_v26  ;;  %v372_v43 = vmul.f32 %v362_v46, %v333_v26  ;;  %v373_v44 = vmul.f32 %v366_v47, %v333_v26  ;;  %v374_v50 = vmul.f32 %v370_v48, %v333_v26 }
  0xa2   : > { %v557_v51 = vmul.f32 %v544_v56, %v333_v26  ;;  %v558_v52 = vmul.f32 %v548_v57, %v333_v26  ;;  %v559_v60 = vmul.f32 %v552_v58, %v333_v26  ;;  %v560_v61 = vmul.f32 %v556_v59, %v333_v26  ;;  %v277_v62 = vpop.permute.xlu0 %276 }
  0xa3   : > { %v327_v63 = vadd.f32 %v323_v31, %v277_v62  ;;  %v328_v0 = vadd.f32 %v324_v24, %v277_v62  ;;  %v329_v27 = vadd.f32 %v325_v32, %v277_v62  ;;  %v330_v33 = vadd.f32 %v326_v36, %v277_v62  ;;  %v381_v53 = vpop.permute.xlu1 %380 }
  0xa4   : > { %v517_v34 = vadd.f32 %v513_v37, %v277_v62  ;;  %v518_v35 = vadd.f32 %v514_v38, %v277_v62  ;;  %v519_v41 = vadd.f32 %v515_v39, %v277_v62  ;;  %v520_v49 = vadd.f32 %v516_v40, %v277_v62 }
  0xa5   : > { %v375_v54 = vadd.f32 %v371_v42, %v327_v63  ;;  %v376_v55 = vadd.f32 %v372_v43, %v328_v0  ;;  %v377_v45 = vadd.f32 %v373_v44, %v329_v27  ;;  %v378_v46 = vadd.f32 %v374_v50, %v330_v33 }
  0xa6   : > { %v561_v47 = vadd.f32 %v557_v51, %v517_v34  ;;  %v562_v48 = vadd.f32 %v558_v52, %v518_v35  ;;  %v563_v56 = vadd.f32 %v559_v60, %v519_v41  ;;  %v564_v57 = vadd.f32 %v560_v61, %v520_v49 }
  0xa7   : > { %v419_v58 = vmul.f32 %v406_v9, %v381_v53  ;;  %v420_v59 = vmul.f32 %v410_v10, %v381_v53  ;;  %v421_v1 = vmul.f32 %v414_v13, %v381_v53  ;;  %v422_v2 = vmul.f32 %v418_v14, %v381_v53  ;;  %v429_v7 = vpop.permute.xlu0 %428 }
  0xa8   : > { %v601_v3 = vmul.f32 %v588_v15, %v381_v53  ;;  %v602_v4 = vmul.f32 %v592_v17, %v381_v53  ;;  %v603_v5 = vmul.f32 %v596_v18, %v381_v53  ;;  %v604_v6 = vmul.f32 %v600_v16, %v381_v53 }
  0xa9   : > { %v423_v8 = vadd.f32 %v419_v58, %v375_v54  ;;  %v424_v25 = vadd.f32 %v420_v59, %v376_v55  ;;  %v425_v26 = vadd.f32 %v421_v1, %v377_v45  ;;  %v426_v31 = vadd.f32 %v422_v2, %v378_v46 }
  0xaa   : > { %v605_v24 = vadd.f32 %v601_v3, %v561_v47  ;;  %v606_v32 = vadd.f32 %v602_v4, %v562_v48  ;;  %v607_v36 = vadd.f32 %v603_v5, %v563_v56  ;;  %v608_v37 = vadd.f32 %v604_v6, %v564_v57 }
  0xab   : > { %v467_v38 = vmul.f32 %v454_v20, %v429_v7  ;;  %v468_v39 = vmul.f32 %v458_v21, %v429_v7  ;;  %v469_v40 = vmul.f32 %v462_v19, %v429_v7  ;;  %v470_v9 = vmul.f32 %v466_v22, %v429_v7 }
  0xac   : > { %v645_v10 = vmul.f32 %v632_v23, %v429_v7  ;;  %v646_v13 = vmul.f32 %v636_v28, %v429_v7  ;;  %v647_v14 = vmul.f32 %v640_v29, %v429_v7  ;;  %v648_v15 = vmul.f32 %v644_v30, %v429_v7 }
  0xad   : > { %v471_v17 = vadd.f32 %v467_v38, %v423_v8  ;;  %v472_v18 = vadd.f32 %v468_v39, %v424_v25  ;;  %v473_v16 = vadd.f32 %v469_v40, %v425_v26  ;;  %v474_v42 = vadd.f32 %v470_v9, %v426_v31 }
  0xae   : > { %v1739_v43 = vadd.f32 %v645_v10, %v605_v24  ;;  %v1741_v44 = vadd.f32 %v646_v13, %v606_v32  ;;  %v1743_v50 = vadd.f32 %v647_v14, %v607_v36  ;;  %v1745_v51 = vadd.f32 %v648_v15, %v608_v37 }
  0xaf   : > { %v657_v20 = vrot.slane %v471_v17, 1  ;;  %v658_v21 = vrot.slane %v472_v18, 1  ;;  %v659_v19 = vrot.slane %v473_v16, 1  ;;  %v660_v22 = vrot.slane %v474_v42, 1 }
  0xb0   : > { %v669_v23 = vrot.slane %v471_v17, 2  ;;  %v670_v28 = vrot.slane %v472_v18, 2  ;;  %v671_v29 = vrot.slane %v473_v16, 2  ;;  %v672_v30 = vrot.slane %v474_v42, 2 }
  0xb1   : > { %v665_v52 = vmax.f32 %v471_v17, %v657_v20  ;;  %v666_v60 = vmax.f32 %v472_v18, %v658_v21  ;;  %v667_v61 = vmax.f32 %v473_v16, %v659_v19  ;;  %v668_v62 = vmax.f32 %v474_v42, %v660_v22 }
  0xb2   : > { %v681_v63 = vrot.slane %v471_v17, 3  ;;  %v682_v0 = vrot.slane %v472_v18, 3  ;;  %v683_v27 = vrot.slane %v473_v16, 3  ;;  %v684_v33 = vrot.slane %v474_v42, 3 }
  0xb3   : > { %v677_v34 = vmax.f32 %v665_v52, %v669_v23  ;;  %v678_v35 = vmax.f32 %v666_v60, %v670_v28  ;;  %v679_v41 = vmax.f32 %v667_v61, %v671_v29  ;;  %v680_v49 = vmax.f32 %v668_v62, %v672_v30 }
  0xb4   : > { %v881_v53 = vrot.slane %v1739_v43, 1  ;;  %v882_v54 = vrot.slane %v1741_v44, 1  ;;  %v883_v48 = vrot.slane %v1743_v50, 1  ;;  %v884_v56 = vrot.slane %v1745_v51, 1 }
  0xb5   : > { %v689_v55 = vmax.f32 %v677_v34, %v681_v63  ;;  %v690_v45 = vmax.f32 %v678_v35, %v682_v0  ;;  %v691_v46 = vmax.f32 %v679_v41, %v683_v27  ;;  %v692_v47 = vmax.f32 %v680_v49, %v684_v33 }
  0xb6   : > { %v889_v57 = vmax.f32 %v1739_v43, %v881_v53  ;;  %v890_v58 = vmax.f32 %v1741_v44, %v882_v54  ;;  %v891_v9 = vmax.f32 %v1743_v50, %v883_v48  ;;  %v892_v15 = vmax.f32 %v1745_v51, %v884_v56 }
  0xb7   : > { %v696_v59 = vrot.slane %v689_v55, %v1657_v11  ;;  %v700_v1 = vrot.slane %v690_v45, %v1657_v11  ;;  %v704_v2 = vrot.slane %v691_v46, %v1657_v11  ;;  %v708_v3 = vrot.slane %v692_v47, %v1657_v11 }
  0xb8   : > { %v788_v4 = vrot.slane %v689_v55, %v1659_v12  ;;  %v792_v5 = vrot.slane %v690_v45, %v1659_v12  ;;  %v796_v6 = vrot.slane %v691_v46, %v1659_v12  ;;  %v800_v7 = vrot.slane %v692_v47, %v1659_v12 }
  0xb9   : > { %v709_v8 = vsub.f32 %v471_v17, %v696_v59  ;;  %v710_v25 = vsub.f32 %v472_v18, %v700_v1  ;;  %v711_v26 = vsub.f32 %v473_v16, %v704_v2  ;;  %v712_v31 = vsub.f32 %v474_v42, %v708_v3 }
  0xba   : > { %v801_v24 = vsub.f32 %v471_v17, %v788_v4  ;;  %v802_v32 = vsub.f32 %v472_v18, %v792_v5  ;;  %v803_v36 = vsub.f32 %v473_v16, %v796_v6  ;;  %v804_v37 = vsub.f32 %v474_v42, %v800_v7 }
  0xbb   : > { %v713_v38 = vmul.f32 1.442695, %v709_v8  ;;  %v715_v39 = vmul.f32 1.442695, %v710_v25  ;;  %v717_v40 = vmul.f32 1.442695, %v711_v26 }
  0xbc   : > { %v719_v10 = vmul.f32 1.442695, %v712_v31  ;;  %v805_v13 = vmul.f32 1.442695, %v801_v24  ;;  %v807_v14 = vmul.f32 1.442695, %v802_v32 }
  0xbd   : > { %1489 = vpow2.f32 %v713_v38  ;;  %v809_v20 = vmul.f32 1.442695, %v803_v36  ;;  %v811_v21 = vmul.f32 1.442695, %v804_v37  ;;  %v893_v19 = vrot.slane %v1739_v43, 2 }
  0xbe   : > { %1491 = vpow2.f32 %v715_v39  ;;  %v894_v17 = vrot.slane %v1741_v44, 2  ;;  %v895_v18 = vrot.slane %v1743_v50, 2  ;;  %v896_v16 = vrot.slane %v1745_v51, 2 }
  0xbf   : > { %1493 = vpow2.f32 %v717_v40  ;;  %v901_v42 = vmax.f32 %v889_v57, %v893_v19  ;;  %v905_v22 = vrot.slane %v1739_v43, 3  ;;  %v906_v23 = vrot.slane %v1741_v44, 3 }
  0xc0   : > { %1495 = vpow2.f32 %v719_v10  ;;  %v902_v28 = vmax.f32 %v890_v58, %v894_v17  ;;  %v903_v29 = vmax.f32 %v891_v9, %v895_v18  ;;  %v904_v30 = vmax.f32 %v892_v15, %v896_v16 }
  0xc1   : > { %1497 = vpow2.f32 %v805_v13  ;;  %v907_v52 = vrot.slane %v1743_v50, 3  ;;  %v908_v60 = vrot.slane %v1745_v51, 3  ;;  %v913_v61 = vmax.f32 %v901_v42, %v905_v22 }
  0xc2   : > { %1499 = vpow2.f32 %v807_v14  ;;  %v914_v62 = vmax.f32 %v902_v28, %v906_v23 }
  0xc3   : > { %1501 = vpow2.f32 %v809_v20  ;;  %v915_v63 = vmax.f32 %v903_v29, %v907_v52  ;;  %v916_v0 = vmax.f32 %v904_v30, %v908_v60  ;;  %v920_v27 = vrot.slane %v913_v61, %v1657_v11 }
  0xc4   : > { %1503 = vpow2.f32 %v811_v21  ;;  %v924_v33 = vrot.slane %v914_v62, %v1657_v11  ;;  %v1012_v34 = vrot.slane %v913_v61, %v1659_v12  ;;  %v1016_v35 = vrot.slane %v914_v62, %v1659_v12 }
  0xc5   : > { %v928_v41 = vrot.slane %v915_v63, %v1657_v11  ;;  %v932_v49 = vrot.slane %v916_v0, %v1657_v11  ;;  %v933_v53 = vsub.f32 %v1739_v43, %v920_v27  ;;  %v1020_v54 = vrot.slane %v915_v63, %v1659_v12 }
  0xc6   : > { %v934_v55 = vsub.f32 %v1741_v44, %v924_v33  ;;  %v1024_v45 = vrot.slane %v916_v0, %v1659_v12  ;;  %v1025_v46 = vsub.f32 %v1739_v43, %v1012_v34  ;;  %v1026_v47 = vsub.f32 %v1741_v44, %v1016_v35 }
  0xc7   : > { %v1783_v48 = vpop.eup %1489  ;;  %v935_v56 = vsub.f32 %v1743_v50, %v928_v41  ;;  %v936_v57 = vsub.f32 %v1745_v51, %v932_v49  ;;  %v937_v58 = vmul.f32 1.442695, %v933_v53  ;;  %v1027_v59 = vsub.f32 %v1743_v50, %v1020_v54 }
  0xc8   : > { %v1788_v1 = vpop.eup %1491  ;;  %v939_v2 = vmul.f32 1.442695, %v934_v55  ;;  %v1028_v3 = vsub.f32 %v1745_v51, %v1024_v45  ;;  %v1029_v4 = vmul.f32 1.442695, %v1025_v46  ;;  %v1031_v5 = vmul.f32 1.442695, %v1026_v47 }
  0xc9   : > { %v1791_v6 = vpop.eup %1493  ;;  %1505 = vpow2.f32 %v937_v58  ;;  %v941_v43 = vmul.f32 1.442695, %v935_v56  ;;  %v943_v44 = vmul.f32 1.442695, %v936_v57  ;;  %v1033_v7 = vmul.f32 1.442695, %v1027_v59 }
  0xca   : > { %v1793_v8 = vpop.eup %1495  ;;  %1507 = vpow2.f32 %v939_v2  ;;  %v1035_v25 = vmul.f32 1.442695, %v1028_v3  ;;  %v725_v26 = vrot.slane %v1783_v48, 1  ;;  %v726_v50 = vrot.slane %v1788_v1, 1 }
  0xcb   : > { %v1797_v31 = vpop.eup %1497  ;;  %1509 = vpow2.f32 %v941_v43  ;;  %v727_v51 = vrot.slane %v1791_v6, 1  ;;  %v728_v24 = vrot.slane %v1793_v8, 1  ;;  %v737_v32 = vrot.slane %v1783_v48, 2 }
  0xcc   : > { %v1802_v36 = vpop.eup %1499  ;;  %1511 = vpow2.f32 %v943_v44  ;;  %v817_v37 = vrot.slane %v1797_v31, 1  ;;  %v829_v38 = vrot.slane %v1797_v31, 2  ;;  %v841_v39 = vrot.slane %v1797_v31, 3 }
  0xcd   : > { %v1807_v40 = vpop.eup %1501  ;;  %1513 = vpow2.f32 %v1029_v4  ;;  %v818_v9 = vrot.slane %v1802_v36, 1  ;;  %v830_v10 = vrot.slane %v1802_v36, 2  ;;  %v842_v13 = vrot.slane %v1802_v36, 3 }
  0xce   : > { %v1812_v14 = vpop.eup %1503  ;;  %1515 = vpow2.f32 %v1031_v5  ;;  %v819_v15 = vrot.slane %v1807_v40, 1  ;;  %v825_v20 = vadd.f32 %v1797_v31, %v817_v37  ;;  %v831_v21 = vrot.slane %v1807_v40, 2 }
  0xcf   : > { %1517 = vpow2.f32 %v1033_v7  ;;  %v820_v19 = vrot.slane %v1812_v14, 1  ;;  %v826_v17 = vadd.f32 %v1802_v36, %v818_v9  ;;  %v832_v18 = vrot.slane %v1812_v14, 2 }
  0xd0   : > { %1519 = vpow2.f32 %v1035_v25  ;;  %v827_v16 = vadd.f32 %v1807_v40, %v819_v15  ;;  %v837_v42 = vadd.f32 %v829_v38, %v825_v20  ;;  %v843_v22 = vrot.slane %v1807_v40, 3 }
  0xd1   : > { %v828_v23 = vadd.f32 %v1812_v14, %v820_v19  ;;  %v838_v28 = vadd.f32 %v830_v10, %v826_v17  ;;  %v844_v29 = vrot.slane %v1812_v14, 3  ;;  %v1825_v30 = vadd.f32 %v1783_v48, %v725_v26 }
  0xd2   : > { %v839_v52 = vadd.f32 %v831_v21, %v827_v16  ;;  %v1827_v60 = vadd.f32 %v841_v39, %v837_v42  ;;  %v1830_v61 = vadd.f32 %v1788_v1, %v726_v50  ;;  %v1833_v62 = vadd.f32 %v1791_v6, %v727_v51 }
  0xd3   : > { %v1835_v63 = vpop.eup %1505  ;;  %v840_v0 = vadd.f32 %v832_v18, %v828_v23  ;;  %v1837_v27 = vadd.f32 %v842_v13, %v838_v28  ;;  %v1840_v33 = vadd.f32 %v1793_v8, %v728_v24  ;;  %v738_v34 = vrot.slane %v1788_v1, 2 }
  0xd4   : > { %v1843_v35 = vpop.eup %1507  ;;  %v949_v41 = vrot.slane %v1835_v63, 1  ;;  %v961_v49 = vrot.slane %v1835_v63, 2  ;;  %v973_v53 = vrot.slane %v1835_v63, 3  ;;  %v1848_v54 = vadd.f32 %v843_v22, %v839_v52 }
  0xd5   : > { %v1850_v55 = vpop.eup %1509  ;;  %v950_v45 = vrot.slane %v1843_v35, 1  ;;  %v962_v46 = vrot.slane %v1843_v35, 2  ;;  %v974_v47 = vrot.slane %v1843_v35, 3  ;;  %v1855_v56 = vadd.f32 %v844_v29, %v840_v0 }
  0xd6   : > { %v1857_v57 = vpop.eup %1511  ;;  %v951_v58 = vrot.slane %v1850_v55, 1  ;;  %v957_v59 = vadd.f32 %v1835_v63, %v949_v41  ;;  %v963_v2 = vrot.slane %v1850_v55, 2  ;;  %v975_v3 = vrot.slane %v1850_v55, 3 }
  0xd7   : > { %v1863_v4 = vpop.eup %1513  ;;  %v952_v5 = vrot.slane %v1857_v57, 1  ;;  %v958_v43 = vadd.f32 %v1843_v35, %v950_v45  ;;  %v964_v44 = vrot.slane %v1857_v57, 2  ;;  %v976_v7 = vrot.slane %v1857_v57, 3 }
  0xd8   : > { %v1869_v25 = vpop.eup %1515  ;;  %v959_v26 = vadd.f32 %v1850_v55, %v951_v58  ;;  %v969_v50 = vadd.f32 %v961_v49, %v957_v59  ;;  %v1041_v51 = vrot.slane %v1863_v4, 1  ;;  %v1053_v24 = vrot.slane %v1863_v4, 2 }
  0xd9   : > { %v1874_v37 = vpop.eup %1517  ;;  %v960_v38 = vadd.f32 %v1857_v57, %v952_v5  ;;  %v970_v39 = vadd.f32 %v962_v46, %v958_v43  ;;  %v1042_v9 = vrot.slane %v1869_v25, 1  ;;  %v1054_v10 = vrot.slane %v1869_v25, 2 }
  0xda   : > { %v1879_v13 = vpop.eup %1519  ;;  %v971_v15 = vadd.f32 %v963_v2, %v959_v26  ;;  %v981_v20 = vadd.f32 %v973_v53, %v969_v50  ;;  %v1043_v21 = vrot.slane %v1874_v37, 1  ;;  %v1049_v19 = vadd.f32 %v1863_v4, %v1041_v51 }
  0xdb   : > { %v972_v17 = vadd.f32 %v964_v44, %v960_v38  ;;  %v982_v18 = vadd.f32 %v974_v47, %v970_v39  ;;  %v1044_v16 = vrot.slane %v1879_v13, 1  ;;  %v1050_v42 = vadd.f32 %v1869_v25, %v1042_v9 }
  0xdc   : > { %v983_v22 = vadd.f32 %v975_v3, %v971_v15  ;;  %v988_v23 = vrot.slane %v981_v20, %v1657_v11  ;;  %v1051_v28 = vadd.f32 %v1874_v37, %v1043_v21  ;;  %v1055_v29 = vrot.slane %v1874_v37, 2 }
  0xdd   : > { %v984_v52 = vadd.f32 %v976_v7, %v972_v17  ;;  %v992_v0 = vrot.slane %v982_v18, %v1657_v11  ;;  %v1052_v41 = vadd.f32 %v1879_v13, %v1044_v16  ;;  %v1056_v49 = vrot.slane %v1879_v13, 2 }
  0xde   : > { %v996_v53 = vrot.slane %v983_v22, %v1657_v11  ;;  %1521 = vrcp.f32 %v988_v23  ;;  %v1061_v45 = vadd.f32 %v1053_v24, %v1049_v19  ;;  %v1062_v46 = vadd.f32 %v1054_v10, %v1050_v42 }
  0xdf   : > { %v1000_v47 = vrot.slane %v984_v52, %v1657_v11  ;;  %1523 = vrcp.f32 %v992_v0  ;;  %v1063_v58 = vadd.f32 %v1055_v29, %v1051_v28  ;;  %v1064_v59 = vadd.f32 %v1056_v49, %v1052_v41 }
  0xe0   : > { %1525 = vrcp.f32 %v996_v53  ;;  %v1065_v2 = vrot.slane %v1863_v4, 3  ;;  %v1066_v3 = vrot.slane %v1869_v25, 3  ;;  %v1067_v5 = vrot.slane %v1874_v37, 3 }
  0xe1   : > { %1527 = vrcp.f32 %v1000_v47  ;;  %v1068_v43 = vrot.slane %v1879_v13, 3  ;;  %v856_v44 = vrot.slane %v1827_v60, %v1659_v12  ;;  %v860_v7 = vrot.slane %v1837_v27, %v1659_v12 }
  0xe2   : > { %v1073_v26 = vadd.f32 %v1065_v2, %v1061_v45  ;;  %v1074_v50 = vadd.f32 %v1066_v3, %v1062_v46  ;;  %v1075_v51 = vadd.f32 %v1067_v5, %v1063_v58  ;;  %v864_v24 = vrot.slane %v1848_v54, %v1659_v12 }
  0xe3   : > { %v1076_v38 = vadd.f32 %v1068_v43, %v1064_v59  ;;  %v868_v39 = vrot.slane %v1855_v56, %v1659_v12  ;;  %1529 = vrcp.f32 %v856_v44  ;;  %v739_v9 = vrot.slane %v1791_v6, 2 }
  0xe4   : > { %v1080_v10 = vrot.slane %v1073_v26, %v1659_v12  ;;  %v1084_v60 = vrot.slane %v1074_v50, %v1659_v12  ;;  %v1088_v15 = vrot.slane %v1075_v51, %v1659_v12  ;;  %1531 = vrcp.f32 %v860_v7 }
  0xe5   : > { %v1092_v27 = vrot.slane %v1076_v38, %v1659_v12  ;;  %1533 = vrcp.f32 %v864_v24  ;;  %v740_v20 = vrot.slane %v1793_v8, 2  ;;  %v745_v54 = vadd.f32 %v737_v32, %v1825_v30 }
  0xe6   : > { %1535 = vrcp.f32 %v1080_v10  ;;  %v746_v56 = vadd.f32 %v738_v34, %v1830_v61  ;;  %v747_v21 = vadd.f32 %v739_v9, %v1833_v62  ;;  %v749_v19 = vrot.slane %v1783_v48, 3 }
  0xe7   : > { %1537 = vrcp.f32 %v1084_v60  ;;  %v748_v17 = vadd.f32 %v740_v20, %v1840_v33  ;;  %v750_v12 = vrot.slane %v1788_v1, 3  ;;  %v751_v18 = vrot.slane %v1791_v6, 3 }
  0xe8   : > { %v1522_v16 = vpop.eup %1521  ;;  %1539 = vrcp.f32 %v1088_v15  ;;  %v752_v32 = vrot.slane %v1793_v8, 3  ;;  %v757_v30 = vadd.f32 %v749_v19, %v745_v54 }
  0xe9   : > { %v1524_v42 = vpop.eup %1523  ;;  %v1924_v61 = vmul.f32 %v1522_v16, %v1835_v63  ;;  %1541 = vrcp.f32 %v1092_v27  ;;  %v758_v62 = vadd.f32 %v750_v12, %v746_v56  ;;  %v1926_v34 = vadd.f32 %v751_v18, %v747_v21 }
  0xea   : > { %v1526_v22 = vpop.eup %1525  ;;  %v1929_v33 = vmul.f32 %v1524_v42, %v1843_v35  ;;  %v1931_v23 = vadd.f32 %v752_v32, %v748_v17  ;;  %v764_v28 = vrot.slane %v757_v30, %v1657_v11  ;;  %1543 = vrcp.f32 %v868_v39 }
  0xeb   : > { %v1528_v29 = vpop.eup %1527  ;;  %v1935_v52 = vmul.f32 %v1526_v22, %v1850_v55  ;;  %v1212_v63 = vsel %vm1117_vm0, %v1924_v61, 0.0  ;;  %v768_v0 = vrot.slane %v758_v62, %v1657_v11  ;;  %v772_v53 = vrot.slane %v1926_v34, %v1657_v11 }
  0xec   : > { %v1941_v41 = vmul.f32 %v1528_v29, %v1857_v57  ;;  %v1213_v49 = vrot.slane %v1212_v63, 4  ;;  %v1219_v35 = vsel %vm1117_vm0, %v1929_v33, 0.0  ;;  %v776_v47 = vrot.slane %v1931_v23, %v1657_v11 }
  0xed   : > { %v1530_v45 = vpop.eup %1529  ;;  %v1220_v46 = vrot.slane %v1219_v35, 4  ;;  %v1226_v55 = vsel %vm1117_vm0, %v1935_v52, 0.0  ;;  %1545 = vrcp.f32 %v764_v28 }
  0xee   : > { %v1532_v58 = vpop.eup %1531  ;;  %v1214_v59 = vadd.f32 %v1213_v49, %v1212_v63  ;;  %v1227_v57 = vrot.slane %v1226_v55, 4  ;;  %v1233_v2 = vsel %vm1117_vm0, %v1941_v41, 0.0  ;;  %v1954_v3 = vmul.f32 %v1530_v45, %v1797_v31 }
  0xef   : > { %v1534_v5 = vpop.eup %1533  ;;  %v1221_v43 = vadd.f32 %v1220_v46, %v1219_v35  ;;  %v1234_v44 = vrot.slane %v1233_v2, 4  ;;  %v1957_v7 = vmul.f32 %v1532_v58, %v1802_v36  ;;  %1547 = vrcp.f32 %v768_v0 }
  0xf0   : > { %v1536_v26 = vpop.eup %1535  ;;  %v1215_v50 = vrot.slane %v1214_v59, 2  ;;  %v1228_v51 = vadd.f32 %v1227_v57, %v1226_v55  ;;  %v1960_v24 = vmul.f32 %v1534_v5, %v1807_v40  ;;  %v1105_v38 = vrot.slane %v1954_v3, 4 }
  0xf1   : > { %v1538_v39 = vpop.eup %1537  ;;  %v1222_v9 = vrot.slane %v1221_v43, 2  ;;  %v1235_v10 = vadd.f32 %v1234_v44, %v1233_v2  ;;  %v1964_v31 = vmul.f32 %v1536_v26, %v1863_v4  ;;  %v1106_v60 = vrot.slane %v1957_v7, 4 }
  0xf2   : > { %v1540_v15 = vpop.eup %1539  ;;  %v1216_v36 = vadd.f32 %v1215_v50, %v1214_v59  ;;  %v1229_v27 = vrot.slane %v1228_v51, 2  ;;  %v1968_v20 = vmul.f32 %v1538_v39, %v1869_v25  ;;  %v1107_v54 = vrot.slane %v1960_v24, 4 }
  0xf3   : > { %v1542_v40 = vpop.eup %1541  ;;  %v1223_v56 = vadd.f32 %v1222_v9, %v1221_v43  ;;  %v1236_v21 = vrot.slane %v1235_v10, 2  ;;  %v1972_v19 = vmul.f32 %v1540_v15, %v1874_v37  ;;  %v1249_v17 = vrot.slane %v1964_v31, 4 }
  0xf4   : > { %v1217_v4 = vrot.slane %v1216_v36, 1  ;;  %v1230_v12 = vadd.f32 %v1229_v27, %v1228_v51  ;;  %v1976_v18 = vmul.f32 %v1542_v40, %v1879_v13  ;;  %v1250_v16 = vrot.slane %v1968_v20, 4  ;;  %v1544_v32 = vpop.eup %1543 }
  0xf5   : > { %v1224_v25 = vrot.slane %v1223_v56, 1  ;;  %v1237_v30 = vadd.f32 %v1236_v21, %v1235_v10  ;;  %v1251_v42 = vrot.slane %v1972_v19, 4  ;;  %v1257_v62 = vsel %vm1117_vm0, %v1249_v17, 0.0 }
  0xf6   : > { %v1218_v22 = vadd.f32 %v1217_v4, %v1216_v36  ;;  %v1231_v28 = vrot.slane %v1230_v12, 1  ;;  %v1252_v37 = vrot.slane %v1976_v18, 4  ;;  %v1258_v29 = vrot.slane %v1257_v62, 4 }
  0xf7   : > { %v1546_v63 = vpop.eup %1545  ;;  %v1225_v0 = vadd.f32 %v1224_v25, %v1223_v56  ;;  %v1238_v49 = vrot.slane %v1237_v30, 1  ;;  %v1264_v13 = vsel %vm1117_vm0, %v1250_v16, 0.0  ;;  %v1271_v35 = vsel %vm1117_vm0, %v1251_v42, 0.0 }
  0xf8   : > { %v1232_v45 = vadd.f32 %v1231_v28, %v1230_v12  ;;  %v1259_v46 = vadd.f32 %v1258_v29, %v1257_v62  ;;  %v1265_v55 = vrot.slane %v1264_v13, 4  ;;  %v1272_v58 = vrot.slane %v1271_v35, 4 }
  0xf9   : > { %v1548_v59 = vpop.eup %1547  ;;  %v1239_v57 = vadd.f32 %v1238_v49, %v1237_v30  ;;  %v1240_v2 = vadd.f32 %v1225_v0, %v1218_v22  ;;  %v1278_v5 = vsel %vm1117_vm0, %v1252_v37, 0.0  ;;  %v1986_v43 = vmul.f32 %v1544_v32, %v1812_v14 }
  0xfa   : > { %v1260_v44 = vrot.slane %v1259_v46, 2  ;;  %v1266_v26 = vadd.f32 %v1265_v55, %v1264_v13  ;;  %v1273_v50 = vadd.f32 %v1272_v58, %v1271_v35  ;;  %v1279_v51 = vrot.slane %v1278_v5, 4 }
  0xfb   : > { %v1241_v39 = vadd.f32 %v1240_v2, %v1232_v45  ;;  %v1108_v9 = vrot.slane %v1986_v43, 4  ;;  %v1113_v10 = vmul.f32 %v1105_v38, %v1924_v61  ;;  %v1114_v15 = vmul.f32 %v1106_v60, %v1929_v33 }
  0xfc   : > { %v1261_v36 = vadd.f32 %v1260_v44, %v1259_v46  ;;  %v1267_v27 = vrot.slane %v1266_v26, 2  ;;  %v1274_v40 = vrot.slane %v1273_v50, 2  ;;  %v1280_v14 = vadd.f32 %v1279_v51, %v1278_v5 }
  0xfd   : > { %v1242_v56 = vadd.f32 %v1241_v39, %v1239_v57  ;;  %v1115_v21 = vmul.f32 %v1107_v54, %v1935_v52  ;;  %v1116_v17 = vmul.f32 %v1108_v9, %v1941_v41  ;;  %v1118_v4 = vsel %vm1117_vm0, %v1113_v10, 0.0 }
  0xfe   : > { %v1262_v61 = vrot.slane %v1261_v36, 1  ;;  %v1268_v12 = vadd.f32 %v1267_v27, %v1266_v26  ;;  %v1275_v16 = vadd.f32 %v1274_v40, %v1273_v50  ;;  %v1281_v32 = vrot.slane %v1280_v14, 2 }
  0xff   : > { %1243 = vadd.xlane.f32.xlu1 %v1242_v56  ;;  %v1119_v33 = vrot.slane %v1118_v4, 4  ;;  %v1125_v25 = vsel %vm1117_vm0, %v1114_v15, 0.0  ;;  %v1132_v30 = vsel %vm1117_vm0, %v1115_v21, 0.0  ;;  %v1139_v42 = vsel %vm1117_vm0, %v1116_v17, 0.0 }
 0x100   : > { %v1263_v62 = vadd.f32 %v1262_v61, %v1261_v36  ;;  %v1269_v52 = vrot.slane %v1268_v12, 1  ;;  %v1276_v22 = vrot.slane %v1275_v16, 1  ;;  %v1282_v28 = vadd.f32 %v1281_v32, %v1280_v14 }
 0x101   : > { %v1120_v37 = vadd.f32 %v1119_v33, %v1118_v4  ;;  %v1126_v41 = vrot.slane %v1125_v25, 4  ;;  %v1133_v29 = vrot.slane %v1132_v30, 4  ;;  %v1140_v0 = vrot.slane %v1139_v42, 4 }
 0x102   : > { %v1270_v49 = vadd.f32 %v1269_v52, %v1268_v12  ;;  %v1277_v13 = vadd.f32 %v1276_v22, %v1275_v16  ;;  %v1283_v35 = vrot.slane %v1282_v28, 1  ;;  %v778_v45 = vmul.f32 %v1546_v63, %v1783_v48 }
 0x103   : > { %v1121_v46 = vrot.slane %v1120_v37, 2  ;;  %v1127_v55 = vadd.f32 %v1126_v41, %v1125_v25  ;;  %v1134_v58 = vadd.f32 %v1133_v29, %v1132_v30  ;;  %v1141_v57 = vadd.f32 %v1140_v0, %v1139_v42 }
 0x104   : > { %v1284_v2 = vadd.f32 %v1283_v35, %v1282_v28  ;;  %v1285_v5 = vadd.f32 %v1270_v49, %v1263_v62  ;;  %v780_v44 = vmul.f32 %v1548_v59, %v1788_v1  ;;  %1549 = vrcp.f32 %v772_v53 }
 0x105   : > { %v1122_v26 = vadd.f32 %v1121_v46, %v1120_v37  ;;  %v1128_v50 = vrot.slane %v1127_v55, 2  ;;  %v1135_v51 = vrot.slane %v1134_v58, 2  ;;  %v1142_v39 = vrot.slane %v1141_v57, 2 }
 0x106   : > { %v1286_v10 = vadd.f32 %v1285_v5, %v1277_v13  ;;  %1551 = vrcp.f32 %v776_v47  ;;  %v1155_v48 = vrot.slane %v778_v45, 4  ;;  %v1156_v63 = vrot.slane %v780_v44, 4 }
 0x107   : > { %v1123_v15 = vrot.slane %v1122_v26, 1  ;;  %v1129_v36 = vadd.f32 %v1128_v50, %v1127_v55  ;;  %v1136_v27 = vadd.f32 %v1135_v51, %v1134_v58  ;;  %v1143_v40 = vadd.f32 %v1142_v39, %v1141_v57 }
 0x108   : > { %v1287_v1 = vadd.f32 %v1286_v10, %v1284_v2  ;;  %v1163_v59 = vmul.f32 %v1155_v48, %v1964_v31  ;;  %v1164_v34 = vmul.f32 %v1156_v63, %v1968_v20  ;;  %v1290_v53 = vsel %vm1117_vm0, %v778_v45, 0.0 }
 0x109   : > { %v1124_v14 = vadd.f32 %v1123_v15, %v1122_v26  ;;  %v1130_v56 = vrot.slane %v1129_v36, 1  ;;  %v1137_v21 = vrot.slane %v1136_v27, 1  ;;  %v1144_v17 = vrot.slane %v1143_v40, 1 }
 0x10a   : > { %1288 = vadd.xlane.f32.xlu0 %v1287_v1  ;;  %v1171_v11 = vrot.slane %v1163_v59, 4  ;;  %v1172_v23 = vrot.slane %v1164_v34, 4  ;;  %v1291_v47 = vrot.slane %v1290_v53, 4  ;;  %v1297_v4 = vsel %vm1117_vm0, %v780_v44, 0.0 }
 0x10b   : > { %v1131_v61 = vadd.f32 %v1130_v56, %v1129_v36  ;;  %v1138_v12 = vadd.f32 %v1137_v21, %v1136_v27  ;;  %v1298_v16 = vrot.slane %v1297_v4, 4  ;;  %v1323_v33 = vsel %vm1117_vm0, %v1105_v38, 0.0 }
 0x10c   : > { %v1179_v32 = vsel %vm1117_vm0, %v1171_v11, 0.0  ;;  %v1186_v31 = vsel %vm1117_vm0, %v1172_v23, 0.0  ;;  %v1292_v20 = vadd.f32 %v1291_v47, %v1290_v53  ;;  %v1145_v22 = vadd.f32 %v1144_v17, %v1143_v40 }
 0x10d   : > { %v1146_v25 = vadd.f32 %v1131_v61, %v1124_v14  ;;  %v1180_v30 = vrot.slane %v1179_v32, 4  ;;  %v1187_v42 = vrot.slane %v1186_v31, 4  ;;  %v1299_v62 = vadd.f32 %v1298_v16, %v1297_v4 }
 0x10e   : > { %v1550_v52 = vpop.eup %1549  ;;  %v1293_v28 = vrot.slane %v1292_v20, 2  ;;  %v1324_v37 = vrot.slane %v1323_v33, 4  ;;  %v1330_v41 = vsel %vm1117_vm0, %v1106_v60, 0.0  ;;  %v1337_v56 = vsel %vm1117_vm0, %v1107_v54, 0.0 }
 0x10f   : > { %v1147_v29 = vadd.f32 %v1146_v25, %v1138_v12  ;;  %v782_v0 = vmul.f32 %v1550_v52, %v1791_v6  ;;  %v1181_v49 = vadd.f32 %v1180_v30, %v1179_v32  ;;  %v1188_v13 = vadd.f32 %v1187_v42, %v1186_v31 }
 0x110   : > { %v1552_v3 = vpop.eup %1551  ;;  %v1294_v35 = vadd.f32 %v1293_v28, %v1292_v20  ;;  %v1300_v38 = vrot.slane %v1299_v62, 2  ;;  %v1325_v45 = vadd.f32 %v1324_v37, %v1323_v33  ;;  %v1331_v46 = vrot.slane %v1330_v41, 4 }
 0x111   : > { %v1148_v55 = vadd.f32 %v1147_v29, %v1145_v22  ;;  %v784_v58 = vmul.f32 %v1552_v3, %v1793_v8  ;;  %v1157_v57 = vrot.slane %v782_v0, 4  ;;  %v1182_v2 = vrot.slane %v1181_v49, 2 }
 0x112   : > { %v1189_v5 = vrot.slane %v1188_v13, 2  ;;  %v1295_v44 = vrot.slane %v1294_v35, 1  ;;  %v1301_v7 = vadd.f32 %v1300_v38, %v1299_v62  ;;  %v1304_v60 = vsel %vm1117_vm0, %v782_v0, 0.0 }
 0x113   : > { %1149 = vadd.xlane.f32.xlu1 %v1148_v55  ;;  %v1158_v26 = vrot.slane %v784_v58, 4  ;;  %v1165_v6 = vmul.f32 %v1157_v57, %v1972_v19  ;;  %v1183_v50 = vadd.f32 %v1182_v2, %v1181_v49  ;;  %v1305_v51 = vrot.slane %v1304_v60, 4 }
 0x114   : > { %v1190_v39 = vadd.f32 %v1189_v5, %v1188_v13  ;;  %v1296_v10 = vadd.f32 %v1295_v44, %v1294_v35  ;;  %v1302_v48 = vrot.slane %v1301_v7, 1  ;;  %v1311_v63 = vsel %vm1117_vm0, %v784_v58, 0.0 }
 0x115   : > { %v1166_v8 = vmul.f32 %v1158_v26, %v1976_v18  ;;  %v1173_v15 = vrot.slane %v1165_v6, 4  ;;  %v1184_v36 = vrot.slane %v1183_v50, 1  ;;  %v1306_v27 = vadd.f32 %v1305_v51, %v1304_v60 }
 0x116   : > { %v1191_v40 = vrot.slane %v1190_v39, 1  ;;  %v1303_v1 = vadd.f32 %v1302_v48, %v1301_v7  ;;  %v1312_v59 = vrot.slane %v1311_v63, 4  ;;  %v1326_v34 = vrot.slane %v1325_v45, 2 }
 0x117   : > { %v1174_v53 = vrot.slane %v1166_v8, 4  ;;  %v1193_v14 = vsel %vm1117_vm0, %v1173_v15, 0.0  ;;  %v1307_v19 = vrot.slane %v1306_v27, 2  ;;  %v1185_v21 = vadd.f32 %v1184_v36, %v1183_v50 }
 0x118   : > { %v1192_v17 = vadd.f32 %v1191_v40, %v1190_v39  ;;  %v1194_v11 = vrot.slane %v1193_v14, 4  ;;  %v1313_v23 = vadd.f32 %v1312_v59, %v1311_v63  ;;  %v1327_v4 = vadd.f32 %v1326_v34, %v1325_v45 }
 0x119   : > { %v1200_v18 = vsel %vm1117_vm0, %v1174_v53, 0.0  ;;  %v1308_v47 = vadd.f32 %v1307_v19, %v1306_v27  ;;  %v1332_v61 = vadd.f32 %v1331_v46, %v1330_v41  ;;  %v1318_v31 = vadd.f32 %v1303_v1, %v1296_v10 }
 0x11a   : > { %v1195_v12 = vadd.f32 %v1194_v11, %v1193_v14  ;;  %v1201_v16 = vrot.slane %v1200_v18, 4  ;;  %v1314_v32 = vrot.slane %v1313_v23, 2  ;;  %v1328_v33 = vrot.slane %v1327_v4, 1 }
 0x11b   : > { %v1309_v20 = vrot.slane %v1308_v47, 1  ;;  %v1333_v25 = vrot.slane %v1332_v61, 2  ;;  %v1338_v30 = vrot.slane %v1337_v56, 4  ;;  %v1344_v62 = vsel %vm1117_vm0, %v1108_v9, 0.0 }
 0x11c   : > { %v1196_v24 = vrot.slane %v1195_v12, 2  ;;  %v1202_v42 = vadd.f32 %v1201_v16, %v1200_v18  ;;  %v1315_v54 = vadd.f32 %v1314_v32, %v1313_v23  ;;  %v1207_v52 = vadd.f32 %v1192_v17, %v1185_v21 }
 0x11d   : > { %v1310_v22 = vadd.f32 %v1309_v20, %v1308_v47  ;;  %v1334_v28 = vadd.f32 %v1333_v25, %v1332_v61  ;;  %v1339_v37 = vadd.f32 %v1338_v30, %v1337_v56  ;;  %v1345_v49 = vrot.slane %v1344_v62, 4 }
 0x11e   : > { %v1197_v41 = vadd.f32 %v1196_v24, %v1195_v12  ;;  %v1203_v29 = vrot.slane %v1202_v42, 2  ;;  %v1316_v0 = vrot.slane %v1315_v54, 1  ;;  %v1329_v3 = vadd.f32 %v1328_v33, %v1327_v4 }
 0x11f   : > { %v1319_v13 = vadd.f32 %v1318_v31, %v1310_v22  ;;  %v1335_v35 = vrot.slane %v1334_v28, 1  ;;  %v1340_v38 = vrot.slane %v1339_v37, 2  ;;  %v1346_v58 = vadd.f32 %v1345_v49, %v1344_v62 }
 0x120   : > { %v1198_v45 = vrot.slane %v1197_v41, 1  ;;  %v1204_v46 = vadd.f32 %v1203_v29, %v1202_v42  ;;  %v1317_v55 = vadd.f32 %v1316_v0, %v1315_v54 }
 0x121   : > { %v1336_v57 = vadd.f32 %v1335_v35, %v1334_v28  ;;  %v1341_v43 = vadd.f32 %v1340_v38, %v1339_v37  ;;  %v1347_v44 = vrot.slane %v1346_v58, 2 }
 0x122   : > { %v1199_v2 = vadd.f32 %v1198_v45, %v1197_v41  ;;  %v1205_v9 = vrot.slane %v1204_v46, 1  ;;  %v1320_v5 = vadd.f32 %v1319_v13, %v1317_v55 }
 0x123   : > { %v1342_v7 = vrot.slane %v1341_v43, 1  ;;  %v1351_v60 = vadd.f32 %v1336_v57, %v1329_v3  ;;  %v1348_v50 = vadd.f32 %v1347_v44, %v1346_v58 }
 0x124   : > { %v1206_v26 = vadd.f32 %v1205_v9, %v1204_v46  ;;  %v1208_v6 = vadd.f32 %v1207_v52, %v1199_v2  ;;  %1321 = vadd.xlane.f32.xlu1 %v1320_v5 }
 0x125   : > { %v1343_v51 = vadd.f32 %v1342_v7, %v1341_v43  ;;  %v1349_v10 = vrot.slane %v1348_v50, 1 }
 0x126   : > { %v1209_v39 = vadd.f32 %v1208_v6, %v1206_v26 }
 0x127   : > { %v1352_v48 = vadd.f32 %v1351_v60, %v1343_v51  ;;  %v1350_v63 = vadd.f32 %v1349_v10, %v1348_v50 }
 0x128   : > { %1210 = vadd.xlane.f32.xlu0 %v1209_v39 }
 0x129   : > { %v1353_v8 = vadd.f32 %v1352_v48, %v1350_v63 }
 0x12c   : > { %1354 = vadd.xlane.f32.xlu0 %v1353_v8 }
 0x18c   : > { %v1244_v15 = vpop.xlane.xlu1 %1243 }
 0x197   : > { %v1289_v36 = vpop.xlane.xlu0 %1288 }
 0x1a0   : > { %v1150_v27 = vpop.xlane.xlu1 %1149 }
 0x1b1   : > { %v1322_v59 = vpop.xlane.xlu1 %1321 }
 0x1b5   : > { %v1211_v40 = vpop.xlane.xlu0 %1210 }
 0x1b6   : > { %v1357_v1 = vsel %vm1356_vm1, %v1150_v27, %v1211_v40 }
 0x1b7   : > { %v1359_v34 = vsel %vm1358_vm2, %v1357_v1, %v1244_v15 }
 0x1b8   : > { %v1361_v53 = vsel %vm1360_vm3, %v1359_v34, %v1289_v36 }
 0x1b9   : > { %v1362_v14 = vsel %vm1117_vm0, %v1361_v53, %v1322_v59  ;;  %v1355_v19 = vpop.xlane.xlu0 %1354 }
 0x1ba   : > { %v1364_v56 = vsel %vm1363_vm4, %v1362_v14, %v1355_v19 }
 0x1bb   : > { %v1366_v21 = vsel %vm1365_vm5, %v1364_v56, 0.0 }
 0x1bc   : > { %v1368_v17 = vsel %vm1367_vm6, %v1366_v21, 0.0 }
 0x1bd   : > { %1370 = vst.msk [vmem:[%s260_s20] sm:$0xff] %vm1369_vm7, %v1368_v17 }
 0x1be PF: > { %s16_s18 = sadd.s32 1, %s1578_s18  }
 0x1bf   : > { %p13_p2 = scmp.ge.s32.totalorder %s16_s18, 4  }
 0x1c1   :  { %15 = sbr.rel (!%p13_p2) target bundleno = 1 (0x1), region = 78 }
 0x1c8   :  { %1390 = vsyncpa [#allocation3], 1 }
 0x1c9   :  { %1392 = vsyncpa [#allocation3 + $0x1], 1 }

// kernel: _lambda_.5
= control target key start
LH: loop header
LB: loop body
LE: loop exit
PB: predicated region body
PF: predicated region fallthrough
CT: control target
= control target key end

     0   :  { %10 = vsyncpa [#allocation3], 0  ;;  %s1615_s18 = smov 0   ;;  %s2048_s0 = inlined_call_operand.vmem [shape: f32[2], index: 0, kind: input, shape index: {}]   ;;  %s2049_s1 = inlined_call_operand.vmem [shape: f32[4,1024], index: 1, kind: input, shape index: {}]   ;;  %s2050_s2 = inlined_call_operand.vmem [shape: f32[4,1024], index: 2, kind: input, shape index: {}]   ;;  %s2051_s3 = inlined_call_operand.vmem [shape: f32[8,4], index: 3, kind: input, shape index: {}]   ;;  %s2052_s4 = inlined_call_operand.vmem [shape: f32[8,1], index: 4, kind: input, shape index: {}]   ;;  %s2053_s5 = inlined_call_operand.vmem [shape: f32[2,8,1], index: 5, kind: output, shape index: {}]  }
   0x1 LB: > { %s1621_s19 = sadd.s32 4294967295, %s1578_s18   ;;  %p1450_p0 = scmp.ge.s32.totalorder %s1578_s18, 1  ;;  %s1578_s18 = sphi %s1615_s18, %s16_s18  }
   0x2   : > { %p162_p1 = scmp.lt.s32.totalorder %s1578_s18, 3  ;;  %s175_s22 = sshll.u32 %s2048_s0, 4  ;;  %s176_s22 = int_to_ptr.vmem [resolvable:$true] %s175_s22 }
   0x3   : > { %p1470_p3 = scmp.eq.s32.totalorder %s1621_s19, 0  ;;  %s1553_s24 = scalar_lea.vmem %s176_s22, 16 }
   0x4   : > { %p1628_p2 = pnand %p1450_p0, %p162_p1  ;;  %p1554_p6 = scmp.ne.s32.totalorder %s176_s22, %s1553_s24 }
   0x5   : > { %p1561_p10 = scmp.lt.s32.totalorder %s176_s22, %s176_s22  ;;  %p1562_p11 = scmp.lt.s32.totalorder %s1553_s24, %s1553_s24 }
   0x6   : > { %p1466_p4 = pneg %p1628_p2 }
   0x7   : > { %p1563_p12 = por %p1562_p11, %p1561_p10 }
   0x8   : > { %p1467_p5 = pnand %p1470_p3, %p1466_p4 }
   0xa   : > { %p1555_p7 = pneg %p1467_p5 }
   0xc   : > { %p1556_p8 = pnand %p1555_p7, %p1554_p6 }
   0xe   : > { %p1557_p9 = pneg %p1556_p8 }
  0x10   : > { %p1564_p13 = pnand %p1563_p12, %p1557_p9 }
  0x12   : > { %1567 = shalt.err (!%p1564_p13)
}
  0x13   : > { %s1580_s25 = smov [#allocation2]   ;;  %212 = sbr.rel (%p1628_p2) target bundleno = 446 (0x1be), region = 40 }
  0x14   : > { %1469 = dma.vmem_to_smem (!%p1467_p5), %s176_s22, 16, %s1580_s25, [#allocation3]  }
  0x1a   : > { %1573 = dma.done.wait (%p1470_p3), [#allocation3], 16  }
  0x1b   : > { %1575 = vsyncadd (%p1470_p3), [#allocation3], 4294967280 }
  0x1c   : > { %218 = sfence }
  0x1d   : > { %v272_v0 = vld [vmem:[%s2051_s3] sm:$0xff]  ;;  %v1581_v1 = vmov 0   ;;  %v1582_v2 = vmov 1   ;;  %v1583_v4 = vmov 2   ;;  %v1584_v5 = vmov 3   ;;  %s1455_s30 = sshll.u32 %s1621_s19, 2 }
  0x1e   : > { %1485 = vset.pattern.permute.xlu0 %v1581_v1  ;;  %1486 = vset.pattern.permute.xlu1 %v1582_v2  ;;  %v273_v3 = vld [vmem:[%s2052_s4] sm:$0xff]  ;;  %p246_p0 = scmp.lt.s32.totalorder %s1455_s30, 7  ;;  %s263_s6 = sld [smem:[#allocation2 + %s1621_s19]]  ;;  %v287_v6 = vlaneseq  ;;  %vm1117_vm0 = vcmask 1043456   ;;  %vm1356_vm1 = vcmask 1040384   ;;  %vm1358_vm2 = vcmask 1041408  }
  0x1f   : > { %282 = vperm.xlu0 %1485, %v272_v0   ;;  %332 = vperm.xlu1 %1486, %v272_v0   ;;  %p257_p1 = scmp.lt.s32.totalorder %s1621_s19, 1  ;;  %vm1360_vm3 = vcmask 1042432   ;;  %vm1363_vm4 = vcmask 1044480   ;;  %vm1365_vm5 = vcmask 1045504   ;;  %vm1367_vm6 = vcmask 1046528  }
  0x20   : > { %s2056_s30 = smov (!%p246_p0, %s1455_s30), 7  ;;  %v288_v7 = vshrl.u32 %v287_v6, 7  ;;  %vm1369_vm7 = vcmask 7168  }
  0x21   : > { %s1456_s7 = sshll.u32 %s2056_s30, 2  ;;  %s2058_s19 = smov (!%p257_p1, %s1621_s19), 1 }
  0x22   : > { %s255_s11 = scalar_lea.vmem %s2050_s2, %s1456_s7  ;;  %s249_s14 = scalar_lea.vmem %s2049_s1, %s1456_s7  ;;  %v1657_v11 = vsub.s32 0, %v288_v7  ;;  %v1659_v12 = vsub.s32 4, %v288_v7  ;;  %v337_v17 = vsub.s32 1, %v288_v7  ;;  %v341_v18 = vsub.s32 5, %v288_v7 }
  0x23   : > { %276 = vperm.xlu0 %1485, %v273_v3   ;;  %1487 = vset.pattern.permute.xlu1 %v1583_v4  ;;  %v265_v8 = vld [vmem:[%s255_s11] sm:$0xff]  ;;  %v266_v10 = vld [vmem:[%s255_s11 + $0x8] sm:$0xff]  ;;  %v385_v24 = vsub.s32 2, %v288_v7  ;;  %v389_v26 = vsub.s32 6, %v288_v7  ;;  %v1679_v27 = vsub.s32 3, %v288_v7  ;;  %v1681_v28 = vsub.s32 7, %v288_v7 }
  0x24   : > { %380 = vperm.xlu1 %1487, %v272_v0   ;;  %s264_s8 = smul.f32 6.0, %s263_s6  ;;  %v1661_v14 = vld [vmem:[%s249_s14] sm:$0xff]  ;;  %v1663_v16 = vld [vmem:[%s249_s14 + $0x8] sm:$0xff]  ;;  %s1459_s15 = sshll.u32 %s2058_s19, 3 }
  0x25   : > { %v290_v20 = vrot.slane %v1661_v14, %v1657_v11  ;;  %v294_v21 = vrot.slane %v1661_v14, %v1659_v12  ;;  %v298_v22 = vrot.slane %v1663_v16, %v1657_v11  ;;  %v302_v25 = vrot.slane %v1663_v16, %v1659_v12  ;;  %s260_s20 = scalar_lea.vmem %s2053_s5, %s1459_s15 }
  0x26   : > { %v267_v9 = vstv %s264_s8  ;;  %v338_v29 = vrot.slane %v1661_v14, %v337_v17  ;;  %v342_v30 = vrot.slane %v1661_v14, %v341_v18  ;;  %v346_v31 = vrot.slane %v1663_v16, %v337_v17 }
  0x27   : > { %1488 = vset.pattern.permute.xlu0 %v1584_v5  ;;  %v268_v13 = vmul.f32 %v267_v9, %v265_v8  ;;  %v269_v15 = vmul.f32 %v267_v9, %v266_v10  ;;  %v350_v32 = vrot.slane %v1663_v16, %v341_v18  ;;  %v310_v33 = vrot.slane %v290_v20, %v1657_v11 }
  0x28   : > { %428 = vperm.xlu0 %1488, %v272_v0   ;;  %v314_v34 = vrot.slane %v294_v21, %v1657_v11  ;;  %v318_v35 = vrot.slane %v298_v22, %v1657_v11  ;;  %v322_v41 = vrot.slane %v302_v25, %v1657_v11  ;;  %v358_v45 = vrot.slane %v338_v29, %v337_v17 }
  0x29   : > { %v1666_v19 = vadd.f32 %v268_v13, %v1661_v14  ;;  %v1675_v23 = vadd.f32 %v269_v15, %v1663_v16  ;;  %v362_v46 = vrot.slane %v342_v30, %v337_v17  ;;  %v366_v47 = vrot.slane %v346_v31, %v337_v17 }
  0x2a   : > { %v370_v48 = vrot.slane %v350_v32, %v337_v17  ;;  %v386_v50 = vrot.slane %v1661_v14, %v385_v24  ;;  %v390_v51 = vrot.slane %v1661_v14, %v389_v26  ;;  %v394_v52 = vrot.slane %v1663_v16, %v385_v24 }
  0x2b   : > { %v480_v36 = vrot.slane %v1666_v19, %v1657_v11  ;;  %v484_v37 = vrot.slane %v1666_v19, %v1659_v12  ;;  %v488_v38 = vrot.slane %v1675_v23, %v1657_v11  ;;  %v492_v39 = vrot.slane %v1675_v23, %v1659_v12 }
  0x2c   : > { %v524_v40 = vrot.slane %v1666_v19, %v337_v17  ;;  %v528_v42 = vrot.slane %v1666_v19, %v341_v18  ;;  %v532_v43 = vrot.slane %v1675_v23, %v337_v17  ;;  %v536_v44 = vrot.slane %v1675_v23, %v341_v18 }
  0x2d   : > { %v500_v49 = vrot.slane %v480_v36, %v1657_v11  ;;  %v504_v53 = vrot.slane %v484_v37, %v1657_v11  ;;  %v508_v54 = vrot.slane %v488_v38, %v1657_v11  ;;  %v512_v55 = vrot.slane %v492_v39, %v1657_v11 }
  0x2e   : > { %v544_v56 = vrot.slane %v524_v40, %v337_v17  ;;  %v548_v57 = vrot.slane %v528_v42, %v337_v17  ;;  %v552_v58 = vrot.slane %v532_v43, %v337_v17  ;;  %v556_v59 = vrot.slane %v536_v44, %v337_v17 }
  0x2f   : > { %v398_v60 = vrot.slane %v1663_v16, %v389_v26  ;;  %v568_v61 = vrot.slane %v1666_v19, %v385_v24  ;;  %v572_v62 = vrot.slane %v1666_v19, %v389_v26  ;;  %v576_v63 = vrot.slane %v1675_v23, %v385_v24 }
  0x30   : > { %v580_v0 = vrot.slane %v1675_v23, %v389_v26  ;;  %v434_v1 = vrot.slane %v1661_v14, %v1679_v27  ;;  %v438_v2 = vrot.slane %v1661_v14, %v1681_v28  ;;  %v442_v3 = vrot.slane %v1663_v16, %v1679_v27 }
  0x31   : > { %v446_v4 = vrot.slane %v1663_v16, %v1681_v28  ;;  %v612_v5 = vrot.slane %v1666_v19, %v1679_v27  ;;  %v616_v6 = vrot.slane %v1666_v19, %v1681_v28  ;;  %v620_v7 = vrot.slane %v1675_v23, %v1679_v27 }
  0x32   : > { %v624_v8 = vrot.slane %v1675_v23, %v1681_v28  ;;  %v406_v9 = vrot.slane %v386_v50, %v385_v24  ;;  %v410_v10 = vrot.slane %v390_v51, %v385_v24  ;;  %v414_v13 = vrot.slane %v394_v52, %v385_v24 }
  0x33   : > { %v418_v14 = vrot.slane %v398_v60, %v385_v24  ;;  %v588_v15 = vrot.slane %v568_v61, %v385_v24  ;;  %v592_v17 = vrot.slane %v572_v62, %v385_v24  ;;  %v596_v18 = vrot.slane %v576_v63, %v385_v24 }
  0x34   : > { %v600_v16 = vrot.slane %v580_v0, %v385_v24  ;;  %v454_v20 = vrot.slane %v434_v1, %v1679_v27  ;;  %v458_v21 = vrot.slane %v438_v2, %v1679_v27  ;;  %v462_v19 = vrot.slane %v442_v3, %v1679_v27 }
  0x35   : > { %v466_v22 = vrot.slane %v446_v4, %v1679_v27  ;;  %v632_v23 = vrot.slane %v612_v5, %v1679_v27  ;;  %v636_v28 = vrot.slane %v616_v6, %v1679_v27  ;;  %v640_v29 = vrot.slane %v620_v7, %v1679_v27 }
  0x36   : > { %v644_v30 = vrot.slane %v624_v8, %v1679_v27 }
  0x9e   : > { %v283_v25 = vpop.permute.xlu0 %282  ;;  %v333_v26 = vpop.permute.xlu1 %332 }
  0x9f   : > { %v323_v31 = vmul.f32 %v310_v33, %v283_v25  ;;  %v324_v24 = vmul.f32 %v314_v34, %v283_v25  ;;  %v325_v32 = vmul.f32 %v318_v35, %v283_v25  ;;  %v326_v36 = vmul.f32 %v322_v41, %v283_v25 }
  0xa0   : > { %v513_v37 = vmul.f32 %v500_v49, %v283_v25  ;;  %v514_v38 = vmul.f32 %v504_v53, %v283_v25  ;;  %v515_v39 = vmul.f32 %v508_v54, %v283_v25  ;;  %v516_v40 = vmul.f32 %v512_v55, %v283_v25 }
  0xa1   : > { %v371_v42 = vmul.f32 %v358_v45, %v333_v26  ;;  %v372_v43 = vmul.f32 %v362_v46, %v333_v26  ;;  %v373_v44 = vmul.f32 %v366_v47, %v333_v26  ;;  %v374_v50 = vmul.f32 %v370_v48, %v333_v26 }
  0xa2   : > { %v557_v51 = vmul.f32 %v544_v56, %v333_v26  ;;  %v558_v52 = vmul.f32 %v548_v57, %v333_v26  ;;  %v559_v60 = vmul.f32 %v552_v58, %v333_v26  ;;  %v560_v61 = vmul.f32 %v556_v59, %v333_v26  ;;  %v277_v62 = vpop.permute.xlu0 %276 }
  0xa3   : > { %v327_v63 = vadd.f32 %v323_v31, %v277_v62  ;;  %v328_v0 = vadd.f32 %v324_v24, %v277_v62  ;;  %v329_v27 = vadd.f32 %v325_v32, %v277_v62  ;;  %v330_v33 = vadd.f32 %v326_v36, %v277_v62  ;;  %v381_v53 = vpop.permute.xlu1 %380 }
  0xa4   : > { %v517_v34 = vadd.f32 %v513_v37, %v277_v62  ;;  %v518_v35 = vadd.f32 %v514_v38, %v277_v62  ;;  %v519_v41 = vadd.f32 %v515_v39, %v277_v62  ;;  %v520_v49 = vadd.f32 %v516_v40, %v277_v62 }
  0xa5   : > { %v375_v54 = vadd.f32 %v371_v42, %v327_v63  ;;  %v376_v55 = vadd.f32 %v372_v43, %v328_v0  ;;  %v377_v45 = vadd.f32 %v373_v44, %v329_v27  ;;  %v378_v46 = vadd.f32 %v374_v50, %v330_v33 }
  0xa6   : > { %v561_v47 = vadd.f32 %v557_v51, %v517_v34  ;;  %v562_v48 = vadd.f32 %v558_v52, %v518_v35  ;;  %v563_v56 = vadd.f32 %v559_v60, %v519_v41  ;;  %v564_v57 = vadd.f32 %v560_v61, %v520_v49 }
  0xa7   : > { %v419_v58 = vmul.f32 %v406_v9, %v381_v53  ;;  %v420_v59 = vmul.f32 %v410_v10, %v381_v53  ;;  %v421_v1 = vmul.f32 %v414_v13, %v381_v53  ;;  %v422_v2 = vmul.f32 %v418_v14, %v381_v53  ;;  %v429_v7 = vpop.permute.xlu0 %428 }
  0xa8   : > { %v601_v3 = vmul.f32 %v588_v15, %v381_v53  ;;  %v602_v4 = vmul.f32 %v592_v17, %v381_v53  ;;  %v603_v5 = vmul.f32 %v596_v18, %v381_v53  ;;  %v604_v6 = vmul.f32 %v600_v16, %v381_v53 }
  0xa9   : > { %v423_v8 = vadd.f32 %v419_v58, %v375_v54  ;;  %v424_v25 = vadd.f32 %v420_v59, %v376_v55  ;;  %v425_v26 = vadd.f32 %v421_v1, %v377_v45  ;;  %v426_v31 = vadd.f32 %v422_v2, %v378_v46 }
  0xaa   : > { %v605_v24 = vadd.f32 %v601_v3, %v561_v47  ;;  %v606_v32 = vadd.f32 %v602_v4, %v562_v48  ;;  %v607_v36 = vadd.f32 %v603_v5, %v563_v56  ;;  %v608_v37 = vadd.f32 %v604_v6, %v564_v57 }
  0xab   : > { %v467_v38 = vmul.f32 %v454_v20, %v429_v7  ;;  %v468_v39 = vmul.f32 %v458_v21, %v429_v7  ;;  %v469_v40 = vmul.f32 %v462_v19, %v429_v7  ;;  %v470_v9 = vmul.f32 %v466_v22, %v429_v7 }
  0xac   : > { %v645_v10 = vmul.f32 %v632_v23, %v429_v7  ;;  %v646_v13 = vmul.f32 %v636_v28, %v429_v7  ;;  %v647_v14 = vmul.f32 %v640_v29, %v429_v7  ;;  %v648_v15 = vmul.f32 %v644_v30, %v429_v7 }
  0xad   : > { %v471_v17 = vadd.f32 %v467_v38, %v423_v8  ;;  %v472_v18 = vadd.f32 %v468_v39, %v424_v25  ;;  %v473_v16 = vadd.f32 %v469_v40, %v425_v26  ;;  %v474_v42 = vadd.f32 %v470_v9, %v426_v31 }
  0xae   : > { %v1739_v43 = vadd.f32 %v645_v10, %v605_v24  ;;  %v1741_v44 = vadd.f32 %v646_v13, %v606_v32  ;;  %v1743_v50 = vadd.f32 %v647_v14, %v607_v36  ;;  %v1745_v51 = vadd.f32 %v648_v15, %v608_v37 }
  0xaf   : > { %v657_v20 = vrot.slane %v471_v17, 1  ;;  %v658_v21 = vrot.slane %v472_v18, 1  ;;  %v659_v19 = vrot.slane %v473_v16, 1  ;;  %v660_v22 = vrot.slane %v474_v42, 1 }
  0xb0   : > { %v669_v23 = vrot.slane %v471_v17, 2  ;;  %v670_v28 = vrot.slane %v472_v18, 2  ;;  %v671_v29 = vrot.slane %v473_v16, 2  ;;  %v672_v30 = vrot.slane %v474_v42, 2 }
  0xb1   : > { %v665_v52 = vmax.f32 %v471_v17, %v657_v20  ;;  %v666_v60 = vmax.f32 %v472_v18, %v658_v21  ;;  %v667_v61 = vmax.f32 %v473_v16, %v659_v19  ;;  %v668_v62 = vmax.f32 %v474_v42, %v660_v22 }
  0xb2   : > { %v681_v63 = vrot.slane %v471_v17, 3  ;;  %v682_v0 = vrot.slane %v472_v18, 3  ;;  %v683_v27 = vrot.slane %v473_v16, 3  ;;  %v684_v33 = vrot.slane %v474_v42, 3 }
  0xb3   : > { %v677_v34 = vmax.f32 %v665_v52, %v669_v23  ;;  %v678_v35 = vmax.f32 %v666_v60, %v670_v28  ;;  %v679_v41 = vmax.f32 %v667_v61, %v671_v29  ;;  %v680_v49 = vmax.f32 %v668_v62, %v672_v30 }
  0xb4   : > { %v881_v53 = vrot.slane %v1739_v43, 1  ;;  %v882_v54 = vrot.slane %v1741_v44, 1  ;;  %v883_v48 = vrot.slane %v1743_v50, 1  ;;  %v884_v56 = vrot.slane %v1745_v51, 1 }
  0xb5   : > { %v689_v55 = vmax.f32 %v677_v34, %v681_v63  ;;  %v690_v45 = vmax.f32 %v678_v35, %v682_v0  ;;  %v691_v46 = vmax.f32 %v679_v41, %v683_v27  ;;  %v692_v47 = vmax.f32 %v680_v49, %v684_v33 }
  0xb6   : > { %v889_v57 = vmax.f32 %v1739_v43, %v881_v53  ;;  %v890_v58 = vmax.f32 %v1741_v44, %v882_v54  ;;  %v891_v9 = vmax.f32 %v1743_v50, %v883_v48  ;;  %v892_v15 = vmax.f32 %v1745_v51, %v884_v56 }
  0xb7   : > { %v696_v59 = vrot.slane %v689_v55, %v1657_v11  ;;  %v700_v1 = vrot.slane %v690_v45, %v1657_v11  ;;  %v704_v2 = vrot.slane %v691_v46, %v1657_v11  ;;  %v708_v3 = vrot.slane %v692_v47, %v1657_v11 }
  0xb8   : > { %v788_v4 = vrot.slane %v689_v55, %v1659_v12  ;;  %v792_v5 = vrot.slane %v690_v45, %v1659_v12  ;;  %v796_v6 = vrot.slane %v691_v46, %v1659_v12  ;;  %v800_v7 = vrot.slane %v692_v47, %v1659_v12 }
  0xb9   : > { %v709_v8 = vsub.f32 %v471_v17, %v696_v59  ;;  %v710_v25 = vsub.f32 %v472_v18, %v700_v1  ;;  %v711_v26 = vsub.f32 %v473_v16, %v704_v2  ;;  %v712_v31 = vsub.f32 %v474_v42, %v708_v3 }
  0xba   : > { %v801_v24 = vsub.f32 %v471_v17, %v788_v4  ;;  %v802_v32 = vsub.f32 %v472_v18, %v792_v5  ;;  %v803_v36 = vsub.f32 %v473_v16, %v796_v6  ;;  %v804_v37 = vsub.f32 %v474_v42, %v800_v7 }
  0xbb   : > { %v713_v38 = vmul.f32 1.442695, %v709_v8  ;;  %v715_v39 = vmul.f32 1.442695, %v710_v25  ;;  %v717_v40 = vmul.f32 1.442695, %v711_v26 }
  0xbc   : > { %v719_v10 = vmul.f32 1.442695, %v712_v31  ;;  %v805_v13 = vmul.f32 1.442695, %v801_v24  ;;  %v807_v14 = vmul.f32 1.442695, %v802_v32 }
  0xbd   : > { %1489 = vpow2.f32 %v713_v38  ;;  %v809_v20 = vmul.f32 1.442695, %v803_v36  ;;  %v811_v21 = vmul.f32 1.442695, %v804_v37  ;;  %v893_v19 = vrot.slane %v1739_v43, 2 }
  0xbe   : > { %1491 = vpow2.f32 %v715_v39  ;;  %v894_v17 = vrot.slane %v1741_v44, 2  ;;  %v895_v18 = vrot.slane %v1743_v50, 2  ;;  %v896_v16 = vrot.slane %v1745_v51, 2 }
  0xbf   : > { %1493 = vpow2.f32 %v717_v40  ;;  %v901_v42 = vmax.f32 %v889_v57, %v893_v19  ;;  %v905_v22 = vrot.slane %v1739_v43, 3  ;;  %v906_v23 = vrot.slane %v1741_v44, 3 }
  0xc0   : > { %1495 = vpow2.f32 %v719_v10  ;;  %v902_v28 = vmax.f32 %v890_v58, %v894_v17  ;;  %v903_v29 = vmax.f32 %v891_v9, %v895_v18  ;;  %v904_v30 = vmax.f32 %v892_v15, %v896_v16 }
  0xc1   : > { %1497 = vpow2.f32 %v805_v13  ;;  %v907_v52 = vrot.slane %v1743_v50, 3  ;;  %v908_v60 = vrot.slane %v1745_v51, 3  ;;  %v913_v61 = vmax.f32 %v901_v42, %v905_v22 }
  0xc2   : > { %1499 = vpow2.f32 %v807_v14  ;;  %v914_v62 = vmax.f32 %v902_v28, %v906_v23 }
  0xc3   : > { %1501 = vpow2.f32 %v809_v20  ;;  %v915_v63 = vmax.f32 %v903_v29, %v907_v52  ;;  %v916_v0 = vmax.f32 %v904_v30, %v908_v60  ;;  %v920_v27 = vrot.slane %v913_v61, %v1657_v11 }
  0xc4   : > { %1503 = vpow2.f32 %v811_v21  ;;  %v924_v33 = vrot.slane %v914_v62, %v1657_v11  ;;  %v1012_v34 = vrot.slane %v913_v61, %v1659_v12  ;;  %v1016_v35 = vrot.slane %v914_v62, %v1659_v12 }
  0xc5   : > { %v928_v41 = vrot.slane %v915_v63, %v1657_v11  ;;  %v932_v49 = vrot.slane %v916_v0, %v1657_v11  ;;  %v933_v53 = vsub.f32 %v1739_v43, %v920_v27  ;;  %v1020_v54 = vrot.slane %v915_v63, %v1659_v12 }
  0xc6   : > { %v934_v55 = vsub.f32 %v1741_v44, %v924_v33  ;;  %v1024_v45 = vrot.slane %v916_v0, %v1659_v12  ;;  %v1025_v46 = vsub.f32 %v1739_v43, %v1012_v34  ;;  %v1026_v47 = vsub.f32 %v1741_v44, %v1016_v35 }
  0xc7   : > { %v1783_v48 = vpop.eup %1489  ;;  %v935_v56 = vsub.f32 %v1743_v50, %v928_v41  ;;  %v936_v57 = vsub.f32 %v1745_v51, %v932_v49  ;;  %v937_v58 = vmul.f32 1.442695, %v933_v53  ;;  %v1027_v59 = vsub.f32 %v1743_v50, %v1020_v54 }
  0xc8   : > { %v1788_v1 = vpop.eup %1491  ;;  %v939_v2 = vmul.f32 1.442695, %v934_v55  ;;  %v1028_v3 = vsub.f32 %v1745_v51, %v1024_v45  ;;  %v1029_v4 = vmul.f32 1.442695, %v1025_v46  ;;  %v1031_v5 = vmul.f32 1.442695, %v1026_v47 }
  0xc9   : > { %v1791_v6 = vpop.eup %1493  ;;  %1505 = vpow2.f32 %v937_v58  ;;  %v941_v43 = vmul.f32 1.442695, %v935_v56  ;;  %v943_v44 = vmul.f32 1.442695, %v936_v57  ;;  %v1033_v7 = vmul.f32 1.442695, %v1027_v59 }
  0xca   : > { %v1793_v8 = vpop.eup %1495  ;;  %1507 = vpow2.f32 %v939_v2  ;;  %v1035_v25 = vmul.f32 1.442695, %v1028_v3  ;;  %v725_v26 = vrot.slane %v1783_v48, 1  ;;  %v726_v50 = vrot.slane %v1788_v1, 1 }
  0xcb   : > { %v1797_v31 = vpop.eup %1497  ;;  %1509 = vpow2.f32 %v941_v43  ;;  %v727_v51 = vrot.slane %v1791_v6, 1  ;;  %v728_v24 = vrot.slane %v1793_v8, 1  ;;  %v737_v32 = vrot.slane %v1783_v48, 2 }
  0xcc   : > { %v1802_v36 = vpop.eup %1499  ;;  %1511 = vpow2.f32 %v943_v44  ;;  %v817_v37 = vrot.slane %v1797_v31, 1  ;;  %v829_v38 = vrot.slane %v1797_v31, 2  ;;  %v841_v39 = vrot.slane %v1797_v31, 3 }
  0xcd   : > { %v1807_v40 = vpop.eup %1501  ;;  %1513 = vpow2.f32 %v1029_v4  ;;  %v818_v9 = vrot.slane %v1802_v36, 1  ;;  %v830_v10 = vrot.slane %v1802_v36, 2  ;;  %v842_v13 = vrot.slane %v1802_v36, 3 }
  0xce   : > { %v1812_v14 = vpop.eup %1503  ;;  %1515 = vpow2.f32 %v1031_v5  ;;  %v819_v15 = vrot.slane %v1807_v40, 1  ;;  %v825_v20 = vadd.f32 %v1797_v31, %v817_v37  ;;  %v831_v21 = vrot.slane %v1807_v40, 2 }
  0xcf   : > { %1517 = vpow2.f32 %v1033_v7  ;;  %v820_v19 = vrot.slane %v1812_v14, 1  ;;  %v826_v17 = vadd.f32 %v1802_v36, %v818_v9  ;;  %v832_v18 = vrot.slane %v1812_v14, 2 }
  0xd0   : > { %1519 = vpow2.f32 %v1035_v25  ;;  %v827_v16 = vadd.f32 %v1807_v40, %v819_v15  ;;  %v837_v42 = vadd.f32 %v829_v38, %v825_v20  ;;  %v843_v22 = vrot.slane %v1807_v40, 3 }
  0xd1   : > { %v828_v23 = vadd.f32 %v1812_v14, %v820_v19  ;;  %v838_v28 = vadd.f32 %v830_v10, %v826_v17  ;;  %v844_v29 = vrot.slane %v1812_v14, 3  ;;  %v1825_v30 = vadd.f32 %v1783_v48, %v725_v26 }
  0xd2   : > { %v839_v52 = vadd.f32 %v831_v21, %v827_v16  ;;  %v1827_v60 = vadd.f32 %v841_v39, %v837_v42  ;;  %v1830_v61 = vadd.f32 %v1788_v1, %v726_v50  ;;  %v1833_v62 = vadd.f32 %v1791_v6, %v727_v51 }
  0xd3   : > { %v1835_v63 = vpop.eup %1505  ;;  %v840_v0 = vadd.f32 %v832_v18, %v828_v23  ;;  %v1837_v27 = vadd.f32 %v842_v13, %v838_v28  ;;  %v1840_v33 = vadd.f32 %v1793_v8, %v728_v24  ;;  %v738_v34 = vrot.slane %v1788_v1, 2 }
  0xd4   : > { %v1843_v35 = vpop.eup %1507  ;;  %v949_v41 = vrot.slane %v1835_v63, 1  ;;  %v961_v49 = vrot.slane %v1835_v63, 2  ;;  %v973_v53 = vrot.slane %v1835_v63, 3  ;;  %v1848_v54 = vadd.f32 %v843_v22, %v839_v52 }
  0xd5   : > { %v1850_v55 = vpop.eup %1509  ;;  %v950_v45 = vrot.slane %v1843_v35, 1  ;;  %v962_v46 = vrot.slane %v1843_v35, 2  ;;  %v974_v47 = vrot.slane %v1843_v35, 3  ;;  %v1855_v56 = vadd.f32 %v844_v29, %v840_v0 }
  0xd6   : > { %v1857_v57 = vpop.eup %1511  ;;  %v951_v58 = vrot.slane %v1850_v55, 1  ;;  %v957_v59 = vadd.f32 %v1835_v63, %v949_v41  ;;  %v963_v2 = vrot.slane %v1850_v55, 2  ;;  %v975_v3 = vrot.slane %v1850_v55, 3 }
  0xd7   : > { %v1863_v4 = vpop.eup %1513  ;;  %v952_v5 = vrot.slane %v1857_v57, 1  ;;  %v958_v43 = vadd.f32 %v1843_v35, %v950_v45  ;;  %v964_v44 = vrot.slane %v1857_v57, 2  ;;  %v976_v7 = vrot.slane %v1857_v57, 3 }
  0xd8   : > { %v1869_v25 = vpop.eup %1515  ;;  %v959_v26 = vadd.f32 %v1850_v55, %v951_v58  ;;  %v969_v50 = vadd.f32 %v961_v49, %v957_v59  ;;  %v1041_v51 = vrot.slane %v1863_v4, 1  ;;  %v1053_v24 = vrot.slane %v1863_v4, 2 }
  0xd9   : > { %v1874_v37 = vpop.eup %1517  ;;  %v960_v38 = vadd.f32 %v1857_v57, %v952_v5  ;;  %v970_v39 = vadd.f32 %v962_v46, %v958_v43  ;;  %v1042_v9 = vrot.slane %v1869_v25, 1  ;;  %v1054_v10 = vrot.slane %v1869_v25, 2 }
  0xda   : > { %v1879_v13 = vpop.eup %1519  ;;  %v971_v15 = vadd.f32 %v963_v2, %v959_v26  ;;  %v981_v20 = vadd.f32 %v973_v53, %v969_v50  ;;  %v1043_v21 = vrot.slane %v1874_v37, 1  ;;  %v1049_v19 = vadd.f32 %v1863_v4, %v1041_v51 }
  0xdb   : > { %v972_v17 = vadd.f32 %v964_v44, %v960_v38  ;;  %v982_v18 = vadd.f32 %v974_v47, %v970_v39  ;;  %v1044_v16 = vrot.slane %v1879_v13, 1  ;;  %v1050_v42 = vadd.f32 %v1869_v25, %v1042_v9 }
  0xdc   : > { %v983_v22 = vadd.f32 %v975_v3, %v971_v15  ;;  %v988_v23 = vrot.slane %v981_v20, %v1657_v11  ;;  %v1051_v28 = vadd.f32 %v1874_v37, %v1043_v21  ;;  %v1055_v29 = vrot.slane %v1874_v37, 2 }
  0xdd   : > { %v984_v52 = vadd.f32 %v976_v7, %v972_v17  ;;  %v992_v0 = vrot.slane %v982_v18, %v1657_v11  ;;  %v1052_v41 = vadd.f32 %v1879_v13, %v1044_v16  ;;  %v1056_v49 = vrot.slane %v1879_v13, 2 }
  0xde   : > { %v996_v53 = vrot.slane %v983_v22, %v1657_v11  ;;  %1521 = vrcp.f32 %v988_v23  ;;  %v1061_v45 = vadd.f32 %v1053_v24, %v1049_v19  ;;  %v1062_v46 = vadd.f32 %v1054_v10, %v1050_v42 }
  0xdf   : > { %v1000_v47 = vrot.slane %v984_v52, %v1657_v11  ;;  %1523 = vrcp.f32 %v992_v0  ;;  %v1063_v58 = vadd.f32 %v1055_v29, %v1051_v28  ;;  %v1064_v59 = vadd.f32 %v1056_v49, %v1052_v41 }
  0xe0   : > { %1525 = vrcp.f32 %v996_v53  ;;  %v1065_v2 = vrot.slane %v1863_v4, 3  ;;  %v1066_v3 = vrot.slane %v1869_v25, 3  ;;  %v1067_v5 = vrot.slane %v1874_v37, 3 }
  0xe1   : > { %1527 = vrcp.f32 %v1000_v47  ;;  %v1068_v43 = vrot.slane %v1879_v13, 3  ;;  %v856_v44 = vrot.slane %v1827_v60, %v1659_v12  ;;  %v860_v7 = vrot.slane %v1837_v27, %v1659_v12 }
  0xe2   : > { %v1073_v26 = vadd.f32 %v1065_v2, %v1061_v45  ;;  %v1074_v50 = vadd.f32 %v1066_v3, %v1062_v46  ;;  %v1075_v51 = vadd.f32 %v1067_v5, %v1063_v58  ;;  %v864_v24 = vrot.slane %v1848_v54, %v1659_v12 }
  0xe3   : > { %v1076_v38 = vadd.f32 %v1068_v43, %v1064_v59  ;;  %v868_v39 = vrot.slane %v1855_v56, %v1659_v12  ;;  %1529 = vrcp.f32 %v856_v44  ;;  %v739_v9 = vrot.slane %v1791_v6, 2 }
  0xe4   : > { %v1080_v10 = vrot.slane %v1073_v26, %v1659_v12  ;;  %v1084_v60 = vrot.slane %v1074_v50, %v1659_v12  ;;  %v1088_v15 = vrot.slane %v1075_v51, %v1659_v12  ;;  %1531 = vrcp.f32 %v860_v7 }
  0xe5   : > { %v1092_v27 = vrot.slane %v1076_v38, %v1659_v12  ;;  %1533 = vrcp.f32 %v864_v24  ;;  %v740_v20 = vrot.slane %v1793_v8, 2  ;;  %v745_v54 = vadd.f32 %v737_v32, %v1825_v30 }
  0xe6   : > { %1535 = vrcp.f32 %v1080_v10  ;;  %v746_v56 = vadd.f32 %v738_v34, %v1830_v61  ;;  %v747_v21 = vadd.f32 %v739_v9, %v1833_v62  ;;  %v749_v19 = vrot.slane %v1783_v48, 3 }
  0xe7   : > { %1537 = vrcp.f32 %v1084_v60  ;;  %v748_v17 = vadd.f32 %v740_v20, %v1840_v33  ;;  %v750_v12 = vrot.slane %v1788_v1, 3  ;;  %v751_v18 = vrot.slane %v1791_v6, 3 }
  0xe8   : > { %v1522_v16 = vpop.eup %1521  ;;  %1539 = vrcp.f32 %v1088_v15  ;;  %v752_v32 = vrot.slane %v1793_v8, 3  ;;  %v757_v30 = vadd.f32 %v749_v19, %v745_v54 }
  0xe9   : > { %v1524_v42 = vpop.eup %1523  ;;  %v1924_v61 = vmul.f32 %v1522_v16, %v1835_v63  ;;  %1541 = vrcp.f32 %v1092_v27  ;;  %v758_v62 = vadd.f32 %v750_v12, %v746_v56  ;;  %v1926_v34 = vadd.f32 %v751_v18, %v747_v21 }
  0xea   : > { %v1526_v22 = vpop.eup %1525  ;;  %v1929_v33 = vmul.f32 %v1524_v42, %v1843_v35  ;;  %v1931_v23 = vadd.f32 %v752_v32, %v748_v17  ;;  %v764_v28 = vrot.slane %v757_v30, %v1657_v11  ;;  %1543 = vrcp.f32 %v868_v39 }
  0xeb   : > { %v1528_v29 = vpop.eup %1527  ;;  %v1935_v52 = vmul.f32 %v1526_v22, %v1850_v55  ;;  %v1212_v63 = vsel %vm1117_vm0, %v1924_v61, 0.0  ;;  %v768_v0 = vrot.slane %v758_v62, %v1657_v11  ;;  %v772_v53 = vrot.slane %v1926_v34, %v1657_v11 }
  0xec   : > { %v1941_v41 = vmul.f32 %v1528_v29, %v1857_v57  ;;  %v1213_v49 = vrot.slane %v1212_v63, 4  ;;  %v1219_v35 = vsel %vm1117_vm0, %v1929_v33, 0.0  ;;  %v776_v47 = vrot.slane %v1931_v23, %v1657_v11 }
  0xed   : > { %v1530_v45 = vpop.eup %1529  ;;  %v1220_v46 = vrot.slane %v1219_v35, 4  ;;  %v1226_v55 = vsel %vm1117_vm0, %v1935_v52, 0.0  ;;  %1545 = vrcp.f32 %v764_v28 }
  0xee   : > { %v1532_v58 = vpop.eup %1531  ;;  %v1214_v59 = vadd.f32 %v1213_v49, %v1212_v63  ;;  %v1227_v57 = vrot.slane %v1226_v55, 4  ;;  %v1233_v2 = vsel %vm1117_vm0, %v1941_v41, 0.0  ;;  %v1954_v3 = vmul.f32 %v1530_v45, %v1797_v31 }
  0xef   : > { %v1534_v5 = vpop.eup %1533  ;;  %v1221_v43 = vadd.f32 %v1220_v46, %v1219_v35  ;;  %v1234_v44 = vrot.slane %v1233_v2, 4  ;;  %v1957_v7 = vmul.f32 %v1532_v58, %v1802_v36  ;;  %1547 = vrcp.f32 %v768_v0 }
  0xf0   : > { %v1536_v26 = vpop.eup %1535  ;;  %v1215_v50 = vrot.slane %v1214_v59, 2  ;;  %v1228_v51 = vadd.f32 %v1227_v57, %v1226_v55  ;;  %v1960_v24 = vmul.f32 %v1534_v5, %v1807_v40  ;;  %v1105_v38 = vrot.slane %v1954_v3, 4 }
  0xf1   : > { %v1538_v39 = vpop.eup %1537  ;;  %v1222_v9 = vrot.slane %v1221_v43, 2  ;;  %v1235_v10 = vadd.f32 %v1234_v44, %v1233_v2  ;;  %v1964_v31 = vmul.f32 %v1536_v26, %v1863_v4  ;;  %v1106_v60 = vrot.slane %v1957_v7, 4 }
  0xf2   : > { %v1540_v15 = vpop.eup %1539  ;;  %v1216_v36 = vadd.f32 %v1215_v50, %v1214_v59  ;;  %v1229_v27 = vrot.slane %v1228_v51, 2  ;;  %v1968_v20 = vmul.f32 %v1538_v39, %v1869_v25  ;;  %v1107_v54 = vrot.slane %v1960_v24, 4 }
  0xf3   : > { %v1542_v40 = vpop.eup %1541  ;;  %v1223_v56 = vadd.f32 %v1222_v9, %v1221_v43  ;;  %v1236_v21 = vrot.slane %v1235_v10, 2  ;;  %v1972_v19 = vmul.f32 %v1540_v15, %v1874_v37  ;;  %v1249_v17 = vrot.slane %v1964_v31, 4 }
  0xf4   : > { %v1217_v4 = vrot.slane %v1216_v36, 1  ;;  %v1230_v12 = vadd.f32 %v1229_v27, %v1228_v51  ;;  %v1976_v18 = vmul.f32 %v1542_v40, %v1879_v13  ;;  %v1250_v16 = vrot.slane %v1968_v20, 4  ;;  %v1544_v32 = vpop.eup %1543 }
  0xf5   : > { %v1224_v25 = vrot.slane %v1223_v56, 1  ;;  %v1237_v30 = vadd.f32 %v1236_v21, %v1235_v10  ;;  %v1251_v42 = vrot.slane %v1972_v19, 4  ;;  %v1257_v62 = vsel %vm1117_vm0, %v1249_v17, 0.0 }
  0xf6   : > { %v1218_v22 = vadd.f32 %v1217_v4, %v1216_v36  ;;  %v1231_v28 = vrot.slane %v1230_v12, 1  ;;  %v1252_v37 = vrot.slane %v1976_v18, 4  ;;  %v1258_v29 = vrot.slane %v1257_v62, 4 }
  0xf7   : > { %v1546_v63 = vpop.eup %1545  ;;  %v1225_v0 = vadd.f32 %v1224_v25, %v1223_v56  ;;  %v1238_v49 = vrot.slane %v1237_v30, 1  ;;  %v1264_v13 = vsel %vm1117_vm0, %v1250_v16, 0.0  ;;  %v1271_v35 = vsel %vm1117_vm0, %v1251_v42, 0.0 }
  0xf8   : > { %v1232_v45 = vadd.f32 %v1231_v28, %v1230_v12  ;;  %v1259_v46 = vadd.f32 %v1258_v29, %v1257_v62  ;;  %v1265_v55 = vrot.slane %v1264_v13, 4  ;;  %v1272_v58 = vrot.slane %v1271_v35, 4 }
  0xf9   : > { %v1548_v59 = vpop.eup %1547  ;;  %v1239_v57 = vadd.f32 %v1238_v49, %v1237_v30  ;;  %v1240_v2 = vadd.f32 %v1225_v0, %v1218_v22  ;;  %v1278_v5 = vsel %vm1117_vm0, %v1252_v37, 0.0  ;;  %v1986_v43 = vmul.f32 %v1544_v32, %v1812_v14 }
  0xfa   : > { %v1260_v44 = vrot.slane %v1259_v46, 2  ;;  %v1266_v26 = vadd.f32 %v1265_v55, %v1264_v13  ;;  %v1273_v50 = vadd.f32 %v1272_v58, %v1271_v35  ;;  %v1279_v51 = vrot.slane %v1278_v5, 4 }
  0xfb   : > { %v1241_v39 = vadd.f32 %v1240_v2, %v1232_v45  ;;  %v1108_v9 = vrot.slane %v1986_v43, 4  ;;  %v1113_v10 = vmul.f32 %v1105_v38, %v1924_v61  ;;  %v1114_v15 = vmul.f32 %v1106_v60, %v1929_v33 }
  0xfc   : > { %v1261_v36 = vadd.f32 %v1260_v44, %v1259_v46  ;;  %v1267_v27 = vrot.slane %v1266_v26, 2  ;;  %v1274_v40 = vrot.slane %v1273_v50, 2  ;;  %v1280_v14 = vadd.f32 %v1279_v51, %v1278_v5 }
  0xfd   : > { %v1242_v56 = vadd.f32 %v1241_v39, %v1239_v57  ;;  %v1115_v21 = vmul.f32 %v1107_v54, %v1935_v52  ;;  %v1116_v17 = vmul.f32 %v1108_v9, %v1941_v41  ;;  %v1118_v4 = vsel %vm1117_vm0, %v1113_v10, 0.0 }
  0xfe   : > { %v1262_v61 = vrot.slane %v1261_v36, 1  ;;  %v1268_v12 = vadd.f32 %v1267_v27, %v1266_v26  ;;  %v1275_v16 = vadd.f32 %v1274_v40, %v1273_v50  ;;  %v1281_v32 = vrot.slane %v1280_v14, 2 }
  0xff   : > { %1243 = vadd.xlane.f32.xlu1 %v1242_v56  ;;  %v1119_v33 = vrot.slane %v1118_v4, 4  ;;  %v1125_v25 = vsel %vm1117_vm0, %v1114_v15, 0.0  ;;  %v1132_v30 = vsel %vm1117_vm0, %v1115_v21, 0.0  ;;  %v1139_v42 = vsel %vm1117_vm0, %v1116_v17, 0.0 }
 0x100   : > { %v1263_v62 = vadd.f32 %v1262_v61, %v1261_v36  ;;  %v1269_v52 = vrot.slane %v1268_v12, 1  ;;  %v1276_v22 = vrot.slane %v1275_v16, 1  ;;  %v1282_v28 = vadd.f32 %v1281_v32, %v1280_v14 }
 0x101   : > { %v1120_v37 = vadd.f32 %v1119_v33, %v1118_v4  ;;  %v1126_v41 = vrot.slane %v1125_v25, 4  ;;  %v1133_v29 = vrot.slane %v1132_v30, 4  ;;  %v1140_v0 = vrot.slane %v1139_v42, 4 }
 0x102   : > { %v1270_v49 = vadd.f32 %v1269_v52, %v1268_v12  ;;  %v1277_v13 = vadd.f32 %v1276_v22, %v1275_v16  ;;  %v1283_v35 = vrot.slane %v1282_v28, 1  ;;  %v778_v45 = vmul.f32 %v1546_v63, %v1783_v48 }
 0x103   : > { %v1121_v46 = vrot.slane %v1120_v37, 2  ;;  %v1127_v55 = vadd.f32 %v1126_v41, %v1125_v25  ;;  %v1134_v58 = vadd.f32 %v1133_v29, %v1132_v30  ;;  %v1141_v57 = vadd.f32 %v1140_v0, %v1139_v42 }
 0x104   : > { %v1284_v2 = vadd.f32 %v1283_v35, %v1282_v28  ;;  %v1285_v5 = vadd.f32 %v1270_v49, %v1263_v62  ;;  %v780_v44 = vmul.f32 %v1548_v59, %v1788_v1  ;;  %1549 = vrcp.f32 %v772_v53 }
 0x105   : > { %v1122_v26 = vadd.f32 %v1121_v46, %v1120_v37  ;;  %v1128_v50 = vrot.slane %v1127_v55, 2  ;;  %v1135_v51 = vrot.slane %v1134_v58, 2  ;;  %v1142_v39 = vrot.slane %v1141_v57, 2 }
 0x106   : > { %v1286_v10 = vadd.f32 %v1285_v5, %v1277_v13  ;;  %1551 = vrcp.f32 %v776_v47  ;;  %v1155_v48 = vrot.slane %v778_v45, 4  ;;  %v1156_v63 = vrot.slane %v780_v44, 4 }
 0x107   : > { %v1123_v15 = vrot.slane %v1122_v26, 1  ;;  %v1129_v36 = vadd.f32 %v1128_v50, %v1127_v55  ;;  %v1136_v27 = vadd.f32 %v1135_v51, %v1134_v58  ;;  %v1143_v40 = vadd.f32 %v1142_v39, %v1141_v57 }
 0x108   : > { %v1287_v1 = vadd.f32 %v1286_v10, %v1284_v2  ;;  %v1163_v59 = vmul.f32 %v1155_v48, %v1964_v31  ;;  %v1164_v34 = vmul.f32 %v1156_v63, %v1968_v20  ;;  %v1290_v53 = vsel %vm1117_vm0, %v778_v45, 0.0 }
 0x109   : > { %v1124_v14 = vadd.f32 %v1123_v15, %v1122_v26  ;;  %v1130_v56 = vrot.slane %v1129_v36, 1  ;;  %v1137_v21 = vrot.slane %v1136_v27, 1  ;;  %v1144_v17 = vrot.slane %v1143_v40, 1 }
 0x10a   : > { %1288 = vadd.xlane.f32.xlu0 %v1287_v1  ;;  %v1171_v11 = vrot.slane %v1163_v59, 4  ;;  %v1172_v23 = vrot.slane %v1164_v34, 4  ;;  %v1291_v47 = vrot.slane %v1290_v53, 4  ;;  %v1297_v4 = vsel %vm1117_vm0, %v780_v44, 0.0 }
 0x10b   : > { %v1131_v61 = vadd.f32 %v1130_v56, %v1129_v36  ;;  %v1138_v12 = vadd.f32 %v1137_v21, %v1136_v27  ;;  %v1298_v16 = vrot.slane %v1297_v4, 4  ;;  %v1323_v33 = vsel %vm1117_vm0, %v1105_v38, 0.0 }
 0x10c   : > { %v1179_v32 = vsel %vm1117_vm0, %v1171_v11, 0.0  ;;  %v1186_v31 = vsel %vm1117_vm0, %v1172_v23, 0.0  ;;  %v1292_v20 = vadd.f32 %v1291_v47, %v1290_v53  ;;  %v1145_v22 = vadd.f32 %v1144_v17, %v1143_v40 }
 0x10d   : > { %v1146_v25 = vadd.f32 %v1131_v61, %v1124_v14  ;;  %v1180_v30 = vrot.slane %v1179_v32, 4  ;;  %v1187_v42 = vrot.slane %v1186_v31, 4  ;;  %v1299_v62 = vadd.f32 %v1298_v16, %v1297_v4 }
 0x10e   : > { %v1550_v52 = vpop.eup %1549  ;;  %v1293_v28 = vrot.slane %v1292_v20, 2  ;;  %v1324_v37 = vrot.slane %v1323_v33, 4  ;;  %v1330_v41 = vsel %vm1117_vm0, %v1106_v60, 0.0  ;;  %v1337_v56 = vsel %vm1117_vm0, %v1107_v54, 0.0 }
 0x10f   : > { %v1147_v29 = vadd.f32 %v1146_v25, %v1138_v12  ;;  %v782_v0 = vmul.f32 %v1550_v52, %v1791_v6  ;;  %v1181_v49 = vadd.f32 %v1180_v30, %v1179_v32  ;;  %v1188_v13 = vadd.f32 %v1187_v42, %v1186_v31 }
 0x110   : > { %v1552_v3 = vpop.eup %1551  ;;  %v1294_v35 = vadd.f32 %v1293_v28, %v1292_v20  ;;  %v1300_v38 = vrot.slane %v1299_v62, 2  ;;  %v1325_v45 = vadd.f32 %v1324_v37, %v1323_v33  ;;  %v1331_v46 = vrot.slane %v1330_v41, 4 }
 0x111   : > { %v1148_v55 = vadd.f32 %v1147_v29, %v1145_v22  ;;  %v784_v58 = vmul.f32 %v1552_v3, %v1793_v8  ;;  %v1157_v57 = vrot.slane %v782_v0, 4  ;;  %v1182_v2 = vrot.slane %v1181_v49, 2 }
 0x112   : > { %v1189_v5 = vrot.slane %v1188_v13, 2  ;;  %v1295_v44 = vrot.slane %v1294_v35, 1  ;;  %v1301_v7 = vadd.f32 %v1300_v38, %v1299_v62  ;;  %v1304_v60 = vsel %vm1117_vm0, %v782_v0, 0.0 }
 0x113   : > { %1149 = vadd.xlane.f32.xlu1 %v1148_v55  ;;  %v1158_v26 = vrot.slane %v784_v58, 4  ;;  %v1165_v6 = vmul.f32 %v1157_v57, %v1972_v19  ;;  %v1183_v50 = vadd.f32 %v1182_v2, %v1181_v49  ;;  %v1305_v51 = vrot.slane %v1304_v60, 4 }
 0x114   : > { %v1190_v39 = vadd.f32 %v1189_v5, %v1188_v13  ;;  %v1296_v10 = vadd.f32 %v1295_v44, %v1294_v35  ;;  %v1302_v48 = vrot.slane %v1301_v7, 1  ;;  %v1311_v63 = vsel %vm1117_vm0, %v784_v58, 0.0 }
 0x115   : > { %v1166_v8 = vmul.f32 %v1158_v26, %v1976_v18  ;;  %v1173_v15 = vrot.slane %v1165_v6, 4  ;;  %v1184_v36 = vrot.slane %v1183_v50, 1  ;;  %v1306_v27 = vadd.f32 %v1305_v51, %v1304_v60 }
 0x116   : > { %v1191_v40 = vrot.slane %v1190_v39, 1  ;;  %v1303_v1 = vadd.f32 %v1302_v48, %v1301_v7  ;;  %v1312_v59 = vrot.slane %v1311_v63, 4  ;;  %v1326_v34 = vrot.slane %v1325_v45, 2 }
 0x117   : > { %v1174_v53 = vrot.slane %v1166_v8, 4  ;;  %v1193_v14 = vsel %vm1117_vm0, %v1173_v15, 0.0  ;;  %v1307_v19 = vrot.slane %v1306_v27, 2  ;;  %v1185_v21 = vadd.f32 %v1184_v36, %v1183_v50 }
 0x118   : > { %v1192_v17 = vadd.f32 %v1191_v40, %v1190_v39  ;;  %v1194_v11 = vrot.slane %v1193_v14, 4  ;;  %v1313_v23 = vadd.f32 %v1312_v59, %v1311_v63  ;;  %v1327_v4 = vadd.f32 %v1326_v34, %v1325_v45 }
 0x119   : > { %v1200_v18 = vsel %vm1117_vm0, %v1174_v53, 0.0  ;;  %v1308_v47 = vadd.f32 %v1307_v19, %v1306_v27  ;;  %v1332_v61 = vadd.f32 %v1331_v46, %v1330_v41  ;;  %v1318_v31 = vadd.f32 %v1303_v1, %v1296_v10 }
 0x11a   : > { %v1195_v12 = vadd.f32 %v1194_v11, %v1193_v14  ;;  %v1201_v16 = vrot.slane %v1200_v18, 4  ;;  %v1314_v32 = vrot.slane %v1313_v23, 2  ;;  %v1328_v33 = vrot.slane %v1327_v4, 1 }
 0x11b   : > { %v1309_v20 = vrot.slane %v1308_v47, 1  ;;  %v1333_v25 = vrot.slane %v1332_v61, 2  ;;  %v1338_v30 = vrot.slane %v1337_v56, 4  ;;  %v1344_v62 = vsel %vm1117_vm0, %v1108_v9, 0.0 }
 0x11c   : > { %v1196_v24 = vrot.slane %v1195_v12, 2  ;;  %v1202_v42 = vadd.f32 %v1201_v16, %v1200_v18  ;;  %v1315_v54 = vadd.f32 %v1314_v32, %v1313_v23  ;;  %v1207_v52 = vadd.f32 %v1192_v17, %v1185_v21 }
 0x11d   : > { %v1310_v22 = vadd.f32 %v1309_v20, %v1308_v47  ;;  %v1334_v28 = vadd.f32 %v1333_v25, %v1332_v61  ;;  %v1339_v37 = vadd.f32 %v1338_v30, %v1337_v56  ;;  %v1345_v49 = vrot.slane %v1344_v62, 4 }
 0x11e   : > { %v1197_v41 = vadd.f32 %v1196_v24, %v1195_v12  ;;  %v1203_v29 = vrot.slane %v1202_v42, 2  ;;  %v1316_v0 = vrot.slane %v1315_v54, 1  ;;  %v1329_v3 = vadd.f32 %v1328_v33, %v1327_v4 }
 0x11f   : > { %v1319_v13 = vadd.f32 %v1318_v31, %v1310_v22  ;;  %v1335_v35 = vrot.slane %v1334_v28, 1  ;;  %v1340_v38 = vrot.slane %v1339_v37, 2  ;;  %v1346_v58 = vadd.f32 %v1345_v49, %v1344_v62 }
 0x120   : > { %v1198_v45 = vrot.slane %v1197_v41, 1  ;;  %v1204_v46 = vadd.f32 %v1203_v29, %v1202_v42  ;;  %v1317_v55 = vadd.f32 %v1316_v0, %v1315_v54 }
 0x121   : > { %v1336_v57 = vadd.f32 %v1335_v35, %v1334_v28  ;;  %v1341_v43 = vadd.f32 %v1340_v38, %v1339_v37  ;;  %v1347_v44 = vrot.slane %v1346_v58, 2 }
 0x122   : > { %v1199_v2 = vadd.f32 %v1198_v45, %v1197_v41  ;;  %v1205_v9 = vrot.slane %v1204_v46, 1  ;;  %v1320_v5 = vadd.f32 %v1319_v13, %v1317_v55 }
 0x123   : > { %v1342_v7 = vrot.slane %v1341_v43, 1  ;;  %v1351_v60 = vadd.f32 %v1336_v57, %v1329_v3  ;;  %v1348_v50 = vadd.f32 %v1347_v44, %v1346_v58 }
 0x124   : > { %v1206_v26 = vadd.f32 %v1205_v9, %v1204_v46  ;;  %v1208_v6 = vadd.f32 %v1207_v52, %v1199_v2  ;;  %1321 = vadd.xlane.f32.xlu1 %v1320_v5 }
 0x125   : > { %v1343_v51 = vadd.f32 %v1342_v7, %v1341_v43  ;;  %v1349_v10 = vrot.slane %v1348_v50, 1 }
 0x126   : > { %v1209_v39 = vadd.f32 %v1208_v6, %v1206_v26 }
 0x127   : > { %v1352_v48 = vadd.f32 %v1351_v60, %v1343_v51  ;;  %v1350_v63 = vadd.f32 %v1349_v10, %v1348_v50 }
 0x128   : > { %1210 = vadd.xlane.f32.xlu0 %v1209_v39 }
 0x129   : > { %v1353_v8 = vadd.f32 %v1352_v48, %v1350_v63 }
 0x12c   : > { %1354 = vadd.xlane.f32.xlu0 %v1353_v8 }
 0x18c   : > { %v1244_v15 = vpop.xlane.xlu1 %1243 }
 0x197   : > { %v1289_v36 = vpop.xlane.xlu0 %1288 }
 0x1a0   : > { %v1150_v27 = vpop.xlane.xlu1 %1149 }
 0x1b1   : > { %v1322_v59 = vpop.xlane.xlu1 %1321 }
 0x1b5   : > { %v1211_v40 = vpop.xlane.xlu0 %1210 }
 0x1b6   : > { %v1357_v1 = vsel %vm1356_vm1, %v1150_v27, %v1211_v40 }
 0x1b7   : > { %v1359_v34 = vsel %vm1358_vm2, %v1357_v1, %v1244_v15 }
 0x1b8   : > { %v1361_v53 = vsel %vm1360_vm3, %v1359_v34, %v1289_v36 }
 0x1b9   : > { %v1362_v14 = vsel %vm1117_vm0, %v1361_v53, %v1322_v59  ;;  %v1355_v19 = vpop.xlane.xlu0 %1354 }
 0x1ba   : > { %v1364_v56 = vsel %vm1363_vm4, %v1362_v14, %v1355_v19 }
 0x1bb   : > { %v1366_v21 = vsel %vm1365_vm5, %v1364_v56, 0.0 }
 0x1bc   : > { %v1368_v17 = vsel %vm1367_vm6, %v1366_v21, 0.0 }
 0x1bd   : > { %1370 = vst.msk [vmem:[%s260_s20] sm:$0xff] %vm1369_vm7, %v1368_v17 }
 0x1be PF: > { %s16_s18 = sadd.s32 1, %s1578_s18  }
 0x1bf   : > { %p13_p2 = scmp.ge.s32.totalorder %s16_s18, 4  }
 0x1c1   :  { %15 = sbr.rel (!%p13_p2) target bundleno = 1 (0x1), region = 78 }
 0x1c8   :  { %1390 = vsyncpa [#allocation3], 1 }
 0x1c9   :  { %1392 = vsyncpa [#allocation3 + $0x1], 1 }

// kernel: _lambda_.4
= control target key start
LH: loop header
LB: loop body
LE: loop exit
PB: predicated region body
PF: predicated region fallthrough
CT: control target
= control target key end

     0   :  { %14 = vsyncpa [#allocation3], 0  ;;  %s2540_s0 = inlined_call_operand.vmem [shape: f32[2], index: 0, kind: input, shape index: {}]   ;;  %s2541_s1 = inlined_call_operand.vmem [shape: f32[4], index: 1, kind: input, shape index: {}]   ;;  %s2542_s2 = inlined_call_operand.vmem [shape: f32[4,1024], index: 2, kind: input, shape index: {}]   ;;  %s2543_s3 = inlined_call_operand.vmem [shape: f32[4,1024], index: 3, kind: input, shape index: {}]   ;;  %s2544_s4 = inlined_call_operand.vmem [shape: f32[8,4], index: 4, kind: input, shape index: {}]   ;;  %s2545_s5 = inlined_call_operand.vmem [shape: f32[4,8], index: 5, kind: input, shape index: {}]   ;;  %s2546_s6 = inlined_call_operand.vmem [shape: f32[8,1], index: 6, kind: input, shape index: {}]   ;;  %s2547_s7 = inlined_call_operand.vmem [shape: f32[4,1024], index: 7, kind: output, shape index: {0}]   ;;  %s2548_s8 = inlined_call_operand.vmem [shape: f32[2,8,1], index: 8, kind: output, shape index: {1}]  }
   0x1   :  { %15 = vsyncpa [#allocation5], 0  ;;  %s2012_s27 = smov 0  }
   0x2 LB: > { %s2018_s28 = sadd.s32 4294967295, %s1955_s27   ;;  %p1778_p0 = scmp.ge.s32.totalorder %s1955_s27, 1  ;;  %s1955_s27 = sphi %s2012_s27, %s21_s27  }
   0x3   : > { %p235_p1 = scmp.lt.s32.totalorder %s1955_s27, 3  ;;  %s248_s9 = sshll.u32 %s2540_s0, 4  ;;  %s249_s9 = int_to_ptr.vmem [resolvable:$true] %s248_s9 }
   0x4   : > { %p2549_p3 = scmp.eq.s32.totalorder %s2018_s28, 0  ;;  %s259_s13 = sshll.u32 %s2541_s1, 4  ;;  %s260_s13 = int_to_ptr.vmem [resolvable:$true] %s259_s13 }
   0x5   : > { %p2025_p2 = pnand %p1778_p0, %p235_p1  ;;  %s1911_s15 = scalar_lea.vmem %s249_s9, 16 }
   0x6   : > { %p1912_p6 = scmp.ne.s32.totalorder %s249_s9, %s1911_s15  ;;  %p1919_p10 = scmp.lt.s32.totalorder %s249_s9, %s249_s9 }
   0x7   : > { %s2551_s10 = scalar_select %p2025_p2, 1, 0 }
   0x8   : > { %p1805_p4 = pneg %p2025_p2  ;;  %p1920_p11 = scmp.lt.s32.totalorder %s1911_s15, %s1911_s15 }
   0xa   : > { %p2037_p5 = pnand %p2549_p3, %p1805_p4  ;;  %p1921_p12 = por %p1920_p11, %p1919_p10 }
   0xc   : > { %p1913_p7 = pneg %p2037_p5 }
   0xe   : > { %p1914_p8 = pnand %p1913_p7, %p1912_p6 }
  0x10   : > { %p1915_p9 = pneg %p1914_p8 }
  0x12   : > { %p1922_p13 = pnand %p1921_p12, %p1915_p9 }
  0x14   : > { %1925 = shalt.err (!%p1922_p13)
}
  0x15   : > { %s1957_s16 = smov [#allocation2]   ;;  %s1926_s17 = scalar_lea.vmem %s260_s13, 16 }
  0x16   : > { %1808 = dma.vmem_to_smem (!%p2037_p5), %s249_s9, 16, %s1957_s16, [#allocation3]  }
  0x17   : > { %p1927_p0 = scmp.ne.s32.totalorder %s260_s13, %s1926_s17  ;;  %p1934_p3 = scmp.lt.s32.totalorder %s260_s13, %s260_s13 }
  0x18   : > { %p1935_p2 = scmp.lt.s32.totalorder %s1926_s17, %s1926_s17 }
  0x19   : > { %p1929_p1 = pnand %p1927_p0, %p1913_p7 }
  0x1a   : > { %p1936_p6 = por %p1935_p2, %p1934_p3 }
  0x1b   : > { %p1930_p4 = pneg %p1929_p1 }
  0x1d   : > { %p1937_p8 = pnand %p1936_p6, %p1930_p4 }
  0x1f   : > { %1940 = shalt.err (!%p1937_p8)
}
  0x20   : > { %s1958_s18 = smov [#allocation4]   ;;  %p2553_p9 = scmp.ne.s32.totalorder %s2551_s10, 0 }
  0x21   : > { %1811 = dma.vmem_to_smem (!%p2037_p5), %s260_s13, 16, %s1958_s18, [#allocation5]  }
  0x22   : > { %299 = sbr.rel (%p2553_p9) target bundleno = 480 (0x1e0), region = 48  ;;  %p2554_p10 = scmp.eq.s32.totalorder (!%p2553_p9), %s2018_s28, 0 }
  0x29   : > { %1946 = dma.done.wait (%p2554_p10), [#allocation3], 16   ;;  %p2555_p11 = pmov %p2554_p10 }
  0x2a   : > { %p2556_p7 = pmov %p2554_p10 }
  0x2b   : > { %1948 = vsyncadd (%p2555_p11), [#allocation3], 4294967280 }
  0x2c   : > { %1950 = dma.done.wait (%p2556_p7), [#allocation5], 16   ;;  %p2557_p2 = pmov %p2556_p7 }
  0x2e   : > { %1952 = vsyncadd (%p2557_p2), [#allocation5], 4294967280 }
  0x2f   : > { %309 = sfence }
  0x30   : > { %v380_v0 = vld [vmem:[%s2544_s4] sm:$0xff]  ;;  %v1959_v1 = vmov 0   ;;  %v1960_v2 = vmov 1   ;;  %v1961_v4 = vmov 2   ;;  %v1962_v6 = vmov 3   ;;  %s1785_s25 = sshll.u32 %s2018_s28, 2 }
  0x31   : > { %1834 = vset.pattern.permute.xlu0 %v1959_v1  ;;  %1835 = vset.pattern.permute.xlu1 %v1960_v2  ;;  %v381_v3 = vld [vmem:[%s2546_s6] sm:$0xff]  ;;  %v1963_v7 = vmov 5   ;;  %v1964_v8 = vmov 7   ;;  %v1965_v9 = vmov 4   ;;  %v1966_v10 = vmov 6   ;;  %p348_p3 = scmp.lt.s32.totalorder %s1785_s25, 7 }
  0x32   : > { %390 = vperm.xlu0 %1834, %v380_v0   ;;  %440 = vperm.xlu1 %1835, %v380_v0   ;;  %v1209_v5 = vld [vmem:[%s2545_s5] sm:$0xf]  ;;  %s371_s26 = sld [smem:[#allocation2 + %s2018_s28]]  ;;  %v395_v11 = vlaneseq  ;;  %vm1251_vm0 = vcmask 1043456   ;;  %p365_p5 = scmp.lt.s32.totalorder %s2018_s28, 1  ;;  %vm1653_vm1 = vcmask 7168  }
  0x33   : > { %s2559_s25 = smov (!%p348_p3, %s1785_s25), 7  ;;  %s2222_s15 = sld [smem:[#allocation4]] }
  0x34   : > { %s2068_s29 = sshll.u32 %s2559_s25, 2  ;;  %v396_v12 = vshrl.u32 %v395_v11, 7  ;;  %s2314_s16 = sld [smem:[#allocation4 + $0x2]] }
  0x35   : > { %s357_s11 = scalar_lea.vmem %s2543_s3, %s2068_s29  ;;  %s351_s14 = scalar_lea.vmem %s2542_s2, %s2068_s29 }
  0x36   : > { %384 = vperm.xlu0 %1834, %v381_v3   ;;  %1836 = vset.pattern.permute.xlu1 %v1961_v4  ;;  %v373_v13 = vld [vmem:[%s357_s11] sm:$0xff]  ;;  %v374_v15 = vld [vmem:[%s357_s11 + $0x8] sm:$0xff]  ;;  %v2078_v16 = vsub.s32 0, %v396_v12  ;;  %v2080_v17 = vsub.s32 4, %v396_v12  ;;  %v2086_v22 = vsub.s32 1, %v396_v12  ;;  %v2088_v23 = vsub.s32 5, %v396_v12  ;;  %s363_s21 = scalar_lea.vmem %s2547_s7, %s2068_s29 }
  0x37   : > { %488 = vperm.xlu1 %1836, %v380_v0   ;;  %v2082_v19 = vld [vmem:[%s351_s14] sm:$0xff]  ;;  %v2084_v21 = vld [vmem:[%s351_s14 + $0x8] sm:$0xff]  ;;  %v2102_v29 = vsub.s32 2, %v396_v12  ;;  %v2106_v31 = vsub.s32 6, %v396_v12  ;;  %v2108_v32 = vsub.s32 3, %v396_v12  ;;  %v2110_v33 = vsub.s32 7, %v396_v12 }
  0x38   : > { %s372_s30 = smul.f32 10.0, %s371_s26  ;;  %v398_v25 = vrot.slane %v2082_v19, %v2078_v16  ;;  %v402_v26 = vrot.slane %v2082_v19, %v2080_v17  ;;  %v406_v27 = vrot.slane %v2084_v21, %v2078_v16  ;;  %v410_v30 = vrot.slane %v2084_v21, %v2080_v17  ;;  %s2398_s17 = sld [smem:[#allocation4 + $0x3]] }
  0x39   : > { %v446_v34 = vrot.slane %v2082_v19, %v2086_v22  ;;  %v450_v35 = vrot.slane %v2082_v19, %v2088_v23  ;;  %v454_v36 = vrot.slane %v2084_v21, %v2086_v22  ;;  %v458_v37 = vrot.slane %v2084_v21, %v2088_v23  ;;  %s1793_s18 = sld [smem:[#allocation4 + $0x1]]  ;;  %s2561_s28 = smov (!%p365_p5, %s2018_s28), 1 }
  0x3a   : > { %1837 = vset.pattern.permute.xlu0 %v1962_v6  ;;  %v375_v14 = vstv %s372_s30  ;;  %v418_v38 = vrot.slane %v398_v25, %v2078_v16  ;;  %v422_v39 = vrot.slane %v402_v26, %v2078_v16  ;;  %v426_v40 = vrot.slane %v406_v27, %v2078_v16  ;;  %s1791_s22 = sshll.u32 %s2561_s28, 3 }
  0x3b   : > { %536 = vperm.xlu0 %1837, %v380_v0   ;;  %1838 = vset.pattern.permute.xlu1 %v1959_v1  ;;  %v376_v18 = vmul.f32 %v375_v14, %v373_v13  ;;  %v377_v20 = vmul.f32 %v375_v14, %v374_v15  ;;  %v430_v46 = vrot.slane %v410_v30, %v2078_v16  ;;  %s368_s25 = scalar_lea.vmem %s2548_s8, %s1791_s22 }
  0x3c   : > { %1302 = vperm.xlu1 %1838, %v1209_v5   ;;  %v466_v50 = vrot.slane %v446_v34, %v2086_v22  ;;  %v470_v51 = vrot.slane %v450_v35, %v2086_v22  ;;  %v474_v52 = vrot.slane %v454_v36, %v2086_v22  ;;  %v478_v53 = vrot.slane %v458_v37, %v2086_v22 }
  0x3d   : > { %v2091_v24 = vadd.f32 %v376_v18, %v2082_v19  ;;  %v2100_v28 = vadd.f32 %v377_v20, %v2084_v21  ;;  %v494_v55 = vrot.slane %v2082_v19, %v2102_v29  ;;  %v498_v56 = vrot.slane %v2082_v19, %v2106_v31 }
  0x3e   : > { %v502_v57 = vrot.slane %v2084_v21, %v2102_v29  ;;  %v506_v1 = vrot.slane %v2084_v21, %v2106_v31 }
  0x3f   : > { %1840 = vset.pattern.permute.xlu0 %v1961_v4  ;;  %v588_v41 = vrot.slane %v2091_v24, %v2078_v16  ;;  %v592_v42 = vrot.slane %v2091_v24, %v2080_v17  ;;  %v596_v43 = vrot.slane %v2100_v28, %v2078_v16  ;;  %v600_v44 = vrot.slane %v2100_v28, %v2080_v17 }
  0x40   : > { %1839 = vset.pattern.permute.xlu1 %v1960_v2  ;;  %1358 = vperm.xlu0 %1840, %v1209_v5   ;;  %v632_v45 = vrot.slane %v2091_v24, %v2086_v22  ;;  %v636_v47 = vrot.slane %v2091_v24, %v2088_v23  ;;  %v640_v48 = vrot.slane %v2100_v28, %v2086_v22 }
  0x41   : > { %1330 = vperm.xlu1 %1839, %v1209_v5   ;;  %v644_v49 = vrot.slane %v2100_v28, %v2088_v23  ;;  %v608_v54 = vrot.slane %v588_v41, %v2078_v16  ;;  %v612_v58 = vrot.slane %v592_v42, %v2078_v16  ;;  %v616_v59 = vrot.slane %v596_v43, %v2078_v16 }
  0x42   : > { %v620_v60 = vrot.slane %v600_v44, %v2078_v16  ;;  %v652_v61 = vrot.slane %v632_v45, %v2086_v22  ;;  %v656_v62 = vrot.slane %v636_v47, %v2086_v22  ;;  %v660_v63 = vrot.slane %v640_v48, %v2086_v22 }
  0x43   : > { %v664_v0 = vrot.slane %v644_v49, %v2086_v22  ;;  %v676_v2 = vrot.slane %v2091_v24, %v2102_v29  ;;  %v680_v3 = vrot.slane %v2091_v24, %v2106_v31  ;;  %v684_v4 = vrot.slane %v2100_v28, %v2102_v29 }
  0x44   : > { %1843 = vset.pattern.permute.xlu0 %v1963_v7  ;;  %v546_v7 = vrot.slane %v2082_v19, %v2110_v33  ;;  %v724_v11 = vrot.slane %v2091_v24, %v2110_v33  ;;  %v728_v12 = vrot.slane %v2100_v28, %v2108_v32  ;;  %v732_v13 = vrot.slane %v2100_v28, %v2110_v33 }
  0x45   : > { %1841 = vset.pattern.permute.xlu1 %v1962_v6  ;;  %1519 = vperm.xlu0 %1843, %v1209_v5   ;;  %v542_v6 = vrot.slane %v2082_v19, %v2108_v32  ;;  %v514_v14 = vrot.slane %v494_v55, %v2102_v29  ;;  %v518_v15 = vrot.slane %v498_v56, %v2102_v29 }
  0x46   : > { %1386 = vperm.xlu1 %1841, %v1209_v5   ;;  %v522_v18 = vrot.slane %v502_v57, %v2102_v29  ;;  %v526_v19 = vrot.slane %v506_v1, %v2102_v29  ;;  %v696_v20 = vrot.slane %v676_v2, %v2102_v29  ;;  %v566_v27 = vrot.slane %v546_v7, %v2108_v32 }
  0x47   : > { %v562_v26 = vrot.slane %v542_v6, %v2108_v32  ;;  %v744_v37 = vrot.slane %v724_v11, %v2108_v32  ;;  %v748_v41 = vrot.slane %v728_v12, %v2108_v32  ;;  %v752_v42 = vrot.slane %v732_v13, %v2108_v32 }
  0x49   : > { %1846 = vset.pattern.permute.xlu0 %v1964_v8 }
  0x4a   : > { %1842 = vset.pattern.permute.xlu1 %v1965_v9  ;;  %v554_v9 = vrot.slane %v2084_v21, %v2110_v33 }
  0x4b   : > { %1491 = vperm.xlu1 %1842, %v1209_v5  }
  0x4c   : > { %v574_v30 = vrot.slane %v554_v9, %v2108_v32 }
  0x4f   : > { %1844 = vset.pattern.permute.xlu1 %v1966_v10  ;;  %v720_v10 = vrot.slane %v2091_v24, %v2108_v32  ;;  %v704_v24 = vrot.slane %v684_v4, %v2102_v29 }
  0x50   : > { %1547 = vperm.xlu1 %1844, %v1209_v5  }
  0x51   : > { %v740_v36 = vrot.slane %v720_v10, %v2108_v32 }
  0x54   : > { %1845 = vset.pattern.permute.xlu1 %v1964_v8  ;;  %v550_v8 = vrot.slane %v2084_v21, %v2108_v32  ;;  %v700_v21 = vrot.slane %v680_v3, %v2102_v29 }
  0x55   : > { %1575 = vperm.xlu1 %1845, %v1209_v5   ;;  %v688_v5 = vrot.slane %v2100_v28, %v2106_v31 }
  0x56   : > { %v570_v28 = vrot.slane %v550_v8, %v2108_v32 }
  0x57   : > { %v708_v25 = vrot.slane %v688_v5, %v2102_v29 }
  0xb1   : > { %v391_v34 = vpop.permute.xlu0 %390  ;;  %v441_v35 = vpop.permute.xlu1 %440 }
  0xb2   : > { %v431_v43 = vmul.f32 %v418_v38, %v391_v34  ;;  %v432_v44 = vmul.f32 %v422_v39, %v391_v34  ;;  %v433_v45 = vmul.f32 %v426_v40, %v391_v34  ;;  %v434_v47 = vmul.f32 %v430_v46, %v391_v34 }
  0xb3   : > { %v621_v48 = vmul.f32 %v608_v54, %v391_v34  ;;  %v622_v49 = vmul.f32 %v612_v58, %v391_v34  ;;  %v623_v55 = vmul.f32 %v616_v59, %v391_v34  ;;  %v624_v56 = vmul.f32 %v620_v60, %v391_v34 }
  0xb4   : > { %v479_v57 = vmul.f32 %v466_v50, %v441_v35  ;;  %v480_v1 = vmul.f32 %v470_v51, %v441_v35  ;;  %v481_v2 = vmul.f32 %v474_v52, %v441_v35  ;;  %v482_v3 = vmul.f32 %v478_v53, %v441_v35 }
  0xb5   : > { %v665_v4 = vmul.f32 %v652_v61, %v441_v35  ;;  %v666_v5 = vmul.f32 %v656_v62, %v441_v35  ;;  %v667_v6 = vmul.f32 %v660_v63, %v441_v35  ;;  %v668_v7 = vmul.f32 %v664_v0, %v441_v35  ;;  %v385_v8 = vpop.permute.xlu0 %384 }
  0xb6   : > { %v435_v9 = vadd.f32 %v431_v43, %v385_v8  ;;  %v436_v10 = vadd.f32 %v432_v44, %v385_v8  ;;  %v437_v11 = vadd.f32 %v433_v45, %v385_v8  ;;  %v438_v38 = vadd.f32 %v434_v47, %v385_v8  ;;  %v489_v58 = vpop.permute.xlu1 %488 }
  0xb7   : > { %v625_v39 = vadd.f32 %v621_v48, %v385_v8  ;;  %v626_v40 = vadd.f32 %v622_v49, %v385_v8  ;;  %v627_v46 = vadd.f32 %v623_v55, %v385_v8  ;;  %v628_v54 = vadd.f32 %v624_v56, %v385_v8 }
  0xb8   : > { %v483_v59 = vadd.f32 %v479_v57, %v435_v9  ;;  %v484_v60 = vadd.f32 %v480_v1, %v436_v10  ;;  %v485_v50 = vadd.f32 %v481_v2, %v437_v11  ;;  %v486_v51 = vadd.f32 %v482_v3, %v438_v38 }
  0xb9   : > { %v669_v52 = vadd.f32 %v665_v4, %v625_v39  ;;  %v670_v53 = vadd.f32 %v666_v5, %v626_v40  ;;  %v671_v61 = vadd.f32 %v667_v6, %v627_v46  ;;  %v672_v62 = vadd.f32 %v668_v7, %v628_v54 }
  0xba   : > { %v527_v63 = vmul.f32 %v514_v14, %v489_v58  ;;  %v528_v0 = vmul.f32 %v518_v15, %v489_v58  ;;  %v529_v12 = vmul.f32 %v522_v18, %v489_v58  ;;  %v530_v13 = vmul.f32 %v526_v19, %v489_v58  ;;  %v537_v45 = vpop.permute.xlu0 %536 }
  0xbb   : > { %v709_v34 = vmul.f32 %v696_v20, %v489_v58  ;;  %v710_v35 = vmul.f32 %v700_v21, %v489_v58  ;;  %v711_v43 = vmul.f32 %v704_v24, %v489_v58  ;;  %v712_v44 = vmul.f32 %v708_v25, %v489_v58 }
  0xbc   : > { %v531_v47 = vadd.f32 %v527_v63, %v483_v59  ;;  %v532_v48 = vadd.f32 %v528_v0, %v484_v60  ;;  %v533_v49 = vadd.f32 %v529_v12, %v485_v50  ;;  %v534_v55 = vadd.f32 %v530_v13, %v486_v51 }
  0xbd   : > { %v713_v56 = vadd.f32 %v709_v34, %v669_v52  ;;  %v714_v57 = vadd.f32 %v710_v35, %v670_v53  ;;  %v715_v1 = vadd.f32 %v711_v43, %v671_v61  ;;  %v716_v2 = vadd.f32 %v712_v44, %v672_v62 }
  0xbe   : > { %v575_v3 = vmul.f32 %v562_v26, %v537_v45  ;;  %v576_v4 = vmul.f32 %v566_v27, %v537_v45  ;;  %v577_v5 = vmul.f32 %v570_v28, %v537_v45  ;;  %v578_v14 = vmul.f32 %v574_v30, %v537_v45 }
  0xbf   : > { %v753_v15 = vmul.f32 %v740_v36, %v537_v45  ;;  %v754_v18 = vmul.f32 %v744_v37, %v537_v45  ;;  %v755_v19 = vmul.f32 %v748_v41, %v537_v45  ;;  %v756_v20 = vmul.f32 %v752_v42, %v537_v45 }
  0xc0   : > { %v579_v21 = vadd.f32 %v575_v3, %v531_v47  ;;  %v580_v24 = vadd.f32 %v576_v4, %v532_v48  ;;  %v581_v25 = vadd.f32 %v577_v5, %v533_v49  ;;  %v582_v6 = vadd.f32 %v578_v14, %v534_v55 }
  0xc1   : > { %v2200_v7 = vadd.f32 %v753_v15, %v713_v56  ;;  %v2202_v8 = vadd.f32 %v754_v18, %v714_v57  ;;  %v2204_v9 = vadd.f32 %v755_v19, %v715_v1  ;;  %v2206_v10 = vadd.f32 %v756_v20, %v716_v2 }
  0xc2   : > { %v765_v26 = vrot.slane %v579_v21, 1  ;;  %v766_v27 = vrot.slane %v580_v24, 1  ;;  %v767_v28 = vrot.slane %v581_v25, 1  ;;  %v768_v30 = vrot.slane %v582_v6, 1 }
  0xc3   : > { %v777_v36 = vrot.slane %v579_v21, 2  ;;  %v778_v37 = vrot.slane %v580_v24, 2  ;;  %v779_v41 = vrot.slane %v581_v25, 2  ;;  %v780_v42 = vrot.slane %v582_v6, 2 }
  0xc4   : > { %v773_v11 = vmax.f32 %v579_v21, %v765_v26  ;;  %v774_v38 = vmax.f32 %v580_v24, %v766_v27  ;;  %v775_v39 = vmax.f32 %v581_v25, %v767_v28  ;;  %v776_v40 = vmax.f32 %v582_v6, %v768_v30 }
  0xc5   : > { %v789_v46 = vrot.slane %v579_v21, 3  ;;  %v790_v54 = vrot.slane %v580_v24, 3  ;;  %v791_v58 = vrot.slane %v581_v25, 3  ;;  %v792_v59 = vrot.slane %v582_v6, 3 }
  0xc6   : > { %v785_v60 = vmax.f32 %v773_v11, %v777_v36  ;;  %v786_v50 = vmax.f32 %v774_v38, %v778_v37  ;;  %v787_v51 = vmax.f32 %v775_v39, %v779_v41  ;;  %v788_v52 = vmax.f32 %v776_v40, %v780_v42 }
  0xc7   : > { %v989_v53 = vrot.slane %v2200_v7, 1  ;;  %v990_v61 = vrot.slane %v2202_v8, 1  ;;  %v991_v13 = vrot.slane %v2204_v9, 1  ;;  %v992_v34 = vrot.slane %v2206_v10, 1 }
  0xc8   : > { %v797_v62 = vmax.f32 %v785_v60, %v789_v46  ;;  %v798_v63 = vmax.f32 %v786_v50, %v790_v54  ;;  %v799_v0 = vmax.f32 %v787_v51, %v791_v58  ;;  %v800_v12 = vmax.f32 %v788_v52, %v792_v59 }
  0xc9   : > { %v997_v35 = vmax.f32 %v2200_v7, %v989_v53  ;;  %v998_v43 = vmax.f32 %v2202_v8, %v990_v61  ;;  %v999_v27 = vmax.f32 %v2204_v9, %v991_v13  ;;  %v1000_v37 = vmax.f32 %v2206_v10, %v992_v34 }
  0xca   : > { %v804_v44 = vrot.slane %v797_v62, %v2078_v16  ;;  %v808_v45 = vrot.slane %v798_v63, %v2078_v16  ;;  %v812_v47 = vrot.slane %v799_v0, %v2078_v16  ;;  %v816_v48 = vrot.slane %v800_v12, %v2078_v16 }
  0xcb   : > { %v896_v49 = vrot.slane %v797_v62, %v2080_v17  ;;  %v900_v55 = vrot.slane %v798_v63, %v2080_v17  ;;  %v904_v56 = vrot.slane %v799_v0, %v2080_v17  ;;  %v908_v57 = vrot.slane %v800_v12, %v2080_v17 }
  0xcc   : > { %v817_v1 = vsub.f32 %v579_v21, %v804_v44  ;;  %v818_v2 = vsub.f32 %v580_v24, %v808_v45  ;;  %v819_v3 = vsub.f32 %v581_v25, %v812_v47  ;;  %v820_v4 = vsub.f32 %v582_v6, %v816_v48 }
  0xcd   : > { %v909_v5 = vsub.f32 %v579_v21, %v896_v49  ;;  %v910_v14 = vsub.f32 %v580_v24, %v900_v55  ;;  %v911_v15 = vsub.f32 %v581_v25, %v904_v56  ;;  %v912_v18 = vsub.f32 %v582_v6, %v908_v57 }
  0xce   : > { %v821_v19 = vmul.f32 1.442695, %v817_v1  ;;  %v823_v20 = vmul.f32 1.442695, %v818_v2  ;;  %v825_v26 = vmul.f32 1.442695, %v819_v3  ;;  %v2235_v51 = vstv %s2222_s15 }
  0xcf   : > { %v827_v28 = vmul.f32 1.442695, %v820_v4  ;;  %v913_v30 = vmul.f32 1.442695, %v909_v5  ;;  %v915_v36 = vmul.f32 1.442695, %v910_v14 }
  0xd0   : > { %1847 = vpow2.f32 %v821_v19  ;;  %v917_v41 = vmul.f32 1.442695, %v911_v15  ;;  %v919_v42 = vmul.f32 1.442695, %v912_v18  ;;  %v1001_v21 = vrot.slane %v2200_v7, 2 }
  0xd1   : > { %1849 = vpow2.f32 %v823_v20  ;;  %v1002_v24 = vrot.slane %v2202_v8, 2  ;;  %v1003_v25 = vrot.slane %v2204_v9, 2  ;;  %v1004_v6 = vrot.slane %v2206_v10, 2 }
  0xd2   : > { %1851 = vpow2.f32 %v825_v26  ;;  %v1009_v11 = vmax.f32 %v997_v35, %v1001_v21  ;;  %v1013_v38 = vrot.slane %v2200_v7, 3  ;;  %v1014_v39 = vrot.slane %v2202_v8, 3 }
  0xd3   : > { %1853 = vpow2.f32 %v827_v28  ;;  %v1010_v40 = vmax.f32 %v998_v43, %v1002_v24  ;;  %v1011_v46 = vmax.f32 %v999_v27, %v1003_v25  ;;  %v1012_v54 = vmax.f32 %v1000_v37, %v1004_v6 }
  0xd4   : > { %1855 = vpow2.f32 %v913_v30  ;;  %v1015_v58 = vrot.slane %v2204_v9, 3  ;;  %v1016_v59 = vrot.slane %v2206_v10, 3  ;;  %v1021_v60 = vmax.f32 %v1009_v11, %v1013_v38 }
  0xd5   : > { %1857 = vpow2.f32 %v915_v36  ;;  %v1022_v50 = vmax.f32 %v1010_v40, %v1014_v39 }
  0xd6   : > { %1859 = vpow2.f32 %v917_v41  ;;  %v1023_v52 = vmax.f32 %v1011_v46, %v1015_v58  ;;  %v1024_v53 = vmax.f32 %v1012_v54, %v1016_v59  ;;  %v1028_v61 = vrot.slane %v1021_v60, %v2078_v16 }
  0xd7   : > { %1861 = vpow2.f32 %v919_v42  ;;  %v1032_v62 = vrot.slane %v1022_v50, %v2078_v16  ;;  %v1120_v63 = vrot.slane %v1021_v60, %v2080_v17  ;;  %v1124_v0 = vrot.slane %v1022_v50, %v2080_v17 }
  0xd8   : > { %v1036_v12 = vrot.slane %v1023_v52, %v2078_v16  ;;  %v1040_v13 = vrot.slane %v1024_v53, %v2078_v16  ;;  %v1041_v34 = vsub.f32 %v2200_v7, %v1028_v61  ;;  %v1128_v35 = vrot.slane %v1023_v52, %v2080_v17 }
  0xd9   : > { %v1042_v43 = vsub.f32 %v2202_v8, %v1032_v62  ;;  %v1132_v44 = vrot.slane %v1024_v53, %v2080_v17  ;;  %v1133_v45 = vsub.f32 %v2200_v7, %v1120_v63  ;;  %v1134_v47 = vsub.f32 %v2202_v8, %v1124_v0 }
  0xda   : > { %v2249_v48 = vpop.eup %1847  ;;  %v1043_v49 = vsub.f32 %v2204_v9, %v1036_v12  ;;  %v1044_v55 = vsub.f32 %v2206_v10, %v1040_v13  ;;  %v1045_v56 = vmul.f32 1.442695, %v1041_v34  ;;  %v1135_v57 = vsub.f32 %v2204_v9, %v1128_v35 }
  0xdb   : > { %v2254_v1 = vpop.eup %1849  ;;  %v1047_v2 = vmul.f32 1.442695, %v1042_v43  ;;  %v1136_v3 = vsub.f32 %v2206_v10, %v1132_v44  ;;  %v1137_v4 = vmul.f32 1.442695, %v1133_v45  ;;  %v1139_v5 = vmul.f32 1.442695, %v1134_v47 }
  0xdc   : > { %v2257_v14 = vpop.eup %1851  ;;  %1863 = vpow2.f32 %v1045_v56  ;;  %v1049_v7 = vmul.f32 1.442695, %v1043_v49  ;;  %v1051_v8 = vmul.f32 1.442695, %v1044_v55  ;;  %v1141_v15 = vmul.f32 1.442695, %v1135_v57 }
  0xdd   : > { %v2259_v18 = vpop.eup %1853  ;;  %1865 = vpow2.f32 %v1047_v2  ;;  %v1143_v19 = vmul.f32 1.442695, %v1136_v3  ;;  %v833_v20 = vrot.slane %v2249_v48, 1  ;;  %v834_v9 = vrot.slane %v2254_v1, 1 }
  0xde   : > { %v2263_v26 = vpop.eup %1855  ;;  %1867 = vpow2.f32 %v1049_v7  ;;  %v835_v10 = vrot.slane %v2257_v14, 1  ;;  %v836_v27 = vrot.slane %v2259_v18, 1  ;;  %v845_v28 = vrot.slane %v2249_v48, 2 }
  0xdf   : > { %v2268_v30 = vpop.eup %1857  ;;  %1869 = vpow2.f32 %v1051_v8  ;;  %v925_v36 = vrot.slane %v2263_v26, 1  ;;  %v937_v37 = vrot.slane %v2263_v26, 2  ;;  %v949_v41 = vrot.slane %v2263_v26, 3 }
  0xe0   : > { %v2273_v42 = vpop.eup %1859  ;;  %1871 = vpow2.f32 %v1137_v4  ;;  %v926_v21 = vrot.slane %v2268_v30, 1  ;;  %v938_v24 = vrot.slane %v2268_v30, 2  ;;  %v950_v25 = vrot.slane %v2268_v30, 3 }
  0xe1   : > { %v2278_v6 = vpop.eup %1861  ;;  %1873 = vpow2.f32 %v1139_v5  ;;  %v927_v11 = vrot.slane %v2273_v42, 1  ;;  %v933_v38 = vadd.f32 %v2263_v26, %v925_v36  ;;  %v939_v39 = vrot.slane %v2273_v42, 2 }
  0xe2   : > { %1875 = vpow2.f32 %v1141_v15  ;;  %v928_v40 = vrot.slane %v2278_v6, 1  ;;  %v934_v46 = vadd.f32 %v2268_v30, %v926_v21  ;;  %v940_v54 = vrot.slane %v2278_v6, 2 }
  0xe3   : > { %1877 = vpow2.f32 %v1143_v19  ;;  %v935_v58 = vadd.f32 %v2273_v42, %v927_v11  ;;  %v945_v59 = vadd.f32 %v937_v37, %v933_v38  ;;  %v951_v60 = vrot.slane %v2273_v42, 3 }
  0xe4   : > { %v936_v50 = vadd.f32 %v2278_v6, %v928_v40  ;;  %v946_v52 = vadd.f32 %v938_v24, %v934_v46  ;;  %v952_v53 = vrot.slane %v2278_v6, 3  ;;  %v841_v61 = vadd.f32 %v2249_v48, %v833_v20 }
  0xe5   : > { %v947_v62 = vadd.f32 %v939_v39, %v935_v58  ;;  %v957_v63 = vadd.f32 %v949_v41, %v945_v59  ;;  %v842_v0 = vadd.f32 %v2254_v1, %v834_v9  ;;  %v843_v12 = vadd.f32 %v2257_v14, %v835_v10 }
  0xe6   : > { %v2293_v13 = vpop.eup %1863  ;;  %v948_v34 = vadd.f32 %v940_v54, %v936_v50  ;;  %v958_v35 = vadd.f32 %v950_v25, %v946_v52  ;;  %v844_v43 = vadd.f32 %v2259_v18, %v836_v27  ;;  %v846_v44 = vrot.slane %v2254_v1, 2 }
  0xe7   : > { %v2297_v45 = vpop.eup %1865  ;;  %v959_v47 = vadd.f32 %v951_v60, %v947_v62  ;;  %v964_v49 = vrot.slane %v957_v63, %v2080_v17  ;;  %v1057_v55 = vrot.slane %v2293_v13, 1  ;;  %v1069_v56 = vrot.slane %v2293_v13, 2 }
  0xe8   : > { %v2302_v57 = vpop.eup %1867  ;;  %v960_v2 = vadd.f32 %v952_v53, %v948_v34  ;;  %v968_v3 = vrot.slane %v958_v35, %v2080_v17  ;;  %v1058_v4 = vrot.slane %v2297_v45, 1  ;;  %v1070_v5 = vrot.slane %v2297_v45, 2 }
  0xe9   : > { %v2307_v7 = vpop.eup %1869  ;;  %v972_v8 = vrot.slane %v959_v47, %v2080_v17  ;;  %1879 = vrcp.f32 %v964_v49  ;;  %v1059_v15 = vrot.slane %v2302_v57, 1  ;;  %v1065_v19 = vadd.f32 %v2293_v13, %v1057_v55 }
  0xea   : > { %v2312_v20 = vpop.eup %1871  ;;  %v976_v9 = vrot.slane %v960_v2, %v2080_v17  ;;  %1881 = vrcp.f32 %v968_v3  ;;  %v1060_v10 = vrot.slane %v2307_v7, 1  ;;  %v1066_v27 = vadd.f32 %v2297_v45, %v1058_v4 }
  0xeb   : > { %v2319_v36 = vpop.eup %1873  ;;  %1883 = vrcp.f32 %v972_v8  ;;  %v1067_v37 = vadd.f32 %v2302_v57, %v1059_v15  ;;  %v1071_v41 = vrot.slane %v2302_v57, 2  ;;  %v1072_v21 = vrot.slane %v2307_v7, 2 }
  0xec   : > { %v2324_v24 = vpop.eup %1875  ;;  %1885 = vrcp.f32 %v976_v9  ;;  %v1068_v25 = vadd.f32 %v2307_v7, %v1060_v10  ;;  %v1077_v11 = vadd.f32 %v1069_v56, %v1065_v19  ;;  %v1078_v38 = vadd.f32 %v1070_v5, %v1066_v27 }
  0xed   : > { %v2327_v39 = vpop.eup %1877  ;;  %v1079_v40 = vadd.f32 %v1071_v41, %v1067_v37  ;;  %v1081_v46 = vrot.slane %v2293_v13, 3  ;;  %v1082_v54 = vrot.slane %v2297_v45, 3  ;;  %v1083_v58 = vrot.slane %v2302_v57, 3 }
  0xee   : > { %v1080_v59 = vadd.f32 %v1072_v21, %v1068_v25  ;;  %v1084_v60 = vrot.slane %v2307_v7, 3  ;;  %v847_v50 = vrot.slane %v2257_v14, 2  ;;  %v848_v52 = vrot.slane %v2259_v18, 2 }
  0xef   : > { %v1089_v53 = vadd.f32 %v1081_v46, %v1077_v11  ;;  %v1090_v62 = vadd.f32 %v1082_v54, %v1078_v38  ;;  %v1091_v63 = vadd.f32 %v1083_v58, %v1079_v40  ;;  %v853_v34 = vadd.f32 %v845_v28, %v841_v61 }
  0xf0   : > { %v1092_v35 = vadd.f32 %v1084_v60, %v1080_v59  ;;  %v854_v47 = vadd.f32 %v846_v44, %v842_v0  ;;  %v855_v49 = vadd.f32 %v847_v50, %v843_v12  ;;  %v856_v55 = vadd.f32 %v848_v52, %v844_v43 }
  0xf1   : > { %v1096_v56 = vrot.slane %v1089_v53, %v2078_v16  ;;  %v1100_v2 = vrot.slane %v1090_v62, %v2078_v16  ;;  %v1104_v3 = vrot.slane %v1091_v63, %v2078_v16  ;;  %v857_v4 = vrot.slane %v2249_v48, 3 }
  0xf2   : > { %v1214_v5 = vstv %s2314_s16  ;;  %v1108_v8 = vrot.slane %v1092_v35, %v2078_v16  ;;  %v858_v15 = vrot.slane %v2254_v1, 3  ;;  %v859_v19 = vrot.slane %v2257_v14, 3 }
  0xf3   : > { %v1880_v28 = vpop.eup %1879  ;;  %1887 = vrcp.f32 %v1096_v56  ;;  %v860_v61 = vrot.slane %v2259_v18, 3  ;;  %v865_v0 = vadd.f32 %v857_v4, %v853_v34  ;;  %v1149_v12 = vrot.slane %v2312_v20, 1 }
  0xf4   : > { %v1882_v43 = vpop.eup %1881  ;;  %v978_v44 = vmul.f32 %v1880_v28, %v2263_v26  ;;  %1889 = vrcp.f32 %v1100_v2  ;;  %v866_v9 = vadd.f32 %v858_v15, %v854_v47  ;;  %v867_v10 = vadd.f32 %v859_v19, %v855_v49 }
  0xf5   : > { %v1884_v27 = vpop.eup %1883  ;;  %v980_v37 = vmul.f32 %v1882_v43, %v2268_v30  ;;  %1891 = vrcp.f32 %v1104_v3  ;;  %v868_v41 = vadd.f32 %v860_v61, %v856_v55  ;;  %v1150_v21 = vrot.slane %v2319_v36, 1 }
  0xf6   : > { %v1886_v25 = vpop.eup %1885  ;;  %v982_v11 = vmul.f32 %v1884_v27, %v2273_v42  ;;  %1893 = vrcp.f32 %v1108_v8  ;;  %v1215_v38 = vmul.f32 %v1214_v5, %v978_v44  ;;  %v872_v40 = vrot.slane %v865_v0, %v2078_v16 }
  0xf7   : > { %v984_v46 = vmul.f32 %v1886_v25, %v2278_v6  ;;  %v1216_v26 = vmul.f32 %v1214_v5, %v980_v37  ;;  %v876_v54 = vrot.slane %v866_v9, %v2078_v16  ;;  %v880_v59 = vrot.slane %v867_v10, %v2078_v16 }
  0xf8   : > { %v1217_v58 = vmul.f32 %v1214_v5, %v982_v11  ;;  %v1151_v30 = vrot.slane %v2324_v24, 1  ;;  %v2357_v50 = vsub.f32 %v2235_v51, %v1215_v38  ;;  %v884_v42 = vrot.slane %v868_v41, %v2078_v16 }
  0xf9   : > { %v1218_v60 = vmul.f32 %v1214_v5, %v984_v46  ;;  %v1152_v52 = vrot.slane %v2327_v39, 1  ;;  %v2362_v53 = vsub.f32 %v2235_v51, %v1216_v26  ;;  %1895 = vrcp.f32 %v872_v40 }
  0xfa   : > { %v1157_v6 = vadd.f32 %v2312_v20, %v1149_v12  ;;  %v1158_v62 = vadd.f32 %v2319_v36, %v1150_v21  ;;  %v2367_v63 = vsub.f32 %v2235_v51, %v1217_v58  ;;  %1897 = vrcp.f32 %v876_v54 }
  0xfb   : > { %v1159_v34 = vadd.f32 %v2324_v24, %v1151_v30  ;;  %v1160_v35 = vadd.f32 %v2327_v39, %v1152_v52  ;;  %1899 = vrcp.f32 %v880_v59  ;;  %v1161_v47 = vrot.slane %v2312_v20, 2 }
  0xfc   : > { %v1162_v49 = vrot.slane %v2319_v36, 2  ;;  %v1163_v55 = vrot.slane %v2324_v24, 2  ;;  %v2375_v2 = vsub.f32 %v2235_v51, %v1218_v60  ;;  %v1164_v3 = vrot.slane %v2327_v39, 2 }
  0xfd   : > { %v1888_v56 = vpop.eup %1887  ;;  %v1173_v4 = vrot.slane %v2312_v20, 3  ;;  %v1174_v5 = vrot.slane %v2319_v36, 3  ;;  %v1169_v19 = vadd.f32 %v1161_v47, %v1157_v6  ;;  %v1175_v51 = vrot.slane %v2324_v24, 3 }
  0xfe   : > { %v1890_v8 = vpop.eup %1889  ;;  %v2381_v15 = vmul.f32 %v1888_v56, %v2293_v13  ;;  %v1170_v28 = vadd.f32 %v1162_v49, %v1158_v62  ;;  %v1171_v61 = vadd.f32 %v1163_v55, %v1159_v34  ;;  %v1172_v43 = vadd.f32 %v1164_v3, %v1160_v35 }
  0xff   : > { %v1892_v0 = vpop.eup %1891  ;;  %v2384_v12 = vmul.f32 %v1890_v8, %v2297_v45  ;;  %v1176_v44 = vrot.slane %v2327_v39, 3  ;;  %v1181_v13 = vadd.f32 %v1173_v4, %v1169_v19  ;;  %1901 = vrcp.f32 %v884_v42 }
 0x100   : > { %v1894_v9 = vpop.eup %1893  ;;  %v2389_v10 = vmul.f32 %v1892_v0, %v2302_v57  ;;  %v1227_v27 = vrot.slane %v2381_v15, 4  ;;  %v1182_v37 = vadd.f32 %v1174_v5, %v1170_v28  ;;  %v1183_v45 = vadd.f32 %v1175_v51, %v1171_v61 }
 0x101   : > { %v2393_v41 = vmul.f32 %v1894_v9, %v2307_v7  ;;  %v1228_v21 = vrot.slane %v2384_v12, 4  ;;  %v1184_v25 = vadd.f32 %v1176_v44, %v1172_v43  ;;  %v1188_v57 = vrot.slane %v1181_v13, %v2080_v17 }
 0x102   : > { %v1229_v11 = vrot.slane %v2389_v10, 4  ;;  %v1235_v38 = vmul.f32 %v1227_v27, %v2357_v50  ;;  %v1192_v40 = vrot.slane %v1182_v37, %v2080_v17  ;;  %v1196_v7 = vrot.slane %v1183_v45, %v2080_v17 }
 0x103   : > { %v1230_v46 = vrot.slane %v2393_v41, 4  ;;  %v1236_v26 = vmul.f32 %v1228_v21, %v2362_v53  ;;  %v1896_v54 = vpop.eup %1895  ;;  %1903 = vrcp.f32 %v1188_v57  ;;  %v1200_v42 = vrot.slane %v1184_v25, %v2080_v17 }
 0x104   : > { %v1237_v58 = vmul.f32 %v1229_v11, %v2367_v63  ;;  %v1243_v59 = vrot.slane %v1235_v38, 4  ;;  %v1898_v30 = vpop.eup %1897  ;;  %1905 = vrcp.f32 %v1192_v40  ;;  %v886_v8 = vmul.f32 %v1896_v54, %v2249_v48 }
 0x105   : > { %v1238_v60 = vmul.f32 %v1230_v46, %v2375_v2  ;;  %v1244_v52 = vrot.slane %v1236_v26, 4  ;;  %v1900_v6 = vpop.eup %1899  ;;  %1907 = vrcp.f32 %v1196_v7  ;;  %v1417_v61 = vstv %s2398_s17 }
 0x106   : > { %v1245_v62 = vrot.slane %v1237_v58, 4  ;;  %v1252_v34 = vsel %vm1251_vm0, %v1243_v59, 0.0  ;;  %1909 = vrcp.f32 %v1200_v42  ;;  %v888_v37 = vmul.f32 %v1898_v30, %v2254_v1 }
 0x107   : > { %v1246_v35 = vrot.slane %v1238_v60, 4  ;;  %v1253_v47 = vrot.slane %v1252_v34, 4  ;;  %v1259_v49 = vsel %vm1251_vm0, %v1244_v52, 0.0  ;;  %v1418_v21 = vmul.f32 %v1417_v61, %v886_v8 }
 0x108   : > { %v1260_v55 = vrot.slane %v1259_v49, 4  ;;  %v1266_v56 = vsel %vm1251_vm0, %v1245_v62, 0.0  ;;  %v1414_v11 = vstv %s1793_s18  ;;  %v890_v38 = vmul.f32 %v1900_v6, %v2257_v14 }
 0x109   : > { %v1254_v3 = vadd.f32 %v1253_v47, %v1252_v34  ;;  %v1267_v4 = vrot.slane %v1266_v56, 4  ;;  %v1273_v5 = vsel %vm1251_vm0, %v1246_v35, 0.0  ;;  %v1902_v9 = vpop.eup %1901  ;;  %v1419_v30 = vmul.f32 %v1417_v61, %v888_v37 }
 0x10a   : > { %v1261_v19 = vadd.f32 %v1260_v55, %v1259_v49  ;;  %v1274_v28 = vrot.slane %v1273_v5, 4  ;;  %v892_v54 = vmul.f32 %v1902_v9, %v2259_v18  ;;  %v2420_v52 = vsub.f32 %v1414_v11, %v1418_v21  ;;  %v1303_v9 = vpop.permute.xlu1 %1302 }
 0x10b   : > { %v1255_v0 = vrot.slane %v1254_v3, 2  ;;  %v1268_v43 = vadd.f32 %v1267_v4, %v1266_v56  ;;  %v1420_v14 = vmul.f32 %v1417_v61, %v890_v38 }
 0x10c   : > { %v1262_v51 = vrot.slane %v1261_v19, 2  ;;  %v1275_v44 = vadd.f32 %v1274_v28, %v1273_v5  ;;  %v1421_v56 = vmul.f32 %v1417_v61, %v892_v54 }
 0x10d   : > { %v1256_v27 = vadd.f32 %v1255_v0, %v1254_v3  ;;  %v1269_v13 = vrot.slane %v1268_v43, 2  ;;  %v1904_v48 = vpop.eup %1903  ;;  %v2431_v3 = vsub.f32 %v1414_v11, %v1419_v30 }
 0x10e   : > { %v1263_v45 = vadd.f32 %v1262_v51, %v1261_v19  ;;  %v1276_v25 = vrot.slane %v1275_v44, 2  ;;  %v1906_v46 = vpop.eup %1905  ;;  %v2418_v58 = vmul.f32 %v1904_v48, %v2312_v20  ;;  %v2443_v61 = vsub.f32 %v1414_v11, %v1421_v56  ;;  %v1331_v54 = vpop.permute.xlu1 %1330 }
 0x10f   : > { %v1257_v57 = vrot.slane %v1256_v27, 1  ;;  %v1270_v40 = vadd.f32 %v1269_v13, %v1268_v43  ;;  %v1908_v59 = vpop.eup %1907  ;;  %v2424_v35 = vmul.f32 %v1906_v46, %v2319_v36 }
 0x110   : > { %v1264_v26 = vrot.slane %v1263_v45, 1  ;;  %v1277_v7 = vadd.f32 %v1276_v25, %v1275_v44  ;;  %v1430_v18 = vrot.slane %v2418_v58, 4  ;;  %v1910_v47 = vpop.eup %1909  ;;  %v2428_v49 = vmul.f32 %v1908_v59, %v2324_v24 }
 0x111   : > { %v1258_v60 = vadd.f32 %v1257_v57, %v1256_v27  ;;  %v1271_v1 = vrot.slane %v1270_v40, 1  ;;  %v2438_v8 = vmul.f32 %v1910_v47, %v2327_v39  ;;  %v1431_v19 = vrot.slane %v2424_v35, 4 }
 0x112   : > { %v1265_v62 = vadd.f32 %v1264_v26, %v1263_v45  ;;  %v1278_v34 = vrot.slane %v1277_v7, 1  ;;  %v1438_v4 = vmul.f32 %v1430_v18, %v2420_v52  ;;  %v1432_v28 = vrot.slane %v2428_v49, 4 }
 0x113   : > { %v1272_v6 = vadd.f32 %v1271_v1, %v1270_v40  ;;  %v1280_v42 = vsub.f32 %v2357_v50, %v1258_v60  ;;  %v2435_v50 = vsub.f32 %v1414_v11, %v1420_v14  ;;  %v1439_v0 = vmul.f32 %v1431_v19, %v2431_v3 }
 0x114   : > { %v1279_v20 = vadd.f32 %v1278_v34, %v1277_v7  ;;  %v1281_v55 = vsub.f32 %v2362_v53, %v1265_v62  ;;  %v1442_v43 = vsel %vm1251_vm0, %v1438_v4, 0.0  ;;  %v1433_v39 = vrot.slane %v2438_v8, 4 }
 0x115   : > { %v1282_v5 = vsub.f32 %v2367_v63, %v1272_v6  ;;  %v1288_v36 = vrot.slane %v1280_v42, 4  ;;  %v1440_v51 = vmul.f32 %v1432_v28, %v2435_v50  ;;  %v1449_v21 = vsel %vm1251_vm0, %v1439_v0, 0.0 }
 0x116   : > { %v1283_v24 = vsub.f32 %v2375_v2, %v1279_v20  ;;  %v1289_v53 = vrot.slane %v1281_v55, 4  ;;  %v1443_v2 = vrot.slane %v1442_v43, 4  ;;  %v1441_v37 = vmul.f32 %v1433_v39, %v2443_v61 }
 0x117   : > { %v1290_v63 = vrot.slane %v1282_v5, 4  ;;  %v2449_v44 = vmul.f32 %v1288_v36, %v2381_v15  ;;  %v1456_v25 = vsel %vm1251_vm0, %v1440_v51, 0.0  ;;  %v1450_v57 = vrot.slane %v1449_v21, 4 }
 0x118   : > { %v1291_v27 = vrot.slane %v1283_v24, 4  ;;  %v2453_v13 = vmul.f32 %v1289_v53, %v2384_v12  ;;  %v1444_v48 = vadd.f32 %v1443_v2, %v1442_v43  ;;  %v1457_v46 = vrot.slane %v1456_v25, 4  ;;  %v1387_v43 = vpop.permute.xlu1 %1386 }
 0x119   : > { %v2458_v45 = vmul.f32 %v1290_v63, %v2389_v10  ;;  %v1308_v15 = vrot.slane %v2449_v44, %v2078_v16  ;;  %v1336_v11 = vrot.slane %v2449_v44, %v2086_v22  ;;  %v1392_v12 = vrot.slane %v2449_v44, %v2108_v32 }
 0x11a   : > { %v2466_v38 = vmul.f32 %v1291_v27, %v2393_v41  ;;  %v1312_v10 = vrot.slane %v2453_v13, %v2078_v16  ;;  %v1340_v40 = vrot.slane %v2453_v13, %v2086_v22  ;;  %v1463_v26 = vsel %vm1251_vm0, %v1441_v37, 0.0 }
 0x11b   : > { %v1316_v7 = vrot.slane %v2458_v45, %v2078_v16  ;;  %v1445_v41 = vrot.slane %v1444_v48, 2  ;;  %v1451_v59 = vadd.f32 %v1450_v57, %v1449_v21  ;;  %v1464_v60 = vrot.slane %v1463_v26, 4 }
 0x11c   : > { %v1321_v1 = vmul.f32 %v1308_v15, %v1303_v9  ;;  %v1344_v30 = vrot.slane %v2458_v45, %v2086_v22  ;;  %v1349_v62 = vmul.f32 %v1336_v11, %v1331_v54  ;;  %v1458_v34 = vadd.f32 %v1457_v46, %v1456_v25 }
 0x11d   : > { %v1320_v14 = vrot.slane %v2466_v38, %v2078_v16  ;;  %v1446_v6 = vadd.f32 %v1445_v41, %v1444_v48  ;;  %v1452_v42 = vrot.slane %v1451_v59, 2  ;;  %v1465_v18 = vadd.f32 %v1464_v60, %v1463_v26  ;;  %v1492_v60 = vpop.permute.xlu1 %1491 }
 0x11e   : > { %v1322_v47 = vmul.f32 %v1312_v10, %v1303_v9  ;;  %v1348_v20 = vrot.slane %v2466_v38, %v2086_v22  ;;  %v1396_v55 = vrot.slane %v2453_v13, %v2108_v32  ;;  %v1459_v56 = vrot.slane %v1458_v34, 2 }
 0x11f   : > { %v1350_v4 = vmul.f32 %v1340_v40, %v1331_v54  ;;  %v1447_v5 = vrot.slane %v1446_v6, 1  ;;  %v1453_v36 = vadd.f32 %v1452_v42, %v1451_v59  ;;  %v1466_v19 = vrot.slane %v1465_v18, 2 }
 0x120   : > { %v1323_v24 = vmul.f32 %v1316_v7, %v1303_v9  ;;  %v1351_v28 = vmul.f32 %v1344_v30, %v1331_v54  ;;  %v1353_v53 = vadd.f32 %v1349_v62, %v1321_v1  ;;  %v1460_v0 = vadd.f32 %v1459_v56, %v1458_v34  ;;  %v1359_v7 = vpop.permute.xlu0 %1358 }
 0x121   : > { %v1324_v16 = vmul.f32 %v1320_v14, %v1303_v9  ;;  %v1448_v63 = vadd.f32 %v1447_v5, %v1446_v6  ;;  %v1454_v51 = vrot.slane %v1453_v36, 1  ;;  %v1467_v39 = vadd.f32 %v1466_v19, %v1465_v18 }
 0x122   : > { %v1352_v27 = vmul.f32 %v1348_v20, %v1331_v54  ;;  %v1461_v2 = vrot.slane %v1460_v0, 1  ;;  %v1364_v22 = vrot.slane %v2449_v44, %v2102_v29  ;;  %v1368_v37 = vrot.slane %v2453_v13, %v2102_v29 }
 0x123   : > { %v1455_v21 = vadd.f32 %v1454_v51, %v1453_v36  ;;  %v1468_v25 = vrot.slane %v1467_v39, 1  ;;  %v1470_v15 = vsub.f32 %v2420_v52, %v1448_v63  ;;  %v1372_v11 = vrot.slane %v2458_v45, %v2102_v29 }
 0x124   : > { %v1354_v9 = vadd.f32 %v1350_v4, %v1322_v47  ;;  %v1400_v48 = vrot.slane %v2458_v45, %v2108_v32  ;;  %v1462_v57 = vadd.f32 %v1461_v2, %v1460_v0  ;;  %v1376_v10 = vrot.slane %v2466_v38, %v2102_v29  ;;  %v1520_v63 = vpop.permute.xlu0 %1519 }
 0x125   : > { %v1355_v40 = vadd.f32 %v1351_v28, %v1323_v24  ;;  %v1469_v46 = vadd.f32 %v1468_v25, %v1467_v39  ;;  %v1471_v26 = vsub.f32 %v2431_v3, %v1455_v21  ;;  %v1478_v13 = vrot.slane %v1470_v15, 4  ;;  %v1548_v28 = vpop.permute.xlu1 %1547 }
 0x126   : > { %v1356_v54 = vadd.f32 %v1352_v27, %v1324_v16  ;;  %v1472_v52 = vsub.f32 %v2435_v50, %v1462_v57  ;;  %v1377_v41 = vmul.f32 %v1364_v22, %v1359_v7  ;;  %v1378_v59 = vmul.f32 %v1368_v37, %v1359_v7 }
 0x127   : > { %v1473_v1 = vsub.f32 %v2443_v61, %v1469_v46  ;;  %v1479_v30 = vrot.slane %v1471_v26, 4  ;;  %v1486_v45 = vmul.f32 %v1478_v13, %v2418_v58  ;;  %v1379_v62 = vmul.f32 %v1372_v11, %v1359_v7 }
 0x128   : > { %v1404_v29 = vrot.slane %v2466_v38, %v2108_v32  ;;  %v1480_v34 = vrot.slane %v1472_v52, 4  ;;  %v1380_v14 = vmul.f32 %v1376_v10, %v1359_v7  ;;  %v1381_v3 = vadd.f32 %v1377_v41, %v1353_v53 }
 0x129   : > { %v1481_v6 = vrot.slane %v1473_v1, 4  ;;  %v1487_v42 = vmul.f32 %v1479_v30, %v2424_v35  ;;  %v1382_v18 = vadd.f32 %v1378_v59, %v1354_v9  ;;  %v1383_v50 = vadd.f32 %v1379_v62, %v1355_v40  ;;  %v1576_v9 = vpop.permute.xlu1 %1575 }
 0x12a   : > { %v1405_v47 = vmul.f32 %v1392_v12, %v1387_v43  ;;  %v1488_v61 = vmul.f32 %v1480_v34, %v2428_v49  ;;  %v1497_v58 = vrot.slane %v1486_v45, %v2080_v17  ;;  %v1384_v20 = vadd.f32 %v1380_v14, %v1356_v54 }
 0x12b   : > { %v1406_v56 = vmul.f32 %v1396_v55, %v1387_v43  ;;  %v1407_v4 = vmul.f32 %v1400_v48, %v1387_v43  ;;  %v1489_v38 = vmul.f32 %v1481_v6, %v2438_v8  ;;  %v1501_v5 = vrot.slane %v1487_v42, %v2080_v17 }
 0x12c   : > { %v1408_v36 = vmul.f32 %v1404_v29, %v1387_v43  ;;  %v1505_v35 = vrot.slane %v1488_v61, %v2080_v17  ;;  %v1409_v19 = vadd.f32 %v1405_v47, %v1381_v3  ;;  %v1510_v12 = vmul.f32 %v1497_v58, %v1492_v60 }
 0x12d   : > { %v1509_v24 = vrot.slane %v1489_v38, %v2080_v17  ;;  %v1410_v32 = vadd.f32 %v1406_v56, %v1382_v18  ;;  %v1411_v44 = vadd.f32 %v1407_v4, %v1383_v50  ;;  %v1525_v53 = vrot.slane %v1486_v45, %v2088_v23 }
 0x12e   : > { %v1412_v49 = vadd.f32 %v1408_v36, %v1384_v20  ;;  %v1511_v0 = vmul.f32 %v1501_v5, %v1492_v60  ;;  %v1512_v55 = vmul.f32 %v1505_v35, %v1492_v60  ;;  %v1553_v16 = vrot.slane %v1486_v45, %v2106_v31 }
 0x12f   : > { %v1581_v8 = vrot.slane %v1486_v45, %v2110_v33  ;;  %v1513_v43 = vmul.f32 %v1509_v24, %v1492_v60  ;;  %v1557_v51 = vrot.slane %v1487_v42, %v2106_v31  ;;  %v1561_v39 = vrot.slane %v1488_v61, %v2106_v31 }
 0x130   : > { %v1514_v17 = vadd.f32 %v1510_v12, %v1409_v19  ;;  %v1515_v27 = vadd.f32 %v1511_v0, %v1410_v32  ;;  %v1516_v2 = vadd.f32 %v1512_v55, %v1411_v44  ;;  %v1529_v22 = vrot.slane %v1487_v42, %v2088_v23 }
 0x131   : > { %v1533_v37 = vrot.slane %v1488_v61, %v2088_v23  ;;  %v1565_v21 = vrot.slane %v1489_v38, %v2106_v31  ;;  %v1517_v25 = vadd.f32 %v1513_v43, %v1412_v49  ;;  %v1537_v15 = vrot.slane %v1489_v38, %v2088_v23 }
 0x132   : > { %v1538_v11 = vmul.f32 %v1525_v53, %v1520_v63  ;;  %v1585_v48 = vrot.slane %v1487_v42, %v2110_v33  ;;  %v1589_v57 = vrot.slane %v1488_v61, %v2110_v33  ;;  %v1539_v10 = vmul.f32 %v1529_v22, %v1520_v63 }
 0x133   : > { %v1540_v40 = vmul.f32 %v1533_v37, %v1520_v63  ;;  %v1566_v46 = vmul.f32 %v1553_v16, %v1548_v28  ;;  %v1593_v26 = vrot.slane %v1489_v38, %v2110_v33  ;;  %v1541_v13 = vmul.f32 %v1537_v15, %v1520_v63 }
 0x134   : > { %v1542_v7 = vadd.f32 %v1538_v11, %v1514_v17  ;;  %v1567_v54 = vmul.f32 %v1557_v51, %v1548_v28  ;;  %v1568_v52 = vmul.f32 %v1561_v39, %v1548_v28  ;;  %v1543_v41 = vadd.f32 %v1539_v10, %v1515_v27 }
 0x135   : > { %v1544_v31 = vadd.f32 %v1540_v40, %v1516_v2  ;;  %v1569_v59 = vmul.f32 %v1565_v21, %v1548_v28  ;;  %v1594_v60 = vmul.f32 %v1581_v8, %v1576_v9  ;;  %v1545_v23 = vadd.f32 %v1541_v13, %v1517_v25 }
 0x136   : > { %v1570_v1 = vadd.f32 %v1566_v46, %v1542_v7  ;;  %v1595_v30 = vmul.f32 %v1585_v48, %v1576_v9  ;;  %v1596_v45 = vmul.f32 %v1589_v57, %v1576_v9  ;;  %v1571_v62 = vadd.f32 %v1567_v54, %v1543_v41 }
 0x137   : > { %v1572_v29 = vadd.f32 %v1568_v52, %v1544_v31  ;;  %v1597_v34 = vmul.f32 %v1593_v26, %v1576_v9  ;;  %v1573_v14 = vadd.f32 %v1569_v59, %v1545_v23 }
 0x138   : > { %v1598_v3 = vadd.f32 %v1594_v60, %v1570_v1  ;;  %v1599_v6 = vadd.f32 %v1595_v30, %v1571_v62 }
 0x139   : > { %v1600_v33 = vadd.f32 %v1596_v45, %v1572_v29  ;;  %v1601_v42 = vadd.f32 %v1597_v34, %v1573_v14 }
 0x13a   : > { %v1602_v18 = vmul.f32 10.0, %v1598_v3  ;;  %v1603_v50 = vmul.f32 10.0, %v1599_v6 }
 0x13b   : > { %v1604_v47 = vmul.f32 10.0, %v1600_v33  ;;  %v1605_v61 = vmul.f32 10.0, %v1601_v42 }
 0x13c   : > { %v1616_v58 = vmul.f32 %v1602_v18, %v1602_v18  ;;  %v1610_v20 = vcombine.low %v1602_v18, %v1603_v50  ;;  %v1617_v56 = vmul.f32 %v1603_v50, %v1603_v50 }
 0x13d   : > { %v1618_v4 = vmul.f32 %v1604_v47, %v1604_v47  ;;  %v1611_v38 = vcombine.low %v1604_v47, %v1605_v61  ;;  %v1619_v5 = vmul.f32 %v1605_v61, %v1605_v61 }
 0x13e   : > { %v1620_v36 = vsel %vm1251_vm0, %v1616_v58, 0.0  ;;  %1614 = vst [vmem:[%s363_s21] sm:$0xff] %v1610_v20  ;;  %v1627_v19 = vsel %vm1251_vm0, %v1617_v56, 0.0 }
 0x13f   : > { %v1621_v35 = vrot.slane %v1620_v36, 4  ;;  %v1634_v24 = vsel %vm1251_vm0, %v1618_v4, 0.0  ;;  %1615 = vst [vmem:[%s363_s21 + $0x8] sm:$0xff] %v1611_v38  ;;  %v1628_v28 = vrot.slane %v1627_v19, 4  ;;  %v1641_v44 = vsel %vm1251_vm0, %v1619_v5, 0.0 }
 0x140   : > { %v1635_v32 = vrot.slane %v1634_v24, 4  ;;  %v1642_v49 = vrot.slane %v1641_v44, 4 }
 0x141   : > { %v1622_v12 = vadd.f32 %v1621_v35, %v1620_v36  ;;  %v1629_v53 = vadd.f32 %v1628_v28, %v1627_v19 }
 0x142   : > { %v1636_v0 = vadd.f32 %v1635_v32, %v1634_v24  ;;  %v1643_v16 = vadd.f32 %v1642_v49, %v1641_v44 }
 0x143   : > { %v1623_v55 = vrot.slane %v1622_v12, 2  ;;  %v1630_v8 = vrot.slane %v1629_v53, 2 }
 0x144   : > { %v1637_v63 = vrot.slane %v1636_v0, 2  ;;  %v1644_v51 = vrot.slane %v1643_v16, 2 }
 0x145   : > { %v1624_v43 = vadd.f32 %v1623_v55, %v1622_v12  ;;  %v1631_v39 = vadd.f32 %v1630_v8, %v1629_v53 }
 0x146   : > { %v1638_v17 = vadd.f32 %v1637_v63, %v1636_v0  ;;  %v1645_v2 = vadd.f32 %v1644_v51, %v1643_v16 }
 0x147   : > { %v1625_v27 = vrot.slane %v1624_v43, 1  ;;  %v1632_v22 = vrot.slane %v1631_v39, 1 }
 0x148   : > { %v1639_v37 = vrot.slane %v1638_v17, 1  ;;  %v1646_v15 = vrot.slane %v1645_v2, 1 }
 0x149   : > { %v1626_v21 = vadd.f32 %v1625_v27, %v1624_v43  ;;  %v1633_v25 = vadd.f32 %v1632_v22, %v1631_v39 }
 0x14a   : > { %v1640_v11 = vadd.f32 %v1639_v37, %v1638_v17  ;;  %v1647_v48 = vadd.f32 %v1646_v15, %v1645_v2 }
 0x14b   : > { %v1648_v9 = vadd.f32 %v1633_v25, %v1626_v21 }
 0x14d   : > { %v1649_v57 = vadd.f32 %v1648_v9, %v1640_v11 }
 0x14f   : > { %v1650_v10 = vadd.f32 %v1649_v57, %v1647_v48 }
 0x151   : > { %1651 = vadd.xlane.f32.xlu0 %v1650_v10 }
 0x1de   : > { %v1652_v40 = vpop.xlane.xlu0 %1651 }
 0x1df   : > { %1654 = vst.msk [vmem:[%s368_s25] sm:$0xff] %vm1653_vm1, %v1652_v40 }
 0x1e0 PF: > { %s21_s27 = sadd.s32 1, %s1955_s27  }
 0x1e1   : > { %p18_p12 = scmp.ge.s32.totalorder %s21_s27, 4  }
 0x1e3   :  { %20 = sbr.rel (!%p18_p12) target bundleno = 2 (0x2), region = 102 }
 0x1ea   :  { %1691 = vsyncpa [#allocation3], 1 }
 0x1eb   :  { %1693 = vsyncpa [#allocation3 + $0x1], 1 }
 0x1ec   :  { %1694 = vsyncpa [#allocation5], 1 }

</bundles_post_ra>
